<compile_context>
chip_gen: v7x
topology: tpu7x:2x2x1
jax: 0.10.0
libtpu: 0.0.40
codegen_flags: <defaults>
</compile_context>

<pallas_src>
import functools

import jax
import jax.numpy as jnp
import numpy as np
from jax import lax
from jax.experimental import pallas as pl
from jax.experimental.pallas import tpu as pltpu

# ---- module config (cfg.ANCHOR_RATIOS etc., fixed in-script) ----------------
ANCHOR_RATIOS = (0.5, 1.0, 2.0)
A = len(ANCHOR_RATIOS)            # 3 anchors per location
NC_SCORE = 2 * A                  # nc_score_out = 6
NC_BBOX = 6 * A                   # nc_bbox_out  = 18
NC_HEAD = NC_SCORE + NC_BBOX      # merged 1x1 head width = 24
NC_SLAB = NC_HEAD + NC_SCORE      # merged output slab = 30 (cls|bbox|prob)
RPN_CH = 512                      # RPN_Conv output channels (fixed by module)
FOLD_MAX_CIN = 128                # keep the W-tap fold only for shallow Cin
MIN_TILE_ROWS_M = 256             # minimum MXU M (= th*Wrow) per grid step
XLA_FALLBACK_POSITIONS = 256      # levels with H*W below this go to plain XLA


# -----------------------------------------------------------------------------
# Fused kernel: one (batch, row-tile) step.
#   x_ref  : (1, 1, 2*mwin, Kc) bf16   stacked left|right halo'd windows
#   w_ref  : (n_taps, Kc, 512)  bf16   conv weights per tap (3 folded / 9 raw)
#   b_ref  : (1, 512)           f32    conv bias
#   wh_ref : (2, 512, 24)       bf16   merged cls|bbox head, split per side
#   bh_ref : (1, 24)            f32    merged head bias
#   out_ref: (1, m, 30)         f32    [cls 0:6 | bbox 6:24 | prob 24:30]
# -----------------------------------------------------------------------------
def _stereo_rpn_fused_kernel(x_ref, w_ref, b_ref, wh_ref, bh_ref, out_ref,
                             *, tap_offsets, m, mwin):
    def conv_relu(side):
        base = side * mwin
        off0 = base + tap_offsets[0]
        # init accumulator with the first tap's matmul (no zeros + add)
        acc = jnp.dot(x_ref[0, 0, off0:off0 + m, :], w_ref[0],
                      preferred_element_type=jnp.float32)
        for t in range(1, len(tap_offsets)):
            off = base + tap_offsets[t]
            acc += jnp.dot(x_ref[0, 0, off:off + m, :], w_ref[t],
                           preferred_element_type=jnp.float32)
        return jnp.maximum(acc + b_ref[...], 0.0).astype(jnp.bfloat16)

    # split-K head: the 1024-wide concatenated feature never materializes.
    feat_l = conv_relu(0)
    head = jnp.dot(feat_l, wh_ref[0], preferred_element_type=jnp.float32)
    feat_r = conv_relu(1)
    head = head + jnp.dot(feat_r, wh_ref[1], preferred_element_type=jnp.float32)
    head = head + bh_ref[...]                                   # (m, 24) f32

    # paired-channel softmax: PyTorch reshape(x, 2)/softmax(dim=1) pairs
    # channels (a, a + A).
    s0 = head[:, :A]
    s1 = head[:, A:NC_SCORE]
    mx = jnp.maximum(s0, s1)
    e0 = jnp.exp(s0 - mx)
    e1 = jnp.exp(s1 - mx)
    inv = pl.reciprocal(e0 + e1)                                # exact (EUP)

    out_ref[0, :, 0:NC_HEAD] = head                             # one 24-lane store
    out_ref[0, :, NC_HEAD:NC_HEAD + A] = e0 * inv
    out_ref[0, :, NC_HEAD + A:NC_SLAB] = e1 * inv


# -----------------------------------------------------------------------------
# Wrapper-side helpers: row stride, VMEM budgets, tile sizing, window prep.
# -----------------------------------------------------------------------------
def _row_stride(W, fold):
    need = W if fold else W + 2        # unfolded windows keep the L/R halo cols
    return -(-need // 16) * 16         # bf16 sublane alignment for tap offsets


def _vmem_budgets():
    """Per-chip (tile budget, scoped vmem limit); conservative fallback."""
    try:
        cap = int(pltpu.get_tpu_info().vmem_capacity_bytes)
        return cap // 4, (cap * 5) // 8     # ~32/80 MiB on 128-MiB chips, 16/40 on v7x
    except Exception:
        return 16 * 1024 * 1024, None


def _choose_tile_h(H, Wrow, kc, n_taps, win_extra, budget):
    def step_bytes(th):
        m = th * Wrow
        mwin = (th + win_extra) * Wrow
        inp = 2 * (2 * mwin) * kc * 2                       # stacked L|R, 2 bufs, bf16
        wgt = 2 * (n_taps * kc + 2 * NC_HEAD) * RPN_CH * 2  # conv + head wts, 2 bufs
        acc = m * RPN_CH * (4 + 2) + m * NC_SLAB * 4        # f32 acc + bf16 feat + head
        out = 2 * m * NC_SLAB * 4                           # merged slab, 2 bufs
        return inp + wgt + acc + out
    if step_bytes(H) <= budget:
        return H
    th_min = min(H, -(-MIN_TILE_ROWS_M // Wrow))            # keep MXU M >= 256
    th = H
    while th > th_min and step_bytes(th) > budget:
        th -= 1
    return th


def _prep_windows(x_nhwc, th, Wrow, fold):
    """bf16 cast + halo + overlapping, spatially pre-flattened row windows.

    fold=True : W-taps folded into channels (K = 3*Cin), th+2 rows per window.
    fold=False: raw channels (K = Cin), halo columns kept, th+3 rows per window
                (one zero slack row for the dw<=2 slice overhang).
    Returns (B, nR, win_rows*Wrow, K) bf16.
    """
    B, H, W, C = x_nhwc.shape
    nR = -(-H // th)
    Hp = nR * th
    xb = x_nhwc.astype(jnp.bfloat16)
    if fold:
        xp = jnp.pad(xb, ((0, 0), (1, Hp - H + 1), (1, 1), (0, 0)))
        xs = jnp.concatenate(
            [xp[:, :, 0:W], xp[:, :, 1:W + 1], xp[:, :, 2:W + 2]], axis=-1)
        xs = jnp.pad(xs, ((0, 0), (0, 0), (0, Wrow - W), (0, 0)))   # (B,Hp+2,Wrow,3C)
        win_rows = th + 2
    else:
        xs = jnp.pad(xb, ((0, 0), (1, Hp - H + 2), (1, Wrow - W - 1), (0, 0)))
        win_rows = th + 3                                            # (B,Hp+3,Wrow,C)
    wins = jnp.stack([xs[:, r * th: r * th + win_rows] for r in range(nR)], axis=1)
    return wins.reshape(B, nR, win_rows * Wrow, xs.shape[-1])


def _rpn_level_pallas(xl_nhwc, xr_nhwc, w_r, conv_b, wh, bh, th, Wrow, fold,
                      vmem_limit):
    B, H, W, _ = xl_nhwc.shape
    xl_w = _prep_windows(xl_nhwc, th, Wrow, fold)
    xr_w = _prep_windows(xr_nhwc, th, Wrow, fold)
    x_w = jnp.concatenate([xl_w, xr_w], axis=2)          # (B, nR, 2*mwin, K)
    nR, mwin2, kc = x_w.shape[1], x_w.shape[2], x_w.shape[3]
    mwin = mwin2 // 2
    m = th * Wrow
    n_taps = w_r.shape[0]
    if fold:
        tap_offsets = tuple(dh * Wrow for dh in range(3))
    else:
        tap_offsets = tuple(dh * Wrow + dw for dh in range(3) for dw in range(3))

    kernel = functools.partial(_stereo_rpn_fused_kernel,
                               tap_offsets=tap_offsets, m=m, mwin=mwin)
    cparams = dict(dimension_semantics=("parallel", "parallel"))
    if vmem_limit is not None:
        cparams["vmem_limit_bytes"] = int(vmem_limit)

    slab = pl.pallas_call(
        kernel,
        out_shape=jax.ShapeDtypeStruct((B, nR * m, NC_SLAB), jnp.float32),
        grid=(B, nR),
        in_specs=[
            pl.BlockSpec((1, 1, mwin2, kc), lambda b, r: (b, r, 0, 0)),
            pl.BlockSpec((n_taps, kc, RPN_CH), lambda b, r: (0, 0, 0)),
            pl.BlockSpec((1, RPN_CH), lambda b, r: (0, 0)),
            pl.BlockSpec((2, RPN_CH, NC_HEAD), lambda b, r: (0, 0, 0)),
            pl.BlockSpec((1, NC_HEAD), lambda b, r: (0, 0)),
        ],
        out_specs=pl.BlockSpec((1, m, NC_SLAB), lambda b, r: (b, r, 0)),
        compiler_params=pltpu.CompilerParams(**cparams),
    )(x_w, w_r, conv_b, wh, bh)

    # split merged slab (pure layout plumbing); pad rows/cols (computed on zero
    # padding) are discarded here, no reliance on block clipping.
    slab = slab.reshape(B, nR * th, Wrow, NC_SLAB)[:, :H, :W, :]
    cls = slab[..., 0:NC_SCORE]
    bbox = slab[..., NC_SCORE:NC_HEAD]
    prob = slab[..., NC_HEAD:NC_SLAB]
    return cls, prob, bbox


def _rpn_level_xla(xl_nhwc, xr_nhwc, params):
    """Plain-XLA path for tiny FPN levels where grid-step overhead dominates."""
    conv_w = params["conv_w"].astype(jnp.bfloat16)

    def conv_relu(x):
        y = lax.conv_general_dilated(
            x.astype(jnp.bfloat16), conv_w, (1, 1), "SAME",
            dimension_numbers=("NHWC", "HWIO", "NHWC"),
            preferred_element_type=jnp.float32)
        return jnp.maximum(y + params["conv_b"], 0.0).astype(jnp.bfloat16)

    f = jnp.concatenate([conv_relu(xl_nhwc), conv_relu(xr_nhwc)], axis=-1)
    cls = jnp.einsum("bhwc,cd->bhwd", f, params["cls_w"].astype(jnp.bfloat16),
                     preferred_element_type=jnp.float32) + params["cls_b"]
    bbox = jnp.einsum("bhwc,cd->bhwd", f, params["bbox_w"].astype(jnp.bfloat16),
                      preferred_element_type=jnp.float32) + params["bbox_b"]
    s0, s1 = cls[..., :A], cls[..., A:]
    mx = jnp.maximum(s0, s1)
    e0, e1 = jnp.exp(s0 - mx), jnp.exp(s1 - mx)
    inv = 1.0 / (e0 + e1)
    prob = jnp.concatenate([e0 * inv, e1 * inv], axis=-1)
    return cls, prob, bbox


# -----------------------------------------------------------------------------
# Forward pass equivalent of _Stereo_RPN.forward (inference compute path).
# -----------------------------------------------------------------------------
def stereo_rpn_forward(params, feats_left_nchw, feats_right_nchw,
                       im_info=None, tile_h=None):
    conv_w = params["conv_w"]                       # (3, 3, din, 512) HWIO
    din = conv_w.shape[2]
    fold = din < FOLD_MAX_CIN
    if fold:                                        # shallow Cin: deep-K fold (3 taps)
        n_taps, kc = 3, 3 * din
        w_r = conv_w.astype(jnp.bfloat16).reshape(3, 3 * din, RPN_CH)
    else:                                           # wide Cin: 9 in-kernel taps
        n_taps, kc = 9, din
        w_r = conv_w.astype(jnp.bfloat16).reshape(9, din, RPN_CH)
    conv_b = params["conv_b"].astype(jnp.float32).reshape(1, RPN_CH)
    wh = jnp.concatenate([params["cls_w"], params["bbox_w"]], axis=1)
    wh = wh.astype(jnp.bfloat16).reshape(2, RPN_CH, NC_HEAD)
    bh = jnp.concatenate([params["cls_b"], params["bbox_b"]])
    bh = bh.astype(jnp.float32).reshape(1, NC_HEAD)

    budget, vmem_limit = _vmem_budgets()
    win_extra = 2 if fold else 3

    rpn_cls_scores, rpn_cls_probs, rpn_bbox_preds, rpn_shapes = [], [], [], []
    for xl_nchw, xr_nchw in zip(feats_left_nchw, feats_right_nchw):
        B, _, H, W = xl_nchw.shape
        xl = jnp.transpose(xl_nchw, (0, 2, 3, 1))   # NCHW -> NHWC
        xr = jnp.transpose(xr_nchw, (0, 2, 3, 1))
        if H * W < XLA_FALLBACK_POSITIONS:
            cls, prob, bbox = _rpn_level_xla(xl, xr, params)
        else:
            Wrow = _row_stride(W, fold)
            if tile_h is not None:
                th = min(int(tile_h), H)
            else:
                th = _choose_tile_h(H, Wrow, kc, n_taps, win_extra, budget)
            cls, prob, bbox = _rpn_level_pallas(
                xl, xr, w_r, conv_b, wh, bh, th, Wrow, fold, vmem_limit)

        rpn_shapes.append((H, W))
        # NHWC row-major == permute(0,2,3,1).contiguous(); view(B,-1,k) == reshape
        rpn_cls_scores.append(cls.reshape(B, -1, 2))
        rpn_cls_probs.append(prob.reshape(B, -1, 2))
        rpn_bbox_preds.append(bbox.reshape(B, -1, 6))

    rpn_cls_score_alls = jnp.concatenate(rpn_cls_scores, axis=1)
    rpn_cls_prob_alls = jnp.concatenate(rpn_cls_probs, axis=1)
    rpn_bbox_pred_alls_left_right = jnp.concatenate(rpn_bbox_preds, axis=1)

    # TODO(synk): _ProposalLayer (anchor generation + NMS), _AnchorTargetLayer
    # and the training losses (index_select + cross_entropy + smooth_l1) are
    # data-dependent, host-style ops with no clean Pallas equivalent.
    rpn_loss_cls = jnp.float32(0.0)
    rpn_loss_box_left_right = jnp.float32(0.0)
    return (rpn_cls_score_alls, rpn_cls_prob_alls,
            rpn_bbox_pred_alls_left_right,
            rpn_loss_cls, rpn_loss_box_left_right, rpn_shapes)


# -----------------------------------------------------------------------------
# Pure-JAX reference (mirrors the PyTorch NCHW semantics).  Matmul operands are
# cast to bf16 with f32 accumulation to match the kernel's MXU precision; the
# softmax follows the exact PyTorch reshape(x,2)/softmax(dim=1) path.
# -----------------------------------------------------------------------------
def _reference(params, feats_left, feats_right):
    conv_w = params["conv_w"].astype(jnp.bfloat16)
    cls_w = params["cls_w"].astype(jnp.bfloat16)
    bbox_w = params["bbox_w"].astype(jnp.bfloat16)

    def conv3x3_relu(x_nhwc):
        y = lax.conv_general_dilated(
            x_nhwc.astype(jnp.bfloat16), conv_w, (1, 1), "SAME",
            dimension_numbers=("NHWC", "HWIO", "NHWC"),
            preferred_element_type=jnp.float32)
        return jnp.maximum(y + params["conv_b"], 0.0).astype(jnp.bfloat16)

    scores, probs, bboxes = [], [], []
    for xl_nchw, xr_nchw in zip(feats_left, feats_right):
        B = xl_nchw.shape[0]
        xl = jnp.transpose(xl_nchw, (0, 2, 3, 1))
        xr = jnp.transpose(xr_nchw, (0, 2, 3, 1))
        f = jnp.concatenate([conv3x3_relu(xl), conv3x3_relu(xr)], axis=-1)
        cls = jnp.einsum("bhwc,cd->bhwd", f, cls_w,
                         preferred_element_type=jnp.float32) + params["cls_b"]
        bbox = jnp.einsum("bhwc,cd->bhwd", f, bbox_w,
                          preferred_element_type=jnp.float32) + params["bbox_b"]
        H, W = cls.shape[1], cls.shape[2]
        cls_nchw = jnp.transpose(cls, (0, 3, 1, 2))
        resh = cls_nchw.reshape(B, 2, (NC_SCORE * H) // 2, W)
        prob_nchw = jax.nn.softmax(resh, axis=1).reshape(B, NC_SCORE, H, W)
        prob = jnp.transpose(prob_nchw, (0, 2, 3, 1))
        scores.append(cls.reshape(B, -1, 2))
        probs.append(prob.reshape(B, -1, 2))
        bboxes.append(bbox.reshape(B, -1, 6))
    return (jnp.concatenate(scores, 1), jnp.concatenate(probs, 1),
            jnp.concatenate(bboxes, 1))


def _init_params(key, din):
    ks = jax.random.split(key, 6)
    conv_w = jax.random.normal(ks[0], (3, 3, din, RPN_CH), jnp.float32) / np.sqrt(9 * din)
    conv_b = jax.random.normal(ks[1], (RPN_CH,), jnp.float32) * 0.01
    cls_w = jax.random.normal(ks[2], (2 * RPN_CH, NC_SCORE), jnp.float32) / np.sqrt(2 * RPN_CH)
    cls_b = jax.random.normal(ks[3], (NC_SCORE,), jnp.float32) * 0.01
    bbox_w = jax.random.normal(ks[4], (2 * RPN_CH, NC_BBOX), jnp.float32) / np.sqrt(2 * RPN_CH)
    bbox_b = jax.random.normal(ks[5], (NC_BBOX,), jnp.float32) * 0.01
    return dict(conv_w=conv_w, conv_b=conv_b, cls_w=cls_w, cls_b=cls_b,
                bbox_w=bbox_w, bbox_b=bbox_b)


def _check(params, feats_left, feats_right, tile_h):
    out = stereo_rpn_forward(params, feats_left, feats_right, tile_h=tile_h)
    cls_all, prob_all, bbox_all = out[0], out[1], out[2]
    jax.block_until_ready((cls_all, prob_all, bbox_all))
    ref_cls, ref_prob, ref_bbox = _reference(params, feats_left, feats_right)
    np.testing.assert_allclose(np.asarray(cls_all), np.asarray(ref_cls),
                               rtol=1e-2, atol=1e-2)
    np.testing.assert_allclose(np.asarray(prob_all), np.asarray(ref_prob),
                               rtol=1e-2, atol=1e-2)
    np.testing.assert_allclose(np.asarray(bbox_all), np.asarray(ref_bbox),
                               rtol=1e-2, atol=1e-2)


if __name__ == "__main__":
    root = jax.random.PRNGKey(0)
    kA, kB = jax.random.split(root)

    # ---- test 1: small-channel FPN pyramid (folded W-tap path, Cin < 128);
    #      the 8x8 level exercises the tiny-level XLA fallback.
    B, din = 2, 16
    kp, k1, k2, k3, k4 = jax.random.split(kA, 5)
    params = _init_params(kp, din)
    feats_left = [jax.random.normal(k1, (B, din, 16, 16), jnp.float32),
                  jax.random.normal(k2, (B, din, 8, 8), jnp.float32)]
    feats_right = [jax.random.normal(k3, (B, din, 16, 16), jnp.float32),
                   jax.random.normal(k4, (B, din, 8, 8), jnp.float32)]
    _check(params, feats_left, feats_right, tile_h=8)      # forced 2 row tiles
    _check(params, feats_left, feats_right, tile_h=None)   # auto tile sizing

    # ---- test 2: wide-channel, unaligned, ragged level (unfolded 9-tap path,
    #      Cin >= 128; W=25 not lane-friendly, H=13 with th=8 -> ragged tile).
    din2 = 128
    kp2, k5, k6 = jax.random.split(kB, 3)
    params2 = _init_params(kp2, din2)
    feats_left2 = [jax.random.normal(k5, (B, din2, 13, 25), jnp.float32)]
    feats_right2 = [jax.random.normal(k6, (B, din2, 13, 25), jnp.float32)]
    _check(params2, feats_left2, feats_right2, tile_h=8)

    print("KERNEL_OK")
</pallas_src>

<mosaic_0001>
module attributes {stable_mosaic.version = 11 : i64} {
  func.func @_stereo_rpn_fused_kernel(%arg0: i32, %arg1: i32, %arg2: memref<1x1x320x48xbf16, #tpu.memory_space<vmem>>, %arg3: memref<3x48x512xbf16, #tpu.memory_space<vmem>>, %arg4: memref<1x512xf32, #tpu.memory_space<vmem>>, %arg5: memref<2x512x24xbf16, #tpu.memory_space<vmem>>, %arg6: memref<1x24xf32, #tpu.memory_space<vmem>>, %arg7: memref<1x128x30xf32, #tpu.memory_space<vmem>>) attributes {dimension_semantics = [#tpu.dimension_semantics<parallel>, #tpu.dimension_semantics<parallel>], iteration_bounds = array<i64: 2, 2>, scalar_prefetch = 0 : i64, scratch_operands = 0 : i64, tpu.core_type = #tpu.core_type<tc>, window_params = [{transform_indices = @transform_0, window_bounds = array<i64: 1, 1, 320, 48>}, {pipeline_mode = #tpu.pipeline_mode<synchronous>, transform_indices = @transform_1, window_bounds = array<i64: 3, 48, 512>}, {pipeline_mode = #tpu.pipeline_mode<synchronous>, transform_indices = @transform_2, window_bounds = array<i64: 1, 512>}, {pipeline_mode = #tpu.pipeline_mode<synchronous>, transform_indices = @transform_3, window_bounds = array<i64: 2, 512, 24>}, {pipeline_mode = #tpu.pipeline_mode<synchronous>, transform_indices = @transform_4, window_bounds = array<i64: 1, 24>}, {transform_indices = @transform_5, window_bounds = array<i64: 1, 128, 30>}]} {
    %c0 = arith.constant 0 : index
    %c0_0 = arith.constant 0 : index
    %c0_1 = arith.constant 0 : index
    %c0_2 = arith.constant 0 : index
    %0 = vector.load %arg2[%c0, %c0_0, %c0_1, %c0_2] : memref<1x1x320x48xbf16, #tpu.memory_space<vmem>>, vector<1x1x128x48xbf16>
    %1 = vector.shape_cast %0 : vector<1x1x128x48xbf16> to vector<128x48xbf16>
    %c0_3 = arith.constant 0 : index
    %c0_4 = arith.constant 0 : index
    %c0_5 = arith.constant 0 : index
    %2 = vector.load %arg3[%c0_3, %c0_4, %c0_5] : memref<3x48x512xbf16, #tpu.memory_space<vmem>>, vector<1x48x512xbf16>
    %3 = vector.shape_cast %2 : vector<1x48x512xbf16> to vector<48x512xbf16>
    %cst = arith.constant dense<0.000000e+00> : vector<128x512xf32>
    %4 = tpu.matmul %1, %3, %cst {dimension_numbers = #tpu.dot_dimension_numbers<[1], [0], [0], [1], [0, 0, 1, 1], [], []>} : vector<128x48xbf16>, vector<48x512xbf16>, vector<128x512xf32> -> vector<128x512xf32>
    %c0_6 = arith.constant 0 : index
    %c0_7 = arith.constant 0 : index
    %c16 = arith.constant 16 : index
    %c0_8 = arith.constant 0 : index
    %5 = vector.load %arg2[%c0_6, %c0_7, %c16, %c0_8] : memref<1x1x320x48xbf16, #tpu.memory_space<vmem>>, vector<1x1x128x48xbf16>
    %6 = vector.shape_cast %5 : vector<1x1x128x48xbf16> to vector<128x48xbf16>
    %c1 = arith.constant 1 : index
    %c0_9 = arith.constant 0 : index
    %c0_10 = arith.constant 0 : index
    %7 = vector.load %arg3[%c1, %c0_9, %c0_10] : memref<3x48x512xbf16, #tpu.memory_space<vmem>>, vector<1x48x512xbf16>
    %8 = vector.shape_cast %7 : vector<1x48x512xbf16> to vector<48x512xbf16>
    %cst_11 = arith.constant dense<0.000000e+00> : vector<128x512xf32>
    %9 = tpu.matmul %6, %8, %cst_11 {dimension_numbers = #tpu.dot_dimension_numbers<[1], [0], [0], [1], [0, 0, 1, 1], [], []>} : vector<128x48xbf16>, vector<48x512xbf16>, vector<128x512xf32> -> vector<128x512xf32>
    %10 = arith.addf %4, %9 : vector<128x512xf32>
    %c0_12 = arith.constant 0 : index
    %c0_13 = arith.constant 0 : index
    %c32 = arith.constant 32 : index
    %c0_14 = arith.constant 0 : index
    %11 = vector.load %arg2[%c0_12, %c0_13, %c32, %c0_14] : memref<1x1x320x48xbf16, #tpu.memory_space<vmem>>, vector<1x1x128x48xbf16>
    %12 = vector.shape_cast %11 : vector<1x1x128x48xbf16> to vector<128x48xbf16>
    %c2 = arith.constant 2 : index
    %c0_15 = arith.constant 0 : index
    %c0_16 = arith.constant 0 : index
    %13 = vector.load %arg3[%c2, %c0_15, %c0_16] : memref<3x48x512xbf16, #tpu.memory_space<vmem>>, vector<1x48x512xbf16>
    %14 = vector.shape_cast %13 : vector<1x48x512xbf16> to vector<48x512xbf16>
    %cst_17 = arith.constant dense<0.000000e+00> : vector<128x512xf32>
    %15 = tpu.matmul %12, %14, %cst_17 {dimension_numbers = #tpu.dot_dimension_numbers<[1], [0], [0], [1], [0, 0, 1, 1], [], []>} : vector<128x48xbf16>, vector<48x512xbf16>, vector<128x512xf32> -> vector<128x512xf32>
    %16 = arith.addf %10, %15 : vector<128x512xf32>
    %c0_18 = arith.constant 0 : index
    %c0_19 = arith.constant 0 : index
    %17 = vector.load %arg4[%c0_18, %c0_19] : memref<1x512xf32, #tpu.memory_space<vmem>>, vector<1x512xf32>
    %18 = vector.broadcast %17 : vector<1x512xf32> to vector<128x512xf32>
    %19 = arith.addf %16, %18 : vector<128x512xf32>
    %cst_20 = arith.constant 0.000000e+00 : f32
    %20 = vector.broadcast %cst_20 : f32 to vector<128x512xf32>
    %21 = arith.maximumf %19, %20 : vector<128x512xf32>
    %22 = arith.truncf %21 : vector<128x512xf32> to vector<128x512xbf16>
    %c0_21 = arith.constant 0 : index
    %c0_22 = arith.constant 0 : index
    %c0_23 = arith.constant 0 : index
    %23 = vector.load %arg5[%c0_21, %c0_22, %c0_23] : memref<2x512x24xbf16, #tpu.memory_space<vmem>>, vector<1x512x24xbf16>
    %24 = vector.shape_cast %23 : vector<1x512x24xbf16> to vector<512x24xbf16>
    %cst_24 = arith.constant dense<0.000000e+00> : vector<128x24xf32>
    %25 = tpu.matmul %22, %24, %cst_24 {dimension_numbers = #tpu.dot_dimension_numbers<[1], [0], [0], [1], [0, 0, 1, 1], [], []>} : vector<128x512xbf16>, vector<512x24xbf16>, vector<128x24xf32> -> vector<128x24xf32>
    %c0_25 = arith.constant 0 : index
    %c0_26 = arith.constant 0 : index
    %c160 = arith.constant 160 : index
    %c0_27 = arith.constant 0 : index
    %26 = vector.load %arg2[%c0_25, %c0_26, %c160, %c0_27] : memref<1x1x320x48xbf16, #tpu.memory_space<vmem>>, vector<1x1x128x48xbf16>
    %27 = vector.shape_cast %26 : vector<1x1x128x48xbf16> to vector<128x48xbf16>
    %c0_28 = arith.constant 0 : index
    %c0_29 = arith.constant 0 : index
    %c0_30 = arith.constant 0 : index
    %28 = vector.load %arg3[%c0_28, %c0_29, %c0_30] : memref<3x48x512xbf16, #tpu.memory_space<vmem>>, vector<1x48x512xbf16>
    %29 = vector.shape_cast %28 : vector<1x48x512xbf16> to vector<48x512xbf16>
    %cst_31 = arith.constant dense<0.000000e+00> : vector<128x512xf32>
    %30 = tpu.matmul %27, %29, %cst_31 {dimension_numbers = #tpu.dot_dimension_numbers<[1], [0], [0], [1], [0, 0, 1, 1], [], []>} : vector<128x48xbf16>, vector<48x512xbf16>, vector<128x512xf32> -> vector<128x512xf32>
    %c0_32 = arith.constant 0 : index
    %c0_33 = arith.constant 0 : index
    %c176 = arith.constant 176 : index
    %c0_34 = arith.constant 0 : index
    %31 = vector.load %arg2[%c0_32, %c0_33, %c176, %c0_34] : memref<1x1x320x48xbf16, #tpu.memory_space<vmem>>, vector<1x1x128x48xbf16>
    %32 = vector.shape_cast %31 : vector<1x1x128x48xbf16> to vector<128x48xbf16>
    %c1_35 = arith.constant 1 : index
    %c0_36 = arith.constant 0 : index
    %c0_37 = arith.constant 0 : index
    %33 = vector.load %arg3[%c1_35, %c0_36, %c0_37] : memref<3x48x512xbf16, #tpu.memory_space<vmem>>, vector<1x48x512xbf16>
    %34 = vector.shape_cast %33 : vector<1x48x512xbf16> to vector<48x512xbf16>
    %cst_38 = arith.constant dense<0.000000e+00> : vector<128x512xf32>
    %35 = tpu.matmul %32, %34, %cst_38 {dimension_numbers = #tpu.dot_dimension_numbers<[1], [0], [0], [1], [0, 0, 1, 1], [], []>} : vector<128x48xbf16>, vector<48x512xbf16>, vector<128x512xf32> -> vector<128x512xf32>
    %36 = arith.addf %30, %35 : vector<128x512xf32>
    %c0_39 = arith.constant 0 : index
    %c0_40 = arith.constant 0 : index
    %c192 = arith.constant 192 : index
    %c0_41 = arith.constant 0 : index
    %37 = vector.load %arg2[%c0_39, %c0_40, %c192, %c0_41] : memref<1x1x320x48xbf16, #tpu.memory_space<vmem>>, vector<1x1x128x48xbf16>
    %38 = vector.shape_cast %37 : vector<1x1x128x48xbf16> to vector<128x48xbf16>
    %c2_42 = arith.constant 2 : index
    %c0_43 = arith.constant 0 : index
    %c0_44 = arith.constant 0 : index
    %39 = vector.load %arg3[%c2_42, %c0_43, %c0_44] : memref<3x48x512xbf16, #tpu.memory_space<vmem>>, vector<1x48x512xbf16>
    %40 = vector.shape_cast %39 : vector<1x48x512xbf16> to vector<48x512xbf16>
    %cst_45 = arith.constant dense<0.000000e+00> : vector<128x512xf32>
    %41 = tpu.matmul %38, %40, %cst_45 {dimension_numbers = #tpu.dot_dimension_numbers<[1], [0], [0], [1], [0, 0, 1, 1], [], []>} : vector<128x48xbf16>, vector<48x512xbf16>, vector<128x512xf32> -> vector<128x512xf32>
    %42 = arith.addf %36, %41 : vector<128x512xf32>
    %c0_46 = arith.constant 0 : index
    %c0_47 = arith.constant 0 : index
    %43 = vector.load %arg4[%c0_46, %c0_47] : memref<1x512xf32, #tpu.memory_space<vmem>>, vector<1x512xf32>
    %44 = vector.broadcast %43 : vector<1x512xf32> to vector<128x512xf32>
    %45 = arith.addf %42, %44 : vector<128x512xf32>
    %cst_48 = arith.constant 0.000000e+00 : f32
    %46 = vector.broadcast %cst_48 : f32 to vector<128x512xf32>
    %47 = arith.maximumf %45, %46 : vector<128x512xf32>
    %48 = arith.truncf %47 : vector<128x512xf32> to vector<128x512xbf16>
    %c1_49 = arith.constant 1 : index
    %c0_50 = arith.constant 0 : index
    %c0_51 = arith.constant 0 : index
    %49 = vector.load %arg5[%c1_49, %c0_50, %c0_51] : memref<2x512x24xbf16, #tpu.memory_space<vmem>>, vector<1x512x24xbf16>
    %50 = vector.shape_cast %49 : vector<1x512x24xbf16> to vector<512x24xbf16>
    %cst_52 = arith.constant dense<0.000000e+00> : vector<128x24xf32>
    %51 = tpu.matmul %48, %50, %cst_52 {dimension_numbers = #tpu.dot_dimension_numbers<[1], [0], [0], [1], [0, 0, 1, 1], [], []>} : vector<128x512xbf16>, vector<512x24xbf16>, vector<128x24xf32> -> vector<128x24xf32>
    %52 = arith.addf %25, %51 : vector<128x24xf32>
    %c0_53 = arith.constant 0 : index
    %c0_54 = arith.constant 0 : index
    %53 = vector.load %arg6[%c0_53, %c0_54] : memref<1x24xf32, #tpu.memory_space<vmem>>, vector<1x24xf32>
    %54 = vector.broadcast %53 : vector<1x24xf32> to vector<128x24xf32>
    %55 = arith.addf %52, %54 : vector<128x24xf32>
    %56 = vector.extract_strided_slice %55 {offsets = [0, 0], sizes = [128, 3], strides = [1, 1]} : vector<128x24xf32> to vector<128x3xf32>
    %57 = vector.extract_strided_slice %55 {offsets = [0, 3], sizes = [128, 3], strides = [1, 1]} : vector<128x24xf32> to vector<128x3xf32>
    %58 = arith.maximumf %56, %57 : vector<128x3xf32>
    %59 = arith.subf %56, %58 : vector<128x3xf32>
    %60 = math.exp %59 : vector<128x3xf32>
    %61 = arith.subf %57, %58 : vector<128x3xf32>
    %62 = math.exp %61 : vector<128x3xf32>
    %63 = arith.addf %60, %62 : vector<128x3xf32>
    %64 = tpu.reciprocal %63 : vector<128x3xf32> -> vector<128x3xf32>
    %c0_55 = arith.constant 0 : index
    %c0_56 = arith.constant 0 : index
    %c0_57 = arith.constant 0 : index
    %65 = vector.load %arg7[%c0_55, %c0_56, %c0_57] : memref<1x128x30xf32, #tpu.memory_space<vmem>>, vector<1x128x24xf32>
    %66 = vector.shape_cast %65 : vector<1x128x24xf32> to vector<128x24xf32>
    %67 = vector.shape_cast %55 : vector<128x24xf32> to vector<1x128x24xf32>
    tpu.vector_store %arg7[%c0_55, %c0_56, %c0_57], %67 {strides = array<i32>} : memref<1x128x30xf32, #tpu.memory_space<vmem>>, vector<1x128x24xf32>,
    %68 = arith.mulf %60, %64 : vector<128x3xf32>
    %c0_58 = arith.constant 0 : index
    %c0_59 = arith.constant 0 : index
    %c24 = arith.constant 24 : index
    %69 = vector.load %arg7[%c0_58, %c0_59, %c24] : memref<1x128x30xf32, #tpu.memory_space<vmem>>, vector<1x128x3xf32>
    %70 = vector.shape_cast %69 : vector<1x128x3xf32> to vector<128x3xf32>
    %71 = vector.shape_cast %68 : vector<128x3xf32> to vector<1x128x3xf32>
    tpu.vector_store %arg7[%c0_58, %c0_59, %c24], %71 {strides = array<i32>} : memref<1x128x30xf32, #tpu.memory_space<vmem>>, vector<1x128x3xf32>,
    %72 = arith.mulf %62, %64 : vector<128x3xf32>
    %c0_60 = arith.constant 0 : index
    %c0_61 = arith.constant 0 : index
    %c27 = arith.constant 27 : index
    %73 = vector.load %arg7[%c0_60, %c0_61, %c27] : memref<1x128x30xf32, #tpu.memory_space<vmem>>, vector<1x128x3xf32>
    %74 = vector.shape_cast %73 : vector<1x128x3xf32> to vector<128x3xf32>
    %75 = vector.shape_cast %72 : vector<128x3xf32> to vector<1x128x3xf32>
    tpu.vector_store %arg7[%c0_60, %c0_61, %c27], %75 {strides = array<i32>} : memref<1x128x30xf32, #tpu.memory_space<vmem>>, vector<1x128x3xf32>,
    return
  }
  func.func @transform_0(%arg0: i32, %arg1: i32) -> (i32, i32, i32, i32) {
    %c0_i32 = arith.constant 0 : i32
    %c0_i32_0 = arith.constant 0 : i32
    %c0_i32_1 = arith.constant 0 : i32
    return %arg0, %arg1, %c0_i32, %c0_i32_0 : i32, i32, i32, i32
  }
  func.func @transform_1(%arg0: i32, %arg1: i32) -> (i32, i32, i32) {
    %c0_i32 = arith.constant 0 : i32
    %c0_i32_0 = arith.constant 0 : i32
    %c0_i32_1 = arith.constant 0 : i32
    %c0_i32_2 = arith.constant 0 : i32
    return %c0_i32, %c0_i32_0, %c0_i32_1 : i32, i32, i32
  }
  func.func @transform_2(%arg0: i32, %arg1: i32) -> (i32, i32) {
    %c0_i32 = arith.constant 0 : i32
    %c0_i32_0 = arith.constant 0 : i32
    %c0_i32_1 = arith.constant 0 : i32
    return %c0_i32, %c0_i32_0 : i32, i32
  }
  func.func @transform_3(%arg0: i32, %arg1: i32) -> (i32, i32, i32) {
    %c0_i32 = arith.constant 0 : i32
    %c0_i32_0 = arith.constant 0 : i32
    %c0_i32_1 = arith.constant 0 : i32
    %c0_i32_2 = arith.constant 0 : i32
    return %c0_i32, %c0_i32_0, %c0_i32_1 : i32, i32, i32
  }
  func.func @transform_4(%arg0: i32, %arg1: i32) -> (i32, i32) {
    %c0_i32 = arith.constant 0 : i32
    %c0_i32_0 = arith.constant 0 : i32
    %c0_i32_1 = arith.constant 0 : i32
    return %c0_i32, %c0_i32_0 : i32, i32
  }
  func.func @transform_5(%arg0: i32, %arg1: i32) -> (i32, i32, i32) {
    %c0_i32 = arith.constant 0 : i32
    %c0_i32_0 = arith.constant 0 : i32
    return %arg0, %arg1, %c0_i32 : i32, i32, i32
  }
}

</mosaic_0001>

<bundles_post_ra>
// kernel: tpu_custom_call.1
= control target key start
LH: loop header
LB: loop body
LE: loop exit
PB: predicated region body
PF: predicated region fallthrough
CT: control target
= control target key end

     0   :  { %s5486_s18 = smov 0   ;;  %s5488_s19 = smov 0   ;;  %s7024_s0 = inlined_call_operand.vmem [shape: bf16[2,2,320,48], index: 0, kind: input, shape index: {}]   ;;  %s7025_s1 = inlined_call_operand.vmem [shape: bf16[3,48,512], index: 1, kind: input, shape index: {}]   ;;  %s7026_s2 = inlined_call_operand.vmem [shape: f32[1,512], index: 2, kind: input, shape index: {}]   ;;  %s7027_s3 = inlined_call_operand.vmem [shape: bf16[2,512,24], index: 3, kind: input, shape index: {}]   ;;  %s7028_s4 = inlined_call_operand.vmem [shape: f32[1,24], index: 4, kind: input, shape index: {}]   ;;  %s7029_s5 = inlined_call_operand.vmem [shape: f32[2,256,30], index: 5, kind: output, shape index: {}]  }
   0x1   :  { %s5490_s20 = smov 0   ;;  %s5492_s21 = smov 0  }
   0x2   :  { %s5494_s22 = smov 0  }
   0x3 LB: > { %s24_s23 = sadd.s32 1, %s5442_s20  ;;  %s27_s24 = sadd.s32 1, %s5446_s21  ;;  %s5450_s22 = sphi %s5494_s22, %s15_s22   ;;  %s5446_s21 = sphi %s5492_s21, %s7033_s21   ;;  %s5442_s20 = sphi %s5490_s20, %s7032_s20   ;;  %s5438_s19 = sphi %s5488_s19, %s7031_s19   ;;  %s5434_s18 = sphi %s5486_s18, %s7030_s18  }
   0x4   : > { %p25_p0 = scmp.ge.s32.totalorder %s24_s23, 2  ;;  %p4280_p1 = scmp.ge.s32.totalorder %s5450_s22, 1 }
   0x5   : > { %p207_p2 = scmp.lt.s32.totalorder %s5450_s22, 5 }
   0x6   : > { %s7035_s23 = smov (%p25_p0, %s24_s23), 0  ;;  %s7037_s24 = smov (!%p25_p0, %s27_s24), %s5446_s21 }
   0x7   : > { %p208_p3 = pnand %p4280_p1, %p207_p2  ;;  %p29_p4 = scmp.ge.s32.totalorder %s7037_s24, 2 }
   0x8   : > { %v5521_v0 = vld [vmem:[%s7025_s1 + $0x64] ss:$16 sps:$4 sm:$0xff] (!%p208_p3)   ;;  %p243_p5 = scmp.lt.s32.totalorder (!%p208_p3), %s5438_s19, 1  ;;  %v5526_v1 = vld [vmem:[%s7025_s1 + $0x6c] ss:$16 sps:$4 sm:$0xff] (!%p208_p3)   ;;  %v5452_v2 = vmov (!%p208_p3), 0  }
   0x9   : > { %s7039_s24 = smov (%p29_p4, %s7037_s24), 0  ;;  %211 = sbr.rel (%p208_p3) target bundleno = 1518 (0x5ee), region = 40 }
   0xa   : > { %463 = vmatprep.mubr.bf16.mxu0 (!%p208_p3), %v5452_v2  ;;  %576 = vmatprep.mubr.bf16.mxu1 (!%p208_p3), %v5452_v2  ;;  %p245_p6 = scmp.lt.s32.totalorder (!%p208_p3), %s5434_s18, 1  ;;  %v5535_v3 = vld [vmem:[%s7025_s1 + $0x60] ss:$16 sps:$4 sm:$0xff] (!%p208_p3)   ;;  %v5540_v4 = vld [vmem:[%s7025_s1 + $0x68] ss:$16 sps:$4 sm:$0xff] (!%p208_p3)   ;;  %vm406_vm0 = vcmask (!%p208_p3), 392192  }
   0xb   : > { %431 = vmatprep.subr.bf16.mxu0 (!%p208_p3), %v5521_v0  ;;  %544 = vmatprep.subr.bf16.mxu1 (!%p208_p3), %v5526_v1  ;;  %v5548_v5 = vld [vmem:[%s7025_s1 + $0x84] ss:$16 sps:$4 sm:$0xff] (!%p208_p3)   ;;  %v5556_v6 = vld [vmem:[%s7025_s1 + $0x8c] ss:$16 sps:$4 sm:$0xff] (!%p208_p3)   ;;  %v5561_v7 = vld [vmem:[%s7025_s1 + $0x80] ss:$16 sps:$4 sm:$0xff] (!%p208_p3)  }
   0xc   : > { %432 = vmatpush1.bf16.msra.mxu0 (!%p208_p3), %v5535_v3  ;;  %545 = vmatpush1.bf16.msra.mxu1 (!%p208_p3), %v5540_v4  ;;  %v5568_v8 = vld [vmem:[%s7025_s1 + $0x88] ss:$16 sps:$4 sm:$0xff] (!%p208_p3)   ;;  %v5574_v9 = vld [vmem:[%s7025_s1 + $0xa4] ss:$16 sps:$4 sm:$0xff] (!%p208_p3)   ;;  %v5579_v10 = vld [vmem:[%s7025_s1 + $0xac] ss:$16 sps:$4 sm:$0xff] (!%p208_p3)  }
   0xd   : > { %433 = vmatprep.subr.bf16.mxu0 (!%p208_p3), %v5548_v5  ;;  %546 = vmatprep.subr.bf16.mxu1 (!%p208_p3), %v5556_v6  ;;  %v5584_v11 = vld [vmem:[%s7025_s1 + $0xa0] ss:$16 sps:$4 sm:$0xff] (!%p208_p3)   ;;  %v5591_v12 = vld [vmem:[%s7025_s1 + $0xa8] ss:$16 sps:$4 sm:$0xff] (!%p208_p3)   ;;  %v5603_v13 = vld [vmem:[%s7025_s1 + $0x4] ss:$16 sps:$4 sm:$0xff] (!%p208_p3)  }
   0xe   : > { %v5608_v14 = vld [vmem:[%s7025_s1] ss:$16 sps:$4 sm:$0xff] (!%p208_p3)   ;;  %v5616_v16 = vld [vmem:[%s7025_s1 + $0xc] ss:$16 sps:$4 sm:$0xff] (!%p208_p3)   ;;  %v5623_v17 = vld [vmem:[%s7025_s1 + $0x8] ss:$16 sps:$4 sm:$0xff] (!%p208_p3)  }
   0xf   : > { %v5630_v18 = vld [vmem:[%s7025_s1 + $0x24] ss:$16 sps:$4 sm:$0xff] (!%p208_p3)   ;;  %v5639_v19 = vld [vmem:[%s7025_s1 + $0x20] ss:$16 sps:$4 sm:$0xff] (!%p208_p3)   ;;  %v5646_v20 = vld [vmem:[%s7025_s1 + $0x28] ss:$16 sps:$4 sm:$0xff] (!%p208_p3)  }
  0x10   : > { %s7041_s19 = smov (!%p243_p5, %s5438_s19), 1  ;;  %434 = vmatpush1.bf16.msra.mxu0 %v5561_v7  ;;  %547 = vmatpush1.bf16.msra.mxu1 %v5568_v8  ;;  %v5653_v21 = vld [vmem:[%s7025_s1 + $0x2c] ss:$16 sps:$4 sm:$0xff]   ;;  %v5665_v23 = vld [vmem:[%s7025_s1 + $0x44] ss:$16 sps:$4 sm:$0xff]   ;;  %vm3908_vm1 = vcmask 195584  }
  0x11   : > { %s246_s10 = scalar_select %p245_p6, %s5434_s18, 1  ;;  %435 = vmatprep.subr.bf16.mxu0 %v5574_v9  ;;  %548 = vmatprep.subr.bf16.mxu1 %v5579_v10  ;;  %v5670_v24 = vld [vmem:[%s7025_s1 + $0x40] ss:$16 sps:$4 sm:$0xff]   ;;  %v5675_v25 = vld [vmem:[%s7025_s1 + $0x4c] ss:$16 sps:$4 sm:$0xff]   ;;  %vm4005_vm2 = vcmask 220352  }
  0x12   : > { %s5119_s15 = smul.u32 80, %s7041_s19  ;;  %v5681_v26 = vld [vmem:[%s7025_s1 + $0x48] ss:$16 sps:$4 sm:$0xff]   ;;  %v5695_v27 = vld [vmem:[%s7025_s1 + $0xc4] ss:$16 sps:$4 sm:$0xff]   ;;  %s5453_s6 = smov 125  }
  0x13   : > { %s5118_s25 = smul.u32 40, %s246_s10  ;;  %v5703_v29 = vld [vmem:[%s7025_s1 + $0xcc] ss:$16 sps:$4 sm:$0xff]   ;;  %v5754_v36 = vld [vmem:[%s7025_s1 + $0xc0] ss:$16 sps:$4 sm:$0xff]   ;;  %s5455_s8 = smov 24  }
  0x14   : > { %436 = vmatpush1.bf16.msra.mxu0 %v5584_v11  ;;  %549 = vmatpush1.bf16.msra.mxu1 %v5591_v12  ;;  %v5759_v37 = vld [vmem:[%s7025_s1 + $0xc8] ss:$16 sps:$4 sm:$0xff]   ;;  %v5764_v38 = vld [vmem:[%s7025_s1 + $0xe4] ss:$16 sps:$4 sm:$0xff]   ;;  %v5769_v39 = vld [vmem:[%s7025_s1 + $0xec] ss:$16 sps:$4 sm:$0xff]  }
  0x15   : > { %s249_s7 = sadd.s32 %s5119_s15, %s5118_s25  ;;  %725 = vmatprep.subr.bf16.mxu0 %v5603_v13  ;;  %838 = vmatprep.subr.bf16.mxu1 %v5616_v16  ;;  %v5774_v40 = vld [vmem:[%s7025_s1 + $0xe0] ss:$16 sps:$4 sm:$0xff]   ;;  %v5779_v41 = vld [vmem:[%s7025_s1 + $0xe8] ss:$16 sps:$4 sm:$0xff]   ;;  %v5786_v42 = vld [vmem:[%s7025_s1 + $0x104] ss:$16 sps:$4 sm:$0xff]  }
  0x16   : > { %s4281_s10 = sshll.u32 %s249_s7, 2  ;;  %v5795_v43 = vld [vmem:[%s7025_s1 + $0x10c] ss:$16 sps:$4 sm:$0xff]   ;;  %v5802_v44 = vld [vmem:[%s7025_s1 + $0x100] ss:$16 sps:$4 sm:$0xff]   ;;  %s5454_s7 = smov 3  }
  0x17   : > { %s5598_s13 = scalar_lea.vmem %s7024_s0, %s4281_s10  ;;  %v5807_v45 = vld [vmem:[%s7025_s1 + $0x108] ss:$16 sps:$4 sm:$0xff]   ;;  %v5252_v63 = vld [vmem:[%s7027_s3 + $0x140] sm:$0xff]   ;;  %vm4166_vm3 = vcmask 244952  }
  0x18   : > { %v5611_v15 = vld [vmem:[%s5598_s13 + $0x8] sm:$0xff]   ;;  %v5657_v22 = vld [vmem:[%s5598_s13 + $0x10] sm:$0xff]   ;;  %v5698_v28 = vld [vmem:[%s5598_s13 + $0x18] sm:$0xff]  }
  0x19   : > { %4317 = vmatmul.mubr.msk.bf16.vlgmr.msra.gmra.mrb[0].mxu0 %vm406_vm0, %v5611_v15  ;;  %4325 = vmatmul.mubr.msk.bf16.vlgmr.msra.gmra.mrb[0].mxu1 %vm406_vm0, %v5611_v15  ;;  %v5714_v30 = vld [vmem:[%s5598_s13 + $0x20] sm:$0xff]   ;;  %v5723_v31 = vld [vmem:[%s5598_s13 + $0x28] sm:$0xff]   ;;  %v5732_v32 = vld [vmem:[%s5598_s13 + $0x30] sm:$0xff]  }
  0x1a   : > { %726 = vmatpush1.bf16.msra.mxu0 %v5608_v14  ;;  %839 = vmatpush1.bf16.msra.mxu1 %v5623_v17  ;;  %v5206_v33 = vld [vmem:[%s5598_s13 + $0x38] sm:$0xff]   ;;  %v5207_v34 = vld [vmem:[%s5598_s13 + $0x40] sm:$0xff]   ;;  %v5227_v46 = vld [vmem:[%s5598_s13 + $0x10] sm:$0xff]  }
  0x1b   : > { %473 = vmatprep.mubr.bf16.mxu0 %v5452_v2  ;;  %586 = vmatprep.mubr.bf16.mxu1 %v5452_v2  ;;  %v5208_v35 = vld [vmem:[%s5598_s13] sm:$0xff]   ;;  %v5228_v47 = vld [vmem:[%s5598_s13 + $0x18] sm:$0xff]   ;;  %v5230_v49 = vld [vmem:[%s5598_s13 + $0x28] sm:$0xff]  }
  0x1c   : > { %727 = vmatprep.subr.bf16.mxu0 %v5630_v18  ;;  %840 = vmatprep.subr.bf16.mxu1 %v5653_v21  ;;  %v5229_v48 = vld [vmem:[%s5598_s13 + $0x20] sm:$0xff]   ;;  %v5231_v50 = vld [vmem:[%s5598_s13 + $0x30] sm:$0xff]   ;;  %v5232_v51 = vld [vmem:[%s5598_s13 + $0x38] sm:$0xff]  }
  0x1d   : > { %v5233_v52 = vld [vmem:[%s5598_s13 + $0x40] sm:$0xff]   ;;  %v5234_v53 = vld [vmem:[%s5598_s13 + $0x48] sm:$0xff]   ;;  %v5910_v54 = vld [vmem:[%s5598_s13 + $0x58] sm:$0xff]  }
  0x1e   : > { %728 = vmatpush1.bf16.msra.mxu0 %v5639_v19  ;;  %841 = vmatpush1.bf16.msra.mxu1 %v5646_v20  ;;  %v5923_v55 = vld [vmem:[%s5598_s13 + $0x60] sm:$0xff]   ;;  %v5237_v56 = vld [vmem:[%s5598_s13 + $0x68] sm:$0xff]   ;;  %v5238_v57 = vld [vmem:[%s5598_s13 + $0x70] sm:$0xff]  }
  0x1f   : > { %729 = vmatprep.subr.bf16.mxu0 %v5665_v23  ;;  %842 = vmatprep.subr.bf16.mxu1 %v5675_v25  ;;  %v5239_v58 = vld [vmem:[%s5598_s13 + $0x78] sm:$0xff]   ;;  %v5240_v59 = vld [vmem:[%s5598_s13 + $0x80] sm:$0xff]   ;;  %v5241_v60 = vld [vmem:[%s5598_s13 + $0x88] sm:$0xff]  }
  0x20   : > { %v5242_v61 = vld [vmem:[%s5598_s13 + $0x90] sm:$0xff]  }
  0x21   : > { %4318 = vmatmul.mubr.msk.bf16.gmra.mrb[4].mxu0 %vm406_vm0, %v5657_v22  ;;  %4326 = vmatmul.mubr.msk.bf16.gmra.mrb[4].mxu1 %vm406_vm0, %v5657_v22  ;;  %v5243_v62 = vld [vmem:[%s5598_s13 + $0x50] sm:$0xff]  }
  0x22   : > { %483 = vmatprep.mubr.bf16.mxu0 %v5452_v2  ;;  %596 = vmatprep.mubr.bf16.mxu1 %v5452_v2 }
  0x23   : > { %730 = vmatpush1.bf16.msra.mxu0 %v5670_v24  ;;  %843 = vmatpush1.bf16.msra.mxu1 %v5681_v26 }
  0x24   : > { %1104 = vmatprep.subr.bf16.mxu0 %v5695_v27  ;;  %1217 = vmatprep.subr.bf16.mxu1 %v5703_v29 }
  0x29   : > { %4319 = vmatmul.mubr.msk.bf16.gmra.mrb[8].mxu0 %vm406_vm0, %v5698_v28  ;;  %4327 = vmatmul.mubr.msk.bf16.gmra.mrb[8].mxu1 %vm406_vm0, %v5698_v28 }
  0x2a   : > { %493 = vmatprep.mubr.bf16.mxu0 %v5452_v2  ;;  %606 = vmatprep.mubr.bf16.mxu1 %v5452_v2 }
  0x31   : > { %4320 = vmatmul.mubr.msk.bf16.gmra.mrb[12].mxu0 %vm406_vm0, %v5714_v30  ;;  %4328 = vmatmul.mubr.msk.bf16.gmra.mrb[12].mxu1 %vm406_vm0, %v5714_v30 }
  0x32   : > { %503 = vmatprep.mubr.bf16.mxu0 %v5452_v2  ;;  %616 = vmatprep.mubr.bf16.mxu1 %v5452_v2 }
  0x39   : > { %4321 = vmatmul.mubr.msk.bf16.gmra.mrb[16].mxu0 %vm406_vm0, %v5723_v31  ;;  %4329 = vmatmul.mubr.msk.bf16.gmra.mrb[16].mxu1 %vm406_vm0, %v5723_v31 }
  0x3a   : > { %513 = vmatprep.mubr.bf16.mxu0 %v5452_v2  ;;  %626 = vmatprep.mubr.bf16.mxu1 %v5452_v2 }
  0x41   : > { %4322 = vmatmul.mubr.msk.bf16.gmra.mrb[20].mxu0 %vm406_vm0, %v5732_v32  ;;  %4330 = vmatmul.mubr.msk.bf16.gmra.mrb[20].mxu1 %vm406_vm0, %v5732_v32 }
  0x42   : > { %523 = vmatprep.mubr.bf16.mxu0 %v5452_v2  ;;  %636 = vmatprep.mubr.bf16.mxu1 %v5452_v2 }
  0x49   : > { %4323 = vmatmul.mubr.msk.bf16.gmra.mrb[24].mxu0 %vm406_vm0, %v5206_v33  ;;  %4331 = vmatmul.mubr.msk.bf16.gmra.mrb[24].mxu1 %vm406_vm0, %v5206_v33 }
  0x4a   : > { %533 = vmatprep.mubr.bf16.mxu0 %v5452_v2  ;;  %646 = vmatprep.mubr.bf16.mxu1 %v5452_v2 }
  0x51   : > { %4324 = vmatmul.mubr.msk.bf16.gmra.mrb[28].mxu0 %vm406_vm0, %v5207_v34  ;;  %4332 = vmatmul.mubr.msk.bf16.gmra.mrb[28].mxu1 %vm406_vm0, %v5207_v34 }
  0x52   : > { %757 = vmatprep.mubr.bf16.mxu0 %v5452_v2  ;;  %870 = vmatprep.mubr.bf16.mxu1 %v5452_v2 }
  0x59   : > { %4346 = vmatmul.mubr.msk.bf16.vlgmr.msra.gmra.mrb[0].mxu0 %vm406_vm0, %v5208_v35  ;;  %4354 = vmatmul.mubr.msk.bf16.vlgmr.msra.gmra.mrb[0].mxu1 %vm406_vm0, %v5208_v35 }
  0x5a   : > { %1105 = vmatpush1.bf16.msra.mxu0 %v5754_v36  ;;  %1218 = vmatpush1.bf16.msra.mxu1 %v5759_v37 }
  0x5b   : > { %767 = vmatprep.mubr.bf16.mxu0 %v5452_v2  ;;  %880 = vmatprep.mubr.bf16.mxu1 %v5452_v2 }
  0x5c   : > { %1106 = vmatprep.subr.bf16.mxu0 %v5764_v38  ;;  %1219 = vmatprep.subr.bf16.mxu1 %v5769_v39 }
  0x5e   : > { %1107 = vmatpush1.bf16.msra.mxu0 %v5774_v40  ;;  %1220 = vmatpush1.bf16.msra.mxu1 %v5779_v41 }
  0x5f   : > { %1108 = vmatprep.subr.bf16.mxu0 %v5786_v42  ;;  %1221 = vmatprep.subr.bf16.mxu1 %v5795_v43 }
  0x61   : > { %4347 = vmatmul.mubr.msk.bf16.gmra.mrb[4].mxu0 %vm406_vm0, %v5611_v15  ;;  %4355 = vmatmul.mubr.msk.bf16.gmra.mrb[4].mxu1 %vm406_vm0, %v5611_v15  ;;  %v5264_v15 = vld [vmem:[%s7027_s3 + $0x158] sm:$0xff]  }
  0x62   : > { %777 = vmatprep.mubr.bf16.mxu0 %v5452_v2  ;;  %890 = vmatprep.mubr.bf16.mxu1 %v5452_v2 }
  0x63   : > { %1109 = vmatpush1.bf16.msra.mxu0 %v5802_v44  ;;  %1222 = vmatpush1.bf16.msra.mxu1 %v5807_v45 }
  0x64   : > { %1722 = vmatprep.subr.bf16.mxu0 %v5521_v0  ;;  %1835 = vmatprep.subr.bf16.mxu1 %v5526_v1  ;;  %v5254_v0 = vld [vmem:[%s7027_s3 + $0x1c0] sm:$0xff]  }
  0x65   : > { %v5244_v1 = vld [vmem:[%s5598_s13 + $0x60] sm:$0xff]  }
  0x69   : > { %4348 = vmatmul.mubr.msk.bf16.gmra.mrb[8].mxu0 %vm406_vm0, %v5657_v22  ;;  %4356 = vmatmul.mubr.msk.bf16.gmra.mrb[8].mxu1 %vm406_vm0, %v5657_v22  ;;  %v5246_v22 = vld [vmem:[%s5598_s13 + $0x70] sm:$0xff]  }
  0x6a   : > { %787 = vmatprep.mubr.bf16.mxu0 %v5452_v2  ;;  %900 = vmatprep.mubr.bf16.mxu1 %v5452_v2 }
  0x71   : > { %4349 = vmatmul.mubr.msk.bf16.gmra.mrb[12].mxu0 %vm406_vm0, %v5698_v28  ;;  %4357 = vmatmul.mubr.msk.bf16.gmra.mrb[12].mxu1 %vm406_vm0, %v5698_v28  ;;  %v5269_v28 = vld [vmem:[%s7027_s3 + $0x120] sm:$0xff]  }
  0x72   : > { %797 = vmatprep.mubr.bf16.mxu0 %v5452_v2  ;;  %910 = vmatprep.mubr.bf16.mxu1 %v5452_v2 }
  0x79   : > { %4350 = vmatmul.mubr.msk.bf16.gmra.mrb[16].mxu0 %vm406_vm0, %v5714_v30  ;;  %4358 = vmatmul.mubr.msk.bf16.gmra.mrb[16].mxu1 %vm406_vm0, %v5714_v30  ;;  %v5272_v30 = vld [vmem:[%s7027_s3 + $0x168] sm:$0xff]  }
  0x7a   : > { %807 = vmatprep.mubr.bf16.mxu0 %v5452_v2  ;;  %920 = vmatprep.mubr.bf16.mxu1 %v5452_v2 }
  0x81   : > { %4351 = vmatmul.mubr.msk.bf16.gmra.mrb[20].mxu0 %vm406_vm0, %v5723_v31  ;;  %4359 = vmatmul.mubr.msk.bf16.gmra.mrb[20].mxu1 %vm406_vm0, %v5723_v31  ;;  %v5274_v31 = vld [vmem:[%s7027_s3 + $0x1e8] sm:$0xff]  }
  0x82   : > { %817 = vmatprep.mubr.bf16.mxu0 %v5452_v2  ;;  %930 = vmatprep.mubr.bf16.mxu1 %v5452_v2 }
  0x89   : > { %4352 = vmatmul.mubr.msk.bf16.gmra.mrb[24].mxu0 %vm406_vm0, %v5732_v32  ;;  %4360 = vmatmul.mubr.msk.bf16.gmra.mrb[24].mxu1 %vm406_vm0, %v5732_v32 }
  0x8a   : > { %827 = vmatprep.mubr.bf16.mxu0 %v5452_v2  ;;  %940 = vmatprep.mubr.bf16.mxu1 %v5452_v2 }
  0x91   : > { %4353 = vmatmul.mubr.msk.bf16.gmra.mrb[28].mxu0 %vm406_vm0, %v5206_v33  ;;  %4361 = vmatmul.mubr.msk.bf16.gmra.mrb[28].mxu1 %vm406_vm0, %v5206_v33 }
  0x92   : > { %1136 = vmatprep.mubr.bf16.mxu0 %v5452_v2  ;;  %1249 = vmatprep.mubr.bf16.mxu1 %v5452_v2 }
  0x99   : > { %4394 = vmatmul.mubr.msk.bf16.vlgmr.msra.gmra.mrb[0].mxu0 %vm406_vm0, %v5227_v46  ;;  %4402 = vmatmul.mubr.msk.bf16.vlgmr.msra.gmra.mrb[0].mxu1 %vm406_vm0, %v5227_v46  ;;  %v5247_v46 = vld [vmem:[%s5598_s13 + $0x78] sm:$0xff]  }
  0x9a   : > { %1723 = vmatpush1.bf16.msra.mxu0 %v5535_v3  ;;  %1836 = vmatpush1.bf16.msra.mxu1 %v5540_v4  ;;  %v5253_v3 = vld [vmem:[%s7027_s3 + $0x100] sm:$0xff]  }
  0x9b   : > { %1146 = vmatprep.mubr.bf16.mxu0 %v5452_v2  ;;  %1259 = vmatprep.mubr.bf16.mxu1 %v5452_v2  ;;  %v5255_v4 = vld [vmem:[%s7027_s3 + $0x180] sm:$0xff]  }
  0x9c   : > { %1724 = vmatprep.subr.bf16.mxu0 %v5548_v5  ;;  %1837 = vmatprep.subr.bf16.mxu1 %v5556_v6  ;;  %v5256_v5 = vld [vmem:[%s7027_s3 + $0x148] sm:$0xff]  }
  0x9d   : > { %v5258_v6 = vld [vmem:[%s7027_s3 + $0x1c8] sm:$0xff]  }
  0x9e   : > { %1725 = vmatpush1.bf16.msra.mxu0 %v5561_v7  ;;  %1838 = vmatpush1.bf16.msra.mxu1 %v5568_v8  ;;  %v5257_v7 = vld [vmem:[%s7027_s3 + $0x108] sm:$0xff]  }
  0x9f   : > { %1726 = vmatprep.subr.bf16.mxu0 %v5574_v9  ;;  %1839 = vmatprep.subr.bf16.mxu1 %v5579_v10  ;;  %v5259_v8 = vld [vmem:[%s7027_s3 + $0x188] sm:$0xff]   ;;  %v5260_v9 = vld [vmem:[%s7027_s3 + $0x150] sm:$0xff]  }
  0xa0   : > { %v5262_v10 = vld [vmem:[%s7027_s3 + $0x1d0] sm:$0xff]  }
  0xa1   : > { %4395 = vmatmul.mubr.msk.bf16.gmra.mrb[4].mxu0 %vm406_vm0, %v5228_v47  ;;  %4403 = vmatmul.mubr.msk.bf16.gmra.mrb[4].mxu1 %vm406_vm0, %v5228_v47 }
  0xa2   : > { %1156 = vmatprep.mubr.bf16.mxu0 %v5452_v2  ;;  %1269 = vmatprep.mubr.bf16.mxu1 %v5452_v2 }
  0xa3   : > { %1727 = vmatpush1.bf16.msra.mxu0 %v5584_v11  ;;  %1840 = vmatpush1.bf16.msra.mxu1 %v5591_v12  ;;  %v5245_v11 = vld [vmem:[%s5598_s13 + $0x68] sm:$0xff]   ;;  %v1396_v12 = vlaneseq }
  0xa4   : > { %1956 = vmatprep.subr.bf16.mxu0 %v5603_v13  ;;  %2069 = vmatprep.subr.bf16.mxu1 %v5616_v16  ;;  %v5261_v13 = vld [vmem:[%s7027_s3 + $0x110] sm:$0xff]   ;;  %v5266_v16 = vld [vmem:[%s7027_s3 + $0x1d8] sm:$0xff]  }
  0xa9   : > { %4396 = vmatmul.mubr.msk.bf16.gmra.mrb[8].mxu0 %vm406_vm0, %v5229_v48  ;;  %4404 = vmatmul.mubr.msk.bf16.gmra.mrb[8].mxu1 %vm406_vm0, %v5229_v48 }
  0xaa   : > { %1166 = vmatprep.mubr.bf16.mxu0 %v5452_v2  ;;  %1279 = vmatprep.mubr.bf16.mxu1 %v5452_v2 }
  0xb1   : > { %4397 = vmatmul.mubr.msk.bf16.gmra.mrb[12].mxu0 %vm406_vm0, %v5230_v49  ;;  %4405 = vmatmul.mubr.msk.bf16.gmra.mrb[12].mxu1 %vm406_vm0, %v5230_v49 }
  0xb2   : > { %1176 = vmatprep.mubr.bf16.mxu0 %v5452_v2  ;;  %1289 = vmatprep.mubr.bf16.mxu1 %v5452_v2 }
  0xb9   : > { %4398 = vmatmul.mubr.msk.bf16.gmra.mrb[16].mxu0 %vm406_vm0, %v5231_v50  ;;  %4406 = vmatmul.mubr.msk.bf16.gmra.mrb[16].mxu1 %vm406_vm0, %v5231_v50 }
  0xba   : > { %1186 = vmatprep.mubr.bf16.mxu0 %v5452_v2  ;;  %1299 = vmatprep.mubr.bf16.mxu1 %v5452_v2 }
  0xc1   : > { %4399 = vmatmul.mubr.msk.bf16.gmra.mrb[20].mxu0 %vm406_vm0, %v5232_v51  ;;  %4407 = vmatmul.mubr.msk.bf16.gmra.mrb[20].mxu1 %vm406_vm0, %v5232_v51 }
  0xc2   : > { %1196 = vmatprep.mubr.bf16.mxu0 %v5452_v2  ;;  %1309 = vmatprep.mubr.bf16.mxu1 %v5452_v2 }
  0xc9   : > { %4400 = vmatmul.mubr.msk.bf16.gmra.mrb[24].mxu0 %vm406_vm0, %v5233_v52  ;;  %4408 = vmatmul.mubr.msk.bf16.gmra.mrb[24].mxu1 %vm406_vm0, %v5233_v52 }
  0xca   : > { %1206 = vmatprep.mubr.bf16.mxu0 %v5452_v2  ;;  %1319 = vmatprep.mubr.bf16.mxu1 %v5452_v2 }
  0xd1   : > { %4401 = vmatmul.mubr.msk.bf16.gmra.mrb[28].mxu0 %vm406_vm0, %v5234_v53  ;;  %4409 = vmatmul.mubr.msk.bf16.gmra.mrb[28].mxu1 %vm406_vm0, %v5234_v53 }
  0xd2   : > { %1754 = vmatprep.mubr.bf16.mxu0 %v5452_v2  ;;  %1867 = vmatprep.mubr.bf16.mxu1 %v5452_v2 }
  0xd9   : > { %4418 = vmatmul.mubr.msk.bf16.vlgmr.msra.gmra.mrb[32].mxu0 %vm406_vm0, %v5910_v54  ;;  %4426 = vmatmul.mubr.msk.bf16.vlgmr.msra.gmra.mrb[32].mxu1 %vm406_vm0, %v5910_v54 }
  0xda   : > { %1957 = vmatpush1.bf16.msra.mxu0 %v5608_v14  ;;  %2070 = vmatpush1.bf16.msra.mxu1 %v5623_v17  ;;  %v5263_v14 = vld [vmem:[%s7027_s3 + $0x190] sm:$0xff]   ;;  %v1397_v17 = vshrl.u32 %v1396_v12, 7 }
  0xdb   : > { %1764 = vmatprep.mubr.bf16.mxu0 %v5452_v2  ;;  %1877 = vmatprep.mubr.bf16.mxu1 %v5452_v2 }
  0xdc   : > { %1958 = vmatprep.subr.bf16.mxu0 %v5630_v18  ;;  %2071 = vmatprep.subr.bf16.mxu1 %v5653_v21  ;;  %v5265_v18 = vld [vmem:[%s7027_s3 + $0x118] sm:$0xff]   ;;  %v5270_v21 = vld [vmem:[%s7027_s3 + $0x1e0] sm:$0xff]  }
  0xde   : > { %1959 = vmatpush1.bf16.msra.mxu0 %v5639_v19  ;;  %2072 = vmatpush1.bf16.msra.mxu1 %v5646_v20  ;;  %v5267_v19 = vld [vmem:[%s7027_s3 + $0x198] sm:$0xff]   ;;  %v5268_v20 = vld [vmem:[%s7027_s3 + $0x160] sm:$0xff]  }
  0xdf   : > { %1960 = vmatprep.subr.bf16.mxu0 %v5665_v23  ;;  %2073 = vmatprep.subr.bf16.mxu1 %v5675_v25  ;;  %v1398_v23 = vsub.s32 0, %v1397_v17  ;;  %v1394_v25 = vld [vmem:[%s7026_s2] sm:$0xf] }
  0xe1   : > { %4419 = vmatmul.mubr.msk.bf16.gmra.mrb[36].mxu0 %vm406_vm0, %v5923_v55  ;;  %4427 = vmatmul.mubr.msk.bf16.gmra.mrb[36].mxu1 %vm406_vm0, %v5923_v55  ;;  %v6098_v32 = vrot.slane %v1394_v25, %v1398_v23 }
  0xe2   : > { %1774 = vmatprep.mubr.bf16.mxu0 %v5452_v2  ;;  %1887 = vmatprep.mubr.bf16.mxu1 %v5452_v2 }
  0xe3   : > { %1961 = vmatpush1.bf16.msra.mxu0 %v5670_v24  ;;  %2074 = vmatpush1.bf16.msra.mxu1 %v5681_v26  ;;  %v1406_v24 = vsub.s32 2, %v1397_v17  ;;  %v1402_v26 = vsub.s32 1, %v1397_v17 }
  0xe4   : > { %2262 = vmatprep.subr.bf16.mxu0 %v5695_v27  ;;  %2375 = vmatprep.subr.bf16.mxu1 %v5703_v29  ;;  %v1410_v27 = vsub.s32 3, %v1397_v17  ;;  %v5271_v29 = vld [vmem:[%s7027_s3 + $0x1a0] sm:$0xff]  }
  0xe5   : > { %v6100_v33 = vrot.slane %v1394_v25, %v1406_v24  ;;  %v6102_v34 = vrot.slane %v1394_v25, %v1402_v26 }
  0xe6   : > { %v6104_v35 = vrot.slane %v1394_v25, %v1410_v27 }
  0xe9   : > { %4420 = vmatmul.mubr.msk.bf16.gmra.mrb[40].mxu0 %vm406_vm0, %v5237_v56  ;;  %4428 = vmatmul.mubr.msk.bf16.gmra.mrb[40].mxu1 %vm406_vm0, %v5237_v56 }
  0xea   : > { %1784 = vmatprep.mubr.bf16.mxu0 %v5452_v2  ;;  %1897 = vmatprep.mubr.bf16.mxu1 %v5452_v2 }
  0xf1   : > { %4421 = vmatmul.mubr.msk.bf16.gmra.mrb[44].mxu0 %vm406_vm0, %v5238_v57  ;;  %4429 = vmatmul.mubr.msk.bf16.gmra.mrb[44].mxu1 %vm406_vm0, %v5238_v57 }
  0xf2   : > { %1794 = vmatprep.mubr.bf16.mxu0 %v5452_v2  ;;  %1907 = vmatprep.mubr.bf16.mxu1 %v5452_v2 }
  0xf9   : > { %4422 = vmatmul.mubr.msk.bf16.gmra.mrb[48].mxu0 %vm406_vm0, %v5239_v58  ;;  %4430 = vmatmul.mubr.msk.bf16.gmra.mrb[48].mxu1 %vm406_vm0, %v5239_v58 }
  0xfa   : > { %1804 = vmatprep.mubr.bf16.mxu0 %v5452_v2  ;;  %1917 = vmatprep.mubr.bf16.mxu1 %v5452_v2 }
 0x101   : > { %4423 = vmatmul.mubr.msk.bf16.gmra.mrb[52].mxu0 %vm406_vm0, %v5240_v59  ;;  %4431 = vmatmul.mubr.msk.bf16.gmra.mrb[52].mxu1 %vm406_vm0, %v5240_v59 }
 0x102   : > { %1814 = vmatprep.mubr.bf16.mxu0 %v5452_v2  ;;  %1927 = vmatprep.mubr.bf16.mxu1 %v5452_v2 }
 0x109   : > { %4424 = vmatmul.mubr.msk.bf16.gmra.mrb[56].mxu0 %vm406_vm0, %v5241_v60  ;;  %4432 = vmatmul.mubr.msk.bf16.gmra.mrb[56].mxu1 %vm406_vm0, %v5241_v60 }
 0x10a   : > { %1824 = vmatprep.mubr.bf16.mxu0 %v5452_v2  ;;  %1937 = vmatprep.mubr.bf16.mxu1 %v5452_v2 }
 0x111   : > { %4425 = vmatmul.mubr.msk.bf16.gmra.mrb[60].mxu0 %vm406_vm0, %v5242_v61  ;;  %4433 = vmatmul.mubr.msk.bf16.gmra.mrb[60].mxu1 %vm406_vm0, %v5242_v61 }
 0x112   : > { %1988 = vmatprep.mubr.bf16.mxu0 %v5452_v2  ;;  %2101 = vmatprep.mubr.bf16.mxu1 %v5452_v2 }
 0x119   : > { %4435 = vmatmul.mubr.msk.bf16.vlgmr.msra.gmra.mrb[32].mxu0 %vm406_vm0, %v5243_v62  ;;  %4443 = vmatmul.mubr.msk.bf16.vlgmr.msra.gmra.mrb[32].mxu1 %vm406_vm0, %v5243_v62 }
 0x11a   : > { %2263 = vmatpush1.bf16.msra.mxu0 %v5754_v36  ;;  %2376 = vmatpush1.bf16.msra.mxu1 %v5759_v37  ;;  %v5273_v36 = vld [vmem:[%s7027_s3 + $0x128] sm:$0xff]  }
 0x11b   : > { %1998 = vmatprep.mubr.bf16.mxu0 %v5452_v2  ;;  %2111 = vmatprep.mubr.bf16.mxu1 %v5452_v2  ;;  %v5275_v37 = vld [vmem:[%s7027_s3 + $0x1a8] sm:$0xff]  }
 0x11c   : > { %2264 = vmatprep.subr.bf16.mxu0 %v5764_v38  ;;  %2377 = vmatprep.subr.bf16.mxu1 %v5769_v39 }
 0x11e   : > { %2265 = vmatpush1.bf16.msra.mxu0 %v5774_v40  ;;  %2378 = vmatpush1.bf16.msra.mxu1 %v5779_v41  ;;  %v5276_v40 = vld [vmem:[%s7027_s3 + $0x170] sm:$0xff]  }
 0x11f   : > { %2266 = vmatprep.subr.bf16.mxu0 %v5786_v42  ;;  %2379 = vmatprep.subr.bf16.mxu1 %v5795_v43  ;;  %v5278_v41 = vld [vmem:[%s7027_s3 + $0x1f0] sm:$0xff]  }
 0x121   : > { %4436 = vmatmul.mubr.msk.bf16.gmra.mrb[36].mxu0 %vm406_vm0, %v5910_v54  ;;  %4444 = vmatmul.mubr.msk.bf16.gmra.mrb[36].mxu1 %vm406_vm0, %v5910_v54 }
 0x122   : > { %2008 = vmatprep.mubr.bf16.mxu0 %v5452_v2  ;;  %2121 = vmatprep.mubr.bf16.mxu1 %v5452_v2 }
 0x123   : > { %2267 = vmatpush1.bf16.msra.mxu0 %v5802_v44  ;;  %2380 = vmatpush1.bf16.msra.mxu1 %v5807_v45 }
 0x124   : > { %4606 = vmatprep.subr.bf16.mxu0 %v5252_v63  ;;  %4670 = vmatprep.subr.bf16.mxu1 %v5254_v0 }
 0x129   : > { %4437 = vmatmul.mubr.msk.bf16.gmra.mrb[40].mxu0 %vm406_vm0, %v5923_v55  ;;  %4445 = vmatmul.mubr.msk.bf16.gmra.mrb[40].mxu1 %vm406_vm0, %v5923_v55  ;;  %v5277_v55 = vld [vmem:[%s7027_s3 + $0x130] sm:$0xff]  }
 0x12a   : > { %2018 = vmatprep.mubr.bf16.mxu0 %v5452_v2  ;;  %2131 = vmatprep.mubr.bf16.mxu1 %v5452_v2 }
 0x131   : > { %4438 = vmatmul.mubr.msk.bf16.gmra.mrb[44].mxu0 %vm406_vm0, %v5237_v56  ;;  %4446 = vmatmul.mubr.msk.bf16.gmra.mrb[44].mxu1 %vm406_vm0, %v5237_v56  ;;  %v5279_v56 = vld [vmem:[%s7027_s3 + $0x1b0] sm:$0xff]  }
 0x132   : > { %2028 = vmatprep.mubr.bf16.mxu0 %v5452_v2  ;;  %2141 = vmatprep.mubr.bf16.mxu1 %v5452_v2 }
 0x139   : > { %4439 = vmatmul.mubr.msk.bf16.gmra.mrb[48].mxu0 %vm406_vm0, %v5238_v57  ;;  %4447 = vmatmul.mubr.msk.bf16.gmra.mrb[48].mxu1 %vm406_vm0, %v5238_v57 }
 0x13a   : > { %2038 = vmatprep.mubr.bf16.mxu0 %v5452_v2  ;;  %2151 = vmatprep.mubr.bf16.mxu1 %v5452_v2 }
 0x141   : > { %4440 = vmatmul.mubr.msk.bf16.gmra.mrb[52].mxu0 %vm406_vm0, %v5239_v58  ;;  %4448 = vmatmul.mubr.msk.bf16.gmra.mrb[52].mxu1 %vm406_vm0, %v5239_v58 }
 0x142   : > { %2048 = vmatprep.mubr.bf16.mxu0 %v5452_v2  ;;  %2161 = vmatprep.mubr.bf16.mxu1 %v5452_v2 }
 0x149   : > { %4441 = vmatmul.mubr.msk.bf16.gmra.mrb[56].mxu0 %vm406_vm0, %v5240_v59  ;;  %4449 = vmatmul.mubr.msk.bf16.gmra.mrb[56].mxu1 %vm406_vm0, %v5240_v59 }
 0x14a   : > { %2058 = vmatprep.mubr.bf16.mxu0 %v5452_v2  ;;  %2171 = vmatprep.mubr.bf16.mxu1 %v5452_v2 }
 0x151   : > { %4442 = vmatmul.mubr.msk.bf16.gmra.mrb[60].mxu0 %vm406_vm0, %v5241_v60  ;;  %4450 = vmatmul.mubr.msk.bf16.gmra.mrb[60].mxu1 %vm406_vm0, %v5241_v60 }
 0x152   : > { %2294 = vmatprep.mubr.bf16.mxu0 %v5452_v2  ;;  %2407 = vmatprep.mubr.bf16.mxu1 %v5452_v2 }
 0x159   : > { %4459 = vmatmul.mubr.msk.bf16.vlgmr.msra.gmra.mrb[32].mxu0 %vm406_vm0, %v5244_v1  ;;  %4467 = vmatmul.mubr.msk.bf16.vlgmr.msra.gmra.mrb[32].mxu1 %vm406_vm0, %v5244_v1 }
 0x15a   : > { %2304 = vmatprep.mubr.bf16.mxu0 %v5452_v2  ;;  %2417 = vmatprep.mubr.bf16.mxu1 %v5452_v2 }
 0x15b   : > { %4607 = vmatpush3.bf16.msra.mxu0 %v5253_v3  ;;  %4671 = vmatpush3.bf16.msra.mxu1 %v5255_v4 }
 0x15c   : > { %4608 = vmatprep.subr.bf16.mxu0 %v5256_v5  ;;  %4672 = vmatprep.subr.bf16.mxu1 %v5258_v6 }
 0x15f   : > { %4609 = vmatpush3.bf16.msra.mxu0 %v5257_v7  ;;  %4673 = vmatpush3.bf16.msra.mxu1 %v5259_v8 }
 0x160   : > { %4610 = vmatprep.subr.bf16.mxu0 %v5260_v9  ;;  %4674 = vmatprep.subr.bf16.mxu1 %v5262_v10 }
 0x161   : > { %4460 = vmatmul.mubr.msk.bf16.gmra.mrb[36].mxu0 %vm406_vm0, %v5245_v11  ;;  %4468 = vmatmul.mubr.msk.bf16.gmra.mrb[36].mxu1 %vm406_vm0, %v5245_v11 }
 0x162   : > { %2314 = vmatprep.mubr.bf16.mxu0 %v5452_v2  ;;  %2427 = vmatprep.mubr.bf16.mxu1 %v5452_v2 }
 0x163   : > { %4611 = vmatpush3.bf16.msra.mxu0 %v5261_v13  ;;  %4675 = vmatpush3.bf16.msra.mxu1 %v5263_v14  ;;  %v5248_v14 = vld [vmem:[%s5598_s13 + $0x80] sm:$0xff]  }
 0x164   : > { %4612 = vmatprep.subr.bf16.mxu0 %v5264_v15  ;;  %4676 = vmatprep.subr.bf16.mxu1 %v5266_v16 }
 0x167   : > { %4613 = vmatpush3.bf16.msra.mxu0 %v5265_v18  ;;  %4677 = vmatpush3.bf16.msra.mxu1 %v5267_v19 }
 0x168   : > { %4614 = vmatprep.subr.bf16.mxu0 %v5268_v20  ;;  %4678 = vmatprep.subr.bf16.mxu1 %v5270_v21 }
 0x169   : > { %4461 = vmatmul.mubr.msk.bf16.gmra.mrb[40].mxu0 %vm406_vm0, %v5246_v22  ;;  %4469 = vmatmul.mubr.msk.bf16.gmra.mrb[40].mxu1 %vm406_vm0, %v5246_v22 }
 0x16a   : > { %2324 = vmatprep.mubr.bf16.mxu0 %v5452_v2  ;;  %2437 = vmatprep.mubr.bf16.mxu1 %v5452_v2 }
 0x16b   : > { %4615 = vmatpush3.bf16.msra.mxu0 %v5269_v28  ;;  %4679 = vmatpush3.bf16.msra.mxu1 %v5271_v29 }
 0x16c   : > { %v1138_v38 = vpop.f32.mrb[0].mxu0  ;;  %v1251_v39 = vpop.f32.mrb[0].mxu1  ;;  %4616 = vmatprep.subr.bf16.mxu0 %v5272_v30  ;;  %4680 = vmatprep.subr.bf16.mxu1 %v5274_v31 }
 0x16d   : > { %v1416_v42 = vadd.f32 %v6098_v32, %v1138_v38  ;;  %v1418_v43 = vadd.f32 %v6100_v33, %v1251_v39  ;;  %v1140_v44 = vpop.f32.mrb[1].mxu0  ;;  %v1253_v45 = vpop.f32.mrb[1].mxu1 }
 0x16e   : > { %v1417_v47 = vadd.f32 %v6102_v34, %v1140_v44  ;;  %v1419_v48 = vadd.f32 %v6104_v35, %v1253_v45  ;;  %v1142_v49 = vpop.f32.mrb[2].mxu0  ;;  %v1255_v50 = vpop.f32.mrb[2].mxu1 }
 0x16f   : > { %v1420_v51 = vadd.f32 %v6098_v32, %v1142_v49  ;;  %v1422_v52 = vadd.f32 %v6100_v33, %v1255_v50  ;;  %v1144_v53 = vpop.f32.mrb[3].mxu0  ;;  %v1257_v54 = vpop.f32.mrb[3].mxu1  ;;  %4617 = vmatpush3.bf16.msra.mxu0 %v5273_v36  ;;  %4681 = vmatpush3.bf16.msra.mxu1 %v5275_v37  ;;  %v1480_v59 = vmax.f32 %v1416_v42, 0.0  ;;  %v1482_v60 = vmax.f32 %v1418_v43, 0.0 }
 0x170   : > { %v1421_v57 = vadd.f32 %v6102_v34, %v1144_v53  ;;  %v1423_v58 = vadd.f32 %v6104_v35, %v1257_v54  ;;  %4618 = vmatprep.subr.bf16.mxu0 %v5276_v40  ;;  %4682 = vmatprep.subr.bf16.mxu1 %v5278_v41  ;;  %v1481_v63 = vmax.f32 %v1417_v47, 0.0  ;;  %v1483_v0 = vmax.f32 %v1419_v48, 0.0  ;;  %v5249_v47 = vld [vmem:[%s5598_s13 + $0x88] sm:$0xff]  }
 0x171   : > { %v1484_v61 = vmax.f32 %v1420_v51, 0.0  ;;  %v1486_v62 = vmax.f32 %v1422_v52, 0.0  ;;  %4462 = vmatmul.mubr.msk.bf16.gmra.mrb[44].mxu0 %vm406_vm0, %v5247_v46  ;;  %4470 = vmatmul.mubr.msk.bf16.gmra.mrb[44].mxu1 %vm406_vm0, %v5247_v46 }
 0x172   : > { %v1485_v1 = vmax.f32 %v1421_v57, 0.0  ;;  %v1487_v3 = vmax.f32 %v1423_v58, 0.0  ;;  %2334 = vmatprep.mubr.bf16.mxu0 %v5452_v2  ;;  %2447 = vmatprep.mubr.bf16.mxu1 %v5452_v2 }
 0x173   : > { %v6139_v4 = vpack.c.bf16 %v1484_v61, %v1480_v59  ;;  %v6141_v5 = vpack.c.bf16 %v1486_v62, %v1482_v60  ;;  %4619 = vmatpush3.bf16.msra.mxu0 %v5277_v55  ;;  %4683 = vmatpush3.bf16.msra.mxu1 %v5279_v56 }
 0x174   : > { %v6143_v6 = vpack.c.bf16 %v1485_v1, %v1481_v63  ;;  %v6145_v7 = vpack.c.bf16 %v1487_v3, %v1483_v0  ;;  %v1148_v8 = vpop.f32.mrb[4].mxu0  ;;  %v1261_v9 = vpop.f32.mrb[4].mxu1 }
 0x175   : > { %v1424_v10 = vadd.f32 %v6098_v32, %v1148_v8  ;;  %v1426_v11 = vadd.f32 %v6100_v33, %v1261_v9  ;;  %v1150_v12 = vpop.f32.mrb[5].mxu0  ;;  %v1263_v13 = vpop.f32.mrb[5].mxu1 }
 0x176   : > { %v1425_v15 = vadd.f32 %v6102_v34, %v1150_v12  ;;  %v1427_v16 = vadd.f32 %v6104_v35, %v1263_v13  ;;  %v1152_v17 = vpop.f32.mrb[6].mxu0  ;;  %v1265_v18 = vpop.f32.mrb[6].mxu1 }
 0x177   : > { %v1428_v19 = vadd.f32 %v6098_v32, %v1152_v17  ;;  %v1430_v20 = vadd.f32 %v6100_v33, %v1265_v18  ;;  %v1154_v21 = vpop.f32.mrb[7].mxu0  ;;  %v1267_v22 = vpop.f32.mrb[7].mxu1  ;;  %v1488_v25 = vmax.f32 %v1424_v10, 0.0  ;;  %v1490_v26 = vmax.f32 %v1426_v11, 0.0  ;;  %v5250_v17 = vld [vmem:[%s5598_s13 + $0x90] sm:$0xff]  }
 0x178   : > { %v1429_v23 = vadd.f32 %v6102_v34, %v1154_v21  ;;  %v1431_v24 = vadd.f32 %v6104_v35, %v1267_v22  ;;  %v1489_v29 = vmax.f32 %v1425_v15, 0.0  ;;  %v1491_v30 = vmax.f32 %v1427_v16, 0.0 }
 0x179   : > { %v1492_v27 = vmax.f32 %v1428_v19, 0.0  ;;  %v1494_v28 = vmax.f32 %v1430_v20, 0.0  ;;  %4463 = vmatmul.mubr.msk.bf16.gmra.mrb[48].mxu0 %vm406_vm0, %v5248_v14  ;;  %4471 = vmatmul.mubr.msk.bf16.gmra.mrb[48].mxu1 %vm406_vm0, %v5248_v14 }
 0x17a   : > { %v1493_v31 = vmax.f32 %v1429_v23, 0.0  ;;  %v1495_v36 = vmax.f32 %v1431_v24, 0.0  ;;  %2344 = vmatprep.mubr.bf16.mxu0 %v5452_v2  ;;  %2457 = vmatprep.mubr.bf16.mxu1 %v5452_v2 }
 0x17b   : > { %v6160_v37 = vpack.c.bf16 %v1492_v27, %v1488_v25  ;;  %v6162_v38 = vpack.c.bf16 %v1494_v28, %v1490_v26 }
 0x17c   : > { %v6164_v39 = vpack.c.bf16 %v1493_v31, %v1489_v29  ;;  %v6166_v40 = vpack.c.bf16 %v1495_v36, %v1491_v30  ;;  %v1158_v41 = vpop.f32.mrb[8].mxu0  ;;  %v1271_v42 = vpop.f32.mrb[8].mxu1 }
 0x17d   : > { %v1432_v43 = vadd.f32 %v6098_v32, %v1158_v41  ;;  %v1434_v44 = vadd.f32 %v6100_v33, %v1271_v42  ;;  %v1160_v45 = vpop.f32.mrb[9].mxu0  ;;  %v1273_v46 = vpop.f32.mrb[9].mxu1 }
 0x17e   : > { %v1433_v48 = vadd.f32 %v6102_v34, %v1160_v45  ;;  %v1435_v49 = vadd.f32 %v6104_v35, %v1273_v46  ;;  %v1162_v50 = vpop.f32.mrb[10].mxu0  ;;  %v1275_v51 = vpop.f32.mrb[10].mxu1 }
 0x17f   : > { %v1436_v52 = vadd.f32 %v6098_v32, %v1162_v50  ;;  %v1438_v53 = vadd.f32 %v6100_v33, %v1275_v51  ;;  %v1164_v54 = vpop.f32.mrb[11].mxu0  ;;  %v1277_v55 = vpop.f32.mrb[11].mxu1  ;;  %v1496_v58 = vmax.f32 %v1432_v43, 0.0  ;;  %v1498_v59 = vmax.f32 %v1434_v44, 0.0 }
 0x180   : > { %v1437_v56 = vadd.f32 %v6102_v34, %v1164_v54  ;;  %v1439_v57 = vadd.f32 %v6104_v35, %v1277_v55  ;;  %v1497_v62 = vmax.f32 %v1433_v48, 0.0  ;;  %v1499_v63 = vmax.f32 %v1435_v49, 0.0  ;;  %v5251_v54 = vld [vmem:[%s5598_s13 + $0x98] sm:$0xff]   ;;  %s4282_s13 = sshll.u32 %s5434_s18, 4  ;;  %s4283_s18 = sshll.u32 %s7041_s19, 5 }
 0x181   : > { %v1500_v60 = vmax.f32 %v1436_v52, 0.0  ;;  %v1502_v61 = vmax.f32 %v1438_v53, 0.0  ;;  %4464 = vmatmul.mubr.msk.bf16.gmra.mrb[52].mxu0 %vm406_vm0, %v5249_v47  ;;  %4472 = vmatmul.mubr.msk.bf16.gmra.mrb[52].mxu1 %vm406_vm0, %v5249_v47  ;;  %p255_p7 = scmp.lt.s32.totalorder %s4282_s13, 31 }
 0x182   : > { %v1501_v0 = vmax.f32 %v1437_v56, 0.0  ;;  %v1503_v1 = vmax.f32 %v1439_v57, 0.0  ;;  %2354 = vmatprep.mubr.bf16.mxu0 %v5452_v2  ;;  %2467 = vmatprep.mubr.bf16.mxu1 %v5452_v2 }
 0x183   : > { %v6181_v3 = vpack.c.bf16 %v1500_v60, %v1496_v58  ;;  %v6183_v8 = vpack.c.bf16 %v1502_v61, %v1498_v59  ;;  %s7043_s13 = smov (!%p255_p7, %s4282_s13), 31 }
 0x184   : > { %v6185_v9 = vpack.c.bf16 %v1501_v0, %v1497_v62  ;;  %v6187_v10 = vpack.c.bf16 %v1503_v1, %v1499_v63  ;;  %v1168_v11 = vpop.f32.mrb[12].mxu0  ;;  %v1281_v12 = vpop.f32.mrb[12].mxu1  ;;  %s258_s25 = sadd.s32 %s4283_s18, %s7043_s13 }
 0x185   : > { %v1440_v13 = vadd.f32 %v6098_v32, %v1168_v11  ;;  %v1442_v14 = vadd.f32 %v6100_v33, %v1281_v12  ;;  %v1170_v15 = vpop.f32.mrb[13].mxu0  ;;  %v1283_v16 = vpop.f32.mrb[13].mxu1  ;;  %s4284_s26 = sshll.u32 %s258_s25, 3 }
 0x186   : > { %v1441_v18 = vadd.f32 %v6102_v34, %v1170_v15  ;;  %v1443_v19 = vadd.f32 %v6104_v35, %v1283_v16  ;;  %v1172_v20 = vpop.f32.mrb[14].mxu0  ;;  %v1285_v21 = vpop.f32.mrb[14].mxu1  ;;  %s6525_s30 = scalar_lea.vmem %s7029_s5, %s4284_s26 }
 0x187   : > { %v1444_v22 = vadd.f32 %v6098_v32, %v1172_v20  ;;  %v1446_v23 = vadd.f32 %v6100_v33, %v1285_v21  ;;  %v1174_v24 = vpop.f32.mrb[15].mxu0  ;;  %v1287_v25 = vpop.f32.mrb[15].mxu1  ;;  %v1504_v28 = vmax.f32 %v1440_v13, 0.0  ;;  %v1506_v29 = vmax.f32 %v1442_v14, 0.0 }
 0x188   : > { %v1445_v26 = vadd.f32 %v6102_v34, %v1174_v24  ;;  %v1447_v27 = vadd.f32 %v6104_v35, %v1287_v25  ;;  %v1505_v36 = vmax.f32 %v1441_v18, 0.0  ;;  %v1507_v41 = vmax.f32 %v1443_v19, 0.0 }
 0x189   : > { %v1508_v30 = vmax.f32 %v1444_v22, 0.0  ;;  %v1510_v31 = vmax.f32 %v1446_v23, 0.0  ;;  %4465 = vmatmul.mubr.msk.bf16.gmra.mrb[56].mxu0 %vm406_vm0, %v5250_v17  ;;  %4473 = vmatmul.mubr.msk.bf16.gmra.mrb[56].mxu1 %vm406_vm0, %v5250_v17 }
 0x18a   : > { %v1509_v42 = vmax.f32 %v1445_v26, 0.0  ;;  %v1511_v43 = vmax.f32 %v1447_v27, 0.0  ;;  %2364 = vmatprep.mubr.bf16.mxu0 %v5452_v2  ;;  %2477 = vmatprep.mubr.bf16.mxu1 %v5452_v2 }
 0x18b   : > { %v6202_v44 = vpack.c.bf16 %v1508_v30, %v1504_v28  ;;  %v6204_v45 = vpack.c.bf16 %v1510_v31, %v1506_v29 }
 0x18c   : > { %v6206_v46 = vpack.c.bf16 %v1509_v42, %v1505_v36  ;;  %v6208_v47 = vpack.c.bf16 %v1511_v43, %v1507_v41  ;;  %v1178_v48 = vpop.f32.mrb[16].mxu0  ;;  %v1291_v49 = vpop.f32.mrb[16].mxu1 }
 0x18d   : > { %v1448_v50 = vadd.f32 %v6098_v32, %v1178_v48  ;;  %v1450_v51 = vadd.f32 %v6100_v33, %v1291_v49  ;;  %v1180_v52 = vpop.f32.mrb[17].mxu0  ;;  %v1293_v53 = vpop.f32.mrb[17].mxu1 }
 0x18e   : > { %v1449_v55 = vadd.f32 %v6102_v34, %v1180_v52  ;;  %v1451_v2 = vadd.f32 %v6104_v35, %v1293_v53  ;;  %v1182_v56 = vpop.f32.mrb[18].mxu0  ;;  %v1295_v57 = vpop.f32.mrb[18].mxu1 }
 0x18f   : > { %v1452_v58 = vadd.f32 %v6098_v32, %v1182_v56  ;;  %v1454_v59 = vadd.f32 %v6100_v33, %v1295_v57  ;;  %v1184_v60 = vpop.f32.mrb[19].mxu0  ;;  %v1297_v61 = vpop.f32.mrb[19].mxu1  ;;  %v1512_v0 = vmax.f32 %v1448_v50, 0.0  ;;  %v1514_v1 = vmax.f32 %v1450_v51, 0.0 }
 0x190   : > { %v1453_v62 = vadd.f32 %v6102_v34, %v1184_v60  ;;  %v1455_v63 = vadd.f32 %v6104_v35, %v1297_v61  ;;  %v1513_v13 = vmax.f32 %v1449_v55, 0.0  ;;  %v1515_v14 = vmax.f32 %v1451_v2, 0.0 }
 0x191   : > { %v1516_v11 = vmax.f32 %v1452_v58, 0.0  ;;  %v1518_v12 = vmax.f32 %v1454_v59, 0.0  ;;  %4466 = vmatmul.mubr.msk.bf16.gmra.mrb[60].mxu0 %vm406_vm0, %v5251_v54  ;;  %4474 = vmatmul.mubr.msk.bf16.gmra.mrb[60].mxu1 %vm406_vm0, %v5251_v54 }
 0x192   : > { %v1517_v15 = vmax.f32 %v1453_v62, 0.0  ;;  %v1519_v16 = vmax.f32 %v1455_v63, 0.0 }
 0x193   : > { %v6221_v17 = vpack.c.bf16 %v1516_v11, %v1512_v0  ;;  %v6223_v18 = vpack.c.bf16 %v1518_v12, %v1514_v1 }
 0x194   : > { %v6225_v19 = vpack.c.bf16 %v1517_v15, %v1513_v13  ;;  %v6227_v20 = vpack.c.bf16 %v1519_v16, %v1515_v14  ;;  %v1188_v21 = vpop.f32.mrb[20].mxu0  ;;  %v1301_v22 = vpop.f32.mrb[20].mxu1 }
 0x195   : > { %v1456_v23 = vadd.f32 %v6098_v32, %v1188_v21  ;;  %v1458_v24 = vadd.f32 %v6100_v33, %v1301_v22  ;;  %v1190_v25 = vpop.f32.mrb[21].mxu0  ;;  %v1303_v26 = vpop.f32.mrb[21].mxu1 }
 0x196   : > { %v1457_v27 = vadd.f32 %v6102_v34, %v1190_v25  ;;  %v1459_v28 = vadd.f32 %v6104_v35, %v1303_v26  ;;  %v1192_v29 = vpop.f32.mrb[22].mxu0  ;;  %v1305_v30 = vpop.f32.mrb[22].mxu1 }
 0x197   : > { %v1460_v31 = vadd.f32 %v6098_v32, %v1192_v29  ;;  %v1462_v36 = vadd.f32 %v6100_v33, %v1305_v30  ;;  %v1194_v41 = vpop.f32.mrb[23].mxu0  ;;  %v1307_v42 = vpop.f32.mrb[23].mxu1  ;;  %v1520_v49 = vmax.f32 %v1456_v23, 0.0  ;;  %v1522_v50 = vmax.f32 %v1458_v24, 0.0 }
 0x198   : > { %v1461_v43 = vadd.f32 %v6102_v34, %v1194_v41  ;;  %v1463_v48 = vadd.f32 %v6104_v35, %v1307_v42  ;;  %v1521_v53 = vmax.f32 %v1457_v27, 0.0  ;;  %v1523_v54 = vmax.f32 %v1459_v28, 0.0 }
 0x199   : > { %v1524_v51 = vmax.f32 %v1460_v31, 0.0  ;;  %v1526_v52 = vmax.f32 %v1462_v36, 0.0 }
 0x19a   : > { %v1525_v55 = vmax.f32 %v1461_v43, 0.0  ;;  %v1527_v2 = vmax.f32 %v1463_v48, 0.0 }
 0x19b   : > { %v6237_v56 = vpack.c.bf16 %v1524_v51, %v1520_v49  ;;  %v6239_v57 = vpack.c.bf16 %v1526_v52, %v1522_v50 }
 0x19c   : > { %v6241_v58 = vpack.c.bf16 %v1525_v55, %v1521_v53  ;;  %v6243_v59 = vpack.c.bf16 %v1527_v2, %v1523_v54  ;;  %v1198_v60 = vpop.f32.mrb[24].mxu0  ;;  %v1311_v61 = vpop.f32.mrb[24].mxu1 }
 0x19d   : > { %v1464_v62 = vadd.f32 %v6098_v32, %v1198_v60  ;;  %v1466_v63 = vadd.f32 %v6100_v33, %v1311_v61  ;;  %v1200_v0 = vpop.f32.mrb[25].mxu0  ;;  %v1313_v1 = vpop.f32.mrb[25].mxu1 }
 0x19e   : > { %v1465_v11 = vadd.f32 %v6102_v34, %v1200_v0  ;;  %v1467_v12 = vadd.f32 %v6104_v35, %v1313_v1  ;;  %v1202_v13 = vpop.f32.mrb[26].mxu0  ;;  %v1315_v14 = vpop.f32.mrb[26].mxu1 }
 0x19f   : > { %v1468_v15 = vadd.f32 %v6098_v32, %v1202_v13  ;;  %v1470_v16 = vadd.f32 %v6100_v33, %v1315_v14  ;;  %v1204_v21 = vpop.f32.mrb[27].mxu0  ;;  %v1317_v22 = vpop.f32.mrb[27].mxu1  ;;  %v1528_v25 = vmax.f32 %v1464_v62, 0.0  ;;  %v1530_v26 = vmax.f32 %v1466_v63, 0.0 }
 0x1a0   : > { %v1469_v23 = vadd.f32 %v6102_v34, %v1204_v21  ;;  %v1471_v24 = vadd.f32 %v6104_v35, %v1317_v22  ;;  %v1529_v29 = vmax.f32 %v1465_v11, 0.0  ;;  %v1531_v30 = vmax.f32 %v1467_v12, 0.0 }
 0x1a1   : > { %v1532_v27 = vmax.f32 %v1468_v15, 0.0  ;;  %v1534_v28 = vmax.f32 %v1470_v16, 0.0 }
 0x1a2   : > { %v1533_v31 = vmax.f32 %v1469_v23, 0.0  ;;  %v1535_v36 = vmax.f32 %v1471_v24, 0.0 }
 0x1a3   : > { %v6253_v41 = vpack.c.bf16 %v1532_v27, %v1528_v25  ;;  %v6255_v42 = vpack.c.bf16 %v1534_v28, %v1530_v26 }
 0x1a4   : > { %v6257_v43 = vpack.c.bf16 %v1533_v31, %v1529_v29  ;;  %v6259_v48 = vpack.c.bf16 %v1535_v36, %v1531_v30  ;;  %v1208_v49 = vpop.f32.mrb[28].mxu0  ;;  %v1321_v50 = vpop.f32.mrb[28].mxu1  ;;  %v5280_v29 = vld [vmem:[%s7027_s3 + $0x178] sm:$0xff]  }
 0x1a5   : > { %v1472_v51 = vadd.f32 %v6098_v32, %v1208_v49  ;;  %v1474_v52 = vadd.f32 %v6100_v33, %v1321_v50  ;;  %v1210_v53 = vpop.f32.mrb[29].mxu0  ;;  %v1323_v54 = vpop.f32.mrb[29].mxu1  ;;  %v5282_v30 = vld [vmem:[%s7027_s3 + $0x1f8] sm:$0xff]   ;;  %4620 = vmatprep.subr.bf16.mxu0 %v5280_v29  ;;  %v5284_v49 = vld [vmem:[%s7027_s3 + $0x40] sm:$0xff]  }
 0x1a6   : > { %v1473_v55 = vadd.f32 %v6102_v34, %v1210_v53  ;;  %v1475_v2 = vadd.f32 %v6104_v35, %v1323_v54  ;;  %v1212_v60 = vpop.f32.mrb[30].mxu0  ;;  %v1325_v61 = vpop.f32.mrb[30].mxu1  ;;  %v5281_v31 = vld [vmem:[%s7027_s3 + $0x138] sm:$0xff]   ;;  %4684 = vmatprep.subr.bf16.mxu1 %v5282_v30  ;;  %v5286_v50 = vld [vmem:[%s7027_s3 + $0xc0] sm:$0xff]  }
 0x1a7   : > { %v1476_v62 = vadd.f32 %v6098_v32, %v1212_v60  ;;  %v1478_v63 = vadd.f32 %v6100_v33, %v1325_v61  ;;  %v1214_v0 = vpop.f32.mrb[31].mxu0  ;;  %v1327_v1 = vpop.f32.mrb[31].mxu1  ;;  %v1536_v13 = vmax.f32 %v1472_v51, 0.0  ;;  %v1538_v14 = vmax.f32 %v1474_v52, 0.0  ;;  %v5283_v36 = vld [vmem:[%s7027_s3 + $0x1b8] sm:$0xff]   ;;  %4621 = vmatpush3.bf16.msra.mxu0 %v5281_v31 }
 0x1a8   : > { %v1477_v11 = vadd.f32 %v6102_v34, %v1214_v0  ;;  %v1479_v12 = vadd.f32 %v6104_v35, %v1327_v1  ;;  %v1537_v21 = vmax.f32 %v1473_v55, 0.0  ;;  %v1539_v22 = vmax.f32 %v1475_v2, 0.0  ;;  %4685 = vmatpush3.bf16.msra.mxu1 %v5283_v36  ;;  %4734 = vmatprep.subr.bf16.mxu0 %v5284_v49 }
 0x1a9   : > { %v1540_v15 = vmax.f32 %v1476_v62, 0.0  ;;  %v1542_v16 = vmax.f32 %v1478_v63, 0.0  ;;  %4798 = vmatprep.subr.bf16.mxu1 %v5286_v50 }
 0x1aa   : > { %v1541_v23 = vmax.f32 %v1477_v11, 0.0  ;;  %v1543_v24 = vmax.f32 %v1479_v12, 0.0 }
 0x1ab   : > { %v6269_v25 = vpack.c.bf16 %v1540_v15, %v1536_v13  ;;  %v6271_v26 = vpack.c.bf16 %v1542_v16, %v1538_v14 }
 0x1ac   : > { %v6273_v27 = vpack.c.bf16 %v1541_v23, %v1537_v21  ;;  %v6275_v28 = vpack.c.bf16 %v1543_v24, %v1539_v22 }
 0x22c   : > { %v2296_v51 = vpop.f32.mrb[32].mxu0  ;;  %v2409_v52 = vpop.f32.mrb[32].mxu1 }
 0x22d   : > { %v2552_v53 = vadd.f32 %v2296_v51, %v6098_v32  ;;  %v2554_v54 = vadd.f32 %v2409_v52, %v6100_v33  ;;  %v2298_v55 = vpop.f32.mrb[33].mxu0  ;;  %v2411_v2 = vpop.f32.mrb[33].mxu1 }
 0x22e   : > { %v2553_v60 = vadd.f32 %v2298_v55, %v6102_v34  ;;  %v2555_v61 = vadd.f32 %v2411_v2, %v6104_v35  ;;  %v2300_v62 = vpop.f32.mrb[34].mxu0  ;;  %v2413_v63 = vpop.f32.mrb[34].mxu1  ;;  %v5285_v55 = vld [vmem:[%s7027_s3] sm:$0xff]  }
 0x22f   : > { %v2556_v0 = vadd.f32 %v2300_v62, %v6098_v32  ;;  %v2558_v1 = vadd.f32 %v2413_v63, %v6100_v33  ;;  %v2302_v11 = vpop.f32.mrb[35].mxu0  ;;  %v2415_v12 = vpop.f32.mrb[35].mxu1  ;;  %v2616_v15 = vmax.f32 %v2552_v53, 0.0  ;;  %v2618_v16 = vmax.f32 %v2554_v54, 0.0  ;;  %v5287_v53 = vld [vmem:[%s7027_s3 + $0x80] sm:$0xff]   ;;  %v5288_v62 = vld [vmem:[%s7027_s3 + $0x48] sm:$0xff]  }
 0x230   : > { %v2557_v13 = vadd.f32 %v2302_v11, %v6102_v34  ;;  %v2559_v14 = vadd.f32 %v2415_v12, %v6104_v35  ;;  %v2617_v23 = vmax.f32 %v2553_v60, 0.0  ;;  %v2619_v24 = vmax.f32 %v2555_v61, 0.0  ;;  %v5290_v63 = vld [vmem:[%s7027_s3 + $0xc8] sm:$0xff]  }
 0x231   : > { %v2620_v21 = vmax.f32 %v2556_v0, 0.0  ;;  %v2622_v22 = vmax.f32 %v2558_v1, 0.0 }
 0x232   : > { %v2621_v29 = vmax.f32 %v2557_v13, 0.0  ;;  %v2623_v30 = vmax.f32 %v2559_v14, 0.0 }
 0x233   : > { %v2680_v31 = vpack.c.bf16 %v2620_v21, %v2616_v15  ;;  %v2682_v36 = vpack.c.bf16 %v2622_v22, %v2618_v16 }
 0x234   : > { %v2681_v49 = vpack.c.bf16 %v2621_v29, %v2617_v23  ;;  %v2683_v50 = vpack.c.bf16 %v2623_v30, %v2619_v24  ;;  %v2306_v51 = vpop.f32.mrb[36].mxu0  ;;  %v2419_v52 = vpop.f32.mrb[36].mxu1  ;;  %v5289_v23 = vld [vmem:[%s7027_s3 + $0x8] sm:$0xff]  }
 0x235   : > { %v2560_v54 = vadd.f32 %v2306_v51, %v6098_v32  ;;  %v2562_v2 = vadd.f32 %v2419_v52, %v6100_v33  ;;  %v2308_v60 = vpop.f32.mrb[37].mxu0  ;;  %v2421_v61 = vpop.f32.mrb[37].mxu1  ;;  %v5291_v24 = vld [vmem:[%s7027_s3 + $0x88] sm:$0xff]  }
 0x236   : > { %v2561_v0 = vadd.f32 %v2308_v60, %v6102_v34  ;;  %v2563_v1 = vadd.f32 %v2421_v61, %v6104_v35  ;;  %v2310_v11 = vpop.f32.mrb[38].mxu0  ;;  %v2423_v12 = vpop.f32.mrb[38].mxu1  ;;  %3001 = vmatprep.mubr.bf16.mxu0 %v2681_v49  ;;  %3098 = vmatprep.mubr.bf16.mxu1 %v2683_v50 }
 0x237   : > { %v2564_v13 = vadd.f32 %v2310_v11, %v6098_v32  ;;  %v2566_v14 = vadd.f32 %v2423_v12, %v6100_v33  ;;  %v2312_v15 = vpop.f32.mrb[39].mxu0  ;;  %v2425_v16 = vpop.f32.mrb[39].mxu1  ;;  %3002 = vmatmul.mubr.bf16.vlgmr.msra.gmra.mrb[64].mxu0 %v2680_v31  ;;  %3099 = vmatmul.mubr.bf16.vlgmr.msra.gmra.mrb[64].mxu1 %v2682_v36  ;;  %v2624_v29 = vmax.f32 %v2560_v54, 0.0  ;;  %v2626_v30 = vmax.f32 %v2562_v2, 0.0  ;;  %v5292_v31 = vld [vmem:[%s7027_s3 + $0x50] sm:$0xff]  }
 0x238   : > { %v2565_v21 = vadd.f32 %v2312_v15, %v6102_v34  ;;  %v2567_v22 = vadd.f32 %v2425_v16, %v6104_v35  ;;  %4735 = vmatpush3.bf16.msra.mxu0 %v5285_v55  ;;  %4799 = vmatpush3.bf16.msra.mxu1 %v5287_v53  ;;  %v5294_v36 = vld [vmem:[%s7027_s3 + $0xd0] sm:$0xff]   ;;  %v2625_v51 = vmax.f32 %v2561_v0, 0.0  ;;  %v2627_v52 = vmax.f32 %v2563_v1, 0.0  ;;  %v5296_v15 = vld [vmem:[%s7027_s3 + $0x58] sm:$0xff]  }
 0x239   : > { %v2628_v49 = vmax.f32 %v2564_v13, 0.0  ;;  %v2630_v50 = vmax.f32 %v2566_v14, 0.0  ;;  %4736 = vmatprep.subr.bf16.mxu0 %v5288_v62  ;;  %4800 = vmatprep.subr.bf16.mxu1 %v5290_v63  ;;  %v5293_v62 = vld [vmem:[%s7027_s3 + $0x10] sm:$0xff]   ;;  %v5298_v16 = vld [vmem:[%s7027_s3 + $0xd8] sm:$0xff]  }
 0x23a   : > { %v2629_v55 = vmax.f32 %v2565_v21, 0.0  ;;  %v2631_v53 = vmax.f32 %v2567_v22, 0.0  ;;  %v5295_v63 = vld [vmem:[%s7027_s3 + $0x90] sm:$0xff]  }
 0x23b   : > { %v2684_v60 = vpack.c.bf16 %v2628_v49, %v2624_v29  ;;  %v2686_v61 = vpack.c.bf16 %v2630_v50, %v2626_v30 }
 0x23c   : > { %v2685_v54 = vpack.c.bf16 %v2629_v55, %v2625_v51  ;;  %v2687_v2 = vpack.c.bf16 %v2631_v53, %v2627_v52  ;;  %v2316_v11 = vpop.f32.mrb[40].mxu0  ;;  %v2429_v12 = vpop.f32.mrb[40].mxu1  ;;  %4737 = vmatpush3.bf16.msra.mxu0 %v5289_v23  ;;  %4801 = vmatpush3.bf16.msra.mxu1 %v5291_v24  ;;  %v5297_v51 = vld [vmem:[%s7027_s3 + $0x18] sm:$0xff]  }
 0x23d   : > { %v2568_v0 = vadd.f32 %v2316_v11, %v6098_v32  ;;  %v2570_v1 = vadd.f32 %v2429_v12, %v6100_v33  ;;  %v2318_v13 = vpop.f32.mrb[41].mxu0  ;;  %v2431_v14 = vpop.f32.mrb[41].mxu1  ;;  %4738 = vmatprep.subr.bf16.mxu0 %v5292_v31  ;;  %4802 = vmatprep.subr.bf16.mxu1 %v5294_v36  ;;  %v5299_v52 = vld [vmem:[%s7027_s3 + $0x98] sm:$0xff]  }
 0x23e   : > { %v2569_v21 = vadd.f32 %v2318_v13, %v6102_v34  ;;  %v2571_v22 = vadd.f32 %v2431_v14, %v6104_v35  ;;  %v2320_v23 = vpop.f32.mrb[42].mxu0  ;;  %v2433_v24 = vpop.f32.mrb[42].mxu1  ;;  %3009 = vmatprep.mubr.bf16.mxu0 %v2685_v54  ;;  %3106 = vmatprep.mubr.bf16.mxu1 %v2687_v2 }
 0x23f   : > { %v2572_v29 = vadd.f32 %v2320_v23, %v6098_v32  ;;  %v2574_v30 = vadd.f32 %v2433_v24, %v6100_v33  ;;  %v2322_v49 = vpop.f32.mrb[43].mxu0  ;;  %v2435_v50 = vpop.f32.mrb[43].mxu1  ;;  %3010 = vmatmul.mubr.bf16.gmra.mrb[68].mxu0 %v2684_v60  ;;  %3107 = vmatmul.mubr.bf16.gmra.mrb[68].mxu1 %v2686_v61  ;;  %v2632_v55 = vmax.f32 %v2568_v0, 0.0  ;;  %v2634_v53 = vmax.f32 %v2570_v1, 0.0  ;;  %v5300_v60 = vld [vmem:[%s7027_s3 + $0x60] sm:$0xff]  }
 0x240   : > { %v2573_v31 = vadd.f32 %v2322_v49, %v6102_v34  ;;  %v2575_v36 = vadd.f32 %v2435_v50, %v6104_v35  ;;  %4739 = vmatpush3.bf16.msra.mxu0 %v5293_v62  ;;  %4803 = vmatpush3.bf16.msra.mxu1 %v5295_v63  ;;  %v5302_v61 = vld [vmem:[%s7027_s3 + $0xe0] sm:$0xff]   ;;  %v2633_v11 = vmax.f32 %v2569_v21, 0.0  ;;  %v2635_v12 = vmax.f32 %v2571_v22, 0.0  ;;  %v5304_v49 = vld [vmem:[%s7027_s3 + $0x68] sm:$0xff]  }
 0x241   : > { %v2636_v54 = vmax.f32 %v2572_v29, 0.0  ;;  %v2638_v2 = vmax.f32 %v2574_v30, 0.0  ;;  %4740 = vmatprep.subr.bf16.mxu0 %v5296_v15  ;;  %4804 = vmatprep.subr.bf16.mxu1 %v5298_v16  ;;  %v5301_v15 = vld [vmem:[%s7027_s3 + $0x20] sm:$0xff]   ;;  %v5306_v50 = vld [vmem:[%s7027_s3 + $0xe8] sm:$0xff]  }
 0x242   : > { %v2637_v62 = vmax.f32 %v2573_v31, 0.0  ;;  %v2639_v63 = vmax.f32 %v2575_v36, 0.0  ;;  %v5303_v16 = vld [vmem:[%s7027_s3 + $0xa0] sm:$0xff]  }
 0x243   : > { %v2688_v13 = vpack.c.bf16 %v2636_v54, %v2632_v55  ;;  %v2690_v14 = vpack.c.bf16 %v2638_v2, %v2634_v53 }
 0x244   : > { %v2689_v0 = vpack.c.bf16 %v2637_v62, %v2633_v11  ;;  %v2691_v1 = vpack.c.bf16 %v2639_v63, %v2635_v12  ;;  %v2326_v23 = vpop.f32.mrb[44].mxu0  ;;  %v2439_v24 = vpop.f32.mrb[44].mxu1  ;;  %4741 = vmatpush3.bf16.msra.mxu0 %v5297_v51  ;;  %4805 = vmatpush3.bf16.msra.mxu1 %v5299_v52  ;;  %v5305_v11 = vld [vmem:[%s7027_s3 + $0x28] sm:$0xff]  }
 0x245   : > { %v2576_v21 = vadd.f32 %v2326_v23, %v6098_v32  ;;  %v2578_v22 = vadd.f32 %v2439_v24, %v6100_v33  ;;  %v2328_v29 = vpop.f32.mrb[45].mxu0  ;;  %v2441_v30 = vpop.f32.mrb[45].mxu1  ;;  %4742 = vmatprep.subr.bf16.mxu0 %v5300_v60  ;;  %4806 = vmatprep.subr.bf16.mxu1 %v5302_v61  ;;  %v5307_v12 = vld [vmem:[%s7027_s3 + $0xa8] sm:$0xff]  }
 0x246   : > { %v2577_v31 = vadd.f32 %v2328_v29, %v6102_v34  ;;  %v2579_v36 = vadd.f32 %v2441_v30, %v6104_v35  ;;  %v2330_v51 = vpop.f32.mrb[46].mxu0  ;;  %v2443_v52 = vpop.f32.mrb[46].mxu1  ;;  %3017 = vmatprep.mubr.bf16.mxu0 %v2689_v0  ;;  %3114 = vmatprep.mubr.bf16.mxu1 %v2691_v1 }
 0x247   : > { %v2580_v55 = vadd.f32 %v2330_v51, %v6098_v32  ;;  %v2582_v53 = vadd.f32 %v2443_v52, %v6100_v33  ;;  %v2332_v54 = vpop.f32.mrb[47].mxu0  ;;  %v2445_v2 = vpop.f32.mrb[47].mxu1  ;;  %3018 = vmatmul.mubr.bf16.gmra.mrb[72].mxu0 %v2688_v13  ;;  %3115 = vmatmul.mubr.bf16.gmra.mrb[72].mxu1 %v2690_v14  ;;  %v2640_v62 = vmax.f32 %v2576_v21, 0.0  ;;  %v2642_v63 = vmax.f32 %v2578_v22, 0.0  ;;  %v5308_v13 = vld [vmem:[%s7027_s3 + $0x70] sm:$0xff]  }
 0x248   : > { %v2581_v60 = vadd.f32 %v2332_v54, %v6102_v34  ;;  %v2583_v61 = vadd.f32 %v2445_v2, %v6104_v35  ;;  %4743 = vmatpush3.bf16.msra.mxu0 %v5301_v15  ;;  %4807 = vmatpush3.bf16.msra.mxu1 %v5303_v16  ;;  %v5310_v14 = vld [vmem:[%s7027_s3 + $0xf0] sm:$0xff]   ;;  %v2641_v23 = vmax.f32 %v2577_v31, 0.0  ;;  %v2643_v24 = vmax.f32 %v2579_v36, 0.0  ;;  %v5312_v54 = vld [vmem:[%s7027_s3 + $0x78] sm:$0xff]  }
 0x249   : > { %v2644_v0 = vmax.f32 %v2580_v55, 0.0  ;;  %v2646_v1 = vmax.f32 %v2582_v53, 0.0  ;;  %4744 = vmatprep.subr.bf16.mxu0 %v5304_v49  ;;  %4808 = vmatprep.subr.bf16.mxu1 %v5306_v50  ;;  %v5309_v49 = vld [vmem:[%s7027_s3 + $0x30] sm:$0xff]   ;;  %v5314_v2 = vld [vmem:[%s7027_s3 + $0xf8] sm:$0xff]  }
 0x24a   : > { %v2645_v15 = vmax.f32 %v2581_v60, 0.0  ;;  %v2647_v16 = vmax.f32 %v2583_v61, 0.0  ;;  %v5311_v50 = vld [vmem:[%s7027_s3 + $0xb0] sm:$0xff]  }
 0x24b   : > { %v2692_v29 = vpack.c.bf16 %v2644_v0, %v2640_v62  ;;  %v2694_v30 = vpack.c.bf16 %v2646_v1, %v2642_v63 }
 0x24c   : > { %v2693_v21 = vpack.c.bf16 %v2645_v15, %v2641_v23  ;;  %v2695_v22 = vpack.c.bf16 %v2647_v16, %v2643_v24  ;;  %v2336_v51 = vpop.f32.mrb[48].mxu0  ;;  %v2449_v52 = vpop.f32.mrb[48].mxu1  ;;  %4745 = vmatpush3.bf16.msra.mxu0 %v5305_v11  ;;  %4809 = vmatpush3.bf16.msra.mxu1 %v5307_v12  ;;  %v5313_v23 = vld [vmem:[%s7027_s3 + $0x38] sm:$0xff]  }
 0x24d   : > { %v2584_v31 = vadd.f32 %v2336_v51, %v6098_v32  ;;  %v2586_v36 = vadd.f32 %v2449_v52, %v6100_v33  ;;  %v2338_v55 = vpop.f32.mrb[49].mxu0  ;;  %v2451_v53 = vpop.f32.mrb[49].mxu1  ;;  %4746 = vmatprep.subr.bf16.mxu0 %v5308_v13  ;;  %4810 = vmatprep.subr.bf16.mxu1 %v5310_v14  ;;  %v5315_v24 = vld [vmem:[%s7027_s3 + $0xb8] sm:$0xff]  }
 0x24e   : > { %v2585_v60 = vadd.f32 %v2338_v55, %v6102_v34  ;;  %v2587_v61 = vadd.f32 %v2451_v53, %v6104_v35  ;;  %v2340_v11 = vpop.f32.mrb[50].mxu0  ;;  %v2453_v12 = vpop.f32.mrb[50].mxu1  ;;  %3025 = vmatprep.mubr.bf16.mxu0 %v2693_v21  ;;  %3122 = vmatprep.mubr.bf16.mxu1 %v2695_v22 }
 0x24f   : > { %v2588_v62 = vadd.f32 %v2340_v11, %v6098_v32  ;;  %v2590_v63 = vadd.f32 %v2453_v12, %v6100_v33  ;;  %v2342_v0 = vpop.f32.mrb[51].mxu0  ;;  %v2455_v1 = vpop.f32.mrb[51].mxu1  ;;  %3026 = vmatmul.mubr.bf16.gmra.mrb[76].mxu0 %v2692_v29  ;;  %3123 = vmatmul.mubr.bf16.gmra.mrb[76].mxu1 %v2694_v30  ;;  %v2648_v15 = vmax.f32 %v2584_v31, 0.0  ;;  %v2650_v16 = vmax.f32 %v2586_v36, 0.0 }
 0x250   : > { %v2589_v13 = vadd.f32 %v2342_v0, %v6102_v34  ;;  %v2591_v14 = vadd.f32 %v2455_v1, %v6104_v35  ;;  %4747 = vmatpush3.bf16.msra.mxu0 %v5309_v49  ;;  %4811 = vmatpush3.bf16.msra.mxu1 %v5311_v50  ;;  %v2649_v29 = vmax.f32 %v2585_v60, 0.0  ;;  %v2651_v30 = vmax.f32 %v2587_v61, 0.0 }
 0x251   : > { %v2652_v21 = vmax.f32 %v2588_v62, 0.0  ;;  %v2654_v22 = vmax.f32 %v2590_v63, 0.0  ;;  %4748 = vmatprep.subr.bf16.mxu0 %v5312_v54  ;;  %4812 = vmatprep.subr.bf16.mxu1 %v5314_v2 }
 0x252   : > { %v2653_v51 = vmax.f32 %v2589_v13, 0.0  ;;  %v2655_v52 = vmax.f32 %v2591_v14, 0.0 }
 0x253   : > { %v2696_v49 = vpack.c.bf16 %v2652_v21, %v2648_v15  ;;  %v2698_v50 = vpack.c.bf16 %v2654_v22, %v2650_v16 }
 0x254   : > { %v2697_v55 = vpack.c.bf16 %v2653_v51, %v2649_v29  ;;  %v2699_v53 = vpack.c.bf16 %v2655_v52, %v2651_v30  ;;  %v2346_v11 = vpop.f32.mrb[52].mxu0  ;;  %v2459_v12 = vpop.f32.mrb[52].mxu1  ;;  %4749 = vmatpush3.bf16.msra.mxu0 %v5313_v23  ;;  %4813 = vmatpush3.bf16.msra.mxu1 %v5315_v24 }
 0x255   : > { %v2592_v0 = vadd.f32 %v2346_v11, %v6098_v32  ;;  %v2594_v31 = vadd.f32 %v2459_v12, %v6100_v33  ;;  %v2348_v36 = vpop.f32.mrb[53].mxu0  ;;  %v2461_v62 = vpop.f32.mrb[53].mxu1 }
 0x256   : > { %v2593_v54 = vadd.f32 %v2348_v36, %v6102_v34  ;;  %v2595_v2 = vadd.f32 %v2461_v62, %v6104_v35  ;;  %v2350_v60 = vpop.f32.mrb[54].mxu0  ;;  %v2463_v61 = vpop.f32.mrb[54].mxu1  ;;  %3033 = vmatprep.mubr.bf16.mxu0 %v2697_v55  ;;  %3130 = vmatprep.mubr.bf16.mxu1 %v2699_v53 }
 0x257   : > { %v2596_v63 = vadd.f32 %v2350_v60, %v6098_v32  ;;  %v2598_v1 = vadd.f32 %v2463_v61, %v6100_v33  ;;  %v2352_v13 = vpop.f32.mrb[55].mxu0  ;;  %v2465_v14 = vpop.f32.mrb[55].mxu1  ;;  %3034 = vmatmul.mubr.bf16.gmra.mrb[80].mxu0 %v2696_v49  ;;  %3131 = vmatmul.mubr.bf16.gmra.mrb[80].mxu1 %v2698_v50  ;;  %v2656_v15 = vmax.f32 %v2592_v0, 0.0  ;;  %v2658_v16 = vmax.f32 %v2594_v31, 0.0 }
 0x258   : > { %v2597_v23 = vadd.f32 %v2352_v13, %v6102_v34  ;;  %v2599_v24 = vadd.f32 %v2465_v14, %v6104_v35  ;;  %v2657_v29 = vmax.f32 %v2593_v54, 0.0  ;;  %v2659_v30 = vmax.f32 %v2595_v2, 0.0 }
 0x259   : > { %v2660_v21 = vmax.f32 %v2596_v63, 0.0  ;;  %v2662_v22 = vmax.f32 %v2598_v1, 0.0 }
 0x25a   : > { %v2661_v51 = vmax.f32 %v2597_v23, 0.0  ;;  %v2663_v52 = vmax.f32 %v2599_v24, 0.0 }
 0x25b   : > { %v2700_v55 = vpack.c.bf16 %v2660_v21, %v2656_v15  ;;  %v2702_v53 = vpack.c.bf16 %v2662_v22, %v2658_v16 }
 0x25c   : > { %v2701_v11 = vpack.c.bf16 %v2661_v51, %v2657_v29  ;;  %v2703_v12 = vpack.c.bf16 %v2663_v52, %v2659_v30  ;;  %v2356_v36 = vpop.f32.mrb[56].mxu0  ;;  %v2469_v62 = vpop.f32.mrb[56].mxu1 }
 0x25d   : > { %v2600_v49 = vadd.f32 %v2356_v36, %v6098_v32  ;;  %v2602_v50 = vadd.f32 %v2469_v62, %v6100_v33  ;;  %v2358_v60 = vpop.f32.mrb[57].mxu0  ;;  %v2471_v61 = vpop.f32.mrb[57].mxu1 }
 0x25e   : > { %v2601_v0 = vadd.f32 %v2358_v60, %v6102_v34  ;;  %v2603_v31 = vadd.f32 %v2471_v61, %v6104_v35  ;;  %v2360_v54 = vpop.f32.mrb[58].mxu0  ;;  %v2473_v2 = vpop.f32.mrb[58].mxu1  ;;  %3041 = vmatprep.mubr.bf16.mxu0 %v2701_v11  ;;  %3138 = vmatprep.mubr.bf16.mxu1 %v2703_v12 }
 0x25f   : > { %v2604_v63 = vadd.f32 %v2360_v54, %v6098_v32  ;;  %v2606_v1 = vadd.f32 %v2473_v2, %v6100_v33  ;;  %v2362_v13 = vpop.f32.mrb[59].mxu0  ;;  %v2475_v14 = vpop.f32.mrb[59].mxu1  ;;  %3042 = vmatmul.mubr.bf16.gmra.mrb[84].mxu0 %v2700_v55  ;;  %3139 = vmatmul.mubr.bf16.gmra.mrb[84].mxu1 %v2702_v53  ;;  %v2664_v15 = vmax.f32 %v2600_v49, 0.0  ;;  %v2666_v16 = vmax.f32 %v2602_v50, 0.0 }
 0x260   : > { %v2605_v23 = vadd.f32 %v2362_v13, %v6102_v34  ;;  %v2607_v24 = vadd.f32 %v2475_v14, %v6104_v35  ;;  %v2665_v29 = vmax.f32 %v2601_v0, 0.0  ;;  %v2667_v30 = vmax.f32 %v2603_v31, 0.0 }
 0x261   : > { %v2668_v21 = vmax.f32 %v2604_v63, 0.0  ;;  %v2670_v22 = vmax.f32 %v2606_v1, 0.0 }
 0x262   : > { %v2669_v51 = vmax.f32 %v2605_v23, 0.0  ;;  %v2671_v52 = vmax.f32 %v2607_v24, 0.0 }
 0x263   : > { %v2704_v11 = vpack.c.bf16 %v2668_v21, %v2664_v15  ;;  %v2706_v12 = vpack.c.bf16 %v2670_v22, %v2666_v16 }
 0x264   : > { %v2705_v36 = vpack.c.bf16 %v2669_v51, %v2665_v29  ;;  %v2707_v62 = vpack.c.bf16 %v2671_v52, %v2667_v30  ;;  %v2366_v60 = vpop.f32.mrb[60].mxu0  ;;  %v2479_v61 = vpop.f32.mrb[60].mxu1 }
 0x265   : > { %v2608_v55 = vadd.f32 %v2366_v60, %v6098_v32  ;;  %v2610_v53 = vadd.f32 %v2479_v61, %v6100_v33  ;;  %v2368_v54 = vpop.f32.mrb[61].mxu0  ;;  %v2481_v2 = vpop.f32.mrb[61].mxu1 }
 0x266   : > { %v2609_v49 = vadd.f32 %v2368_v54, %v6102_v34  ;;  %v2611_v50 = vadd.f32 %v2481_v2, %v6104_v35  ;;  %v2370_v0 = vpop.f32.mrb[62].mxu0  ;;  %v2483_v31 = vpop.f32.mrb[62].mxu1  ;;  %3049 = vmatprep.mubr.bf16.mxu0 %v2705_v36  ;;  %3146 = vmatprep.mubr.bf16.mxu1 %v2707_v62 }
 0x267   : > { %v2612_v63 = vadd.f32 %v2370_v0, %v6098_v32  ;;  %v2614_v1 = vadd.f32 %v2483_v31, %v6100_v33  ;;  %v2372_v13 = vpop.f32.mrb[63].mxu0  ;;  %v2485_v14 = vpop.f32.mrb[63].mxu1  ;;  %3050 = vmatmul.mubr.bf16.gmra.mrb[88].mxu0 %v2704_v11  ;;  %3147 = vmatmul.mubr.bf16.gmra.mrb[88].mxu1 %v2706_v12  ;;  %v2672_v15 = vmax.f32 %v2608_v55, 0.0  ;;  %v2674_v16 = vmax.f32 %v2610_v53, 0.0 }
 0x268   : > { %v2613_v23 = vadd.f32 %v2372_v13, %v6102_v34  ;;  %v2615_v24 = vadd.f32 %v2485_v14, %v6104_v35  ;;  %v2673_v29 = vmax.f32 %v2609_v49, 0.0  ;;  %v2675_v30 = vmax.f32 %v2611_v50, 0.0 }
 0x269   : > { %v2676_v21 = vmax.f32 %v2612_v63, 0.0  ;;  %v2678_v22 = vmax.f32 %v2614_v1, 0.0 }
 0x26a   : > { %v2677_v51 = vmax.f32 %v2613_v23, 0.0  ;;  %v2679_v52 = vmax.f32 %v2615_v24, 0.0 }
 0x26b   : > { %v2708_v36 = vpack.c.bf16 %v2676_v21, %v2672_v15  ;;  %v2710_v32 = vpack.c.bf16 %v2678_v22, %v2674_v16 }
 0x26c   : > { %v2709_v62 = vpack.c.bf16 %v2677_v51, %v2673_v29  ;;  %v2711_v33 = vpack.c.bf16 %v2679_v52, %v2675_v30 }
 0x26e   : > { %3057 = vmatprep.mubr.bf16.mxu0 %v2709_v62  ;;  %3154 = vmatprep.mubr.bf16.mxu1 %v2711_v33 }
 0x26f   : > { %3058 = vmatmul.mubr.bf16.gmra.mrb[92].mxu0 %v2708_v36  ;;  %3155 = vmatmul.mubr.bf16.gmra.mrb[92].mxu1 %v2710_v32 }
 0x270   : > { %3387 = vmatprep.mubr.bf16.mxu0 %v6143_v6  ;;  %3484 = vmatprep.mubr.bf16.mxu1 %v6145_v7 }
 0x277   : > { %3388 = vmatmul.mubr.bf16.vlgmr.msra.gmra.mrb[96].mxu0 %v6139_v4  ;;  %3485 = vmatmul.mubr.bf16.vlgmr.msra.gmra.mrb[96].mxu1 %v6141_v5 }
 0x278   : > { %3395 = vmatprep.mubr.bf16.mxu0 %v6164_v39  ;;  %3492 = vmatprep.mubr.bf16.mxu1 %v6166_v40 }
 0x27f   : > { %3396 = vmatmul.mubr.bf16.gmra.mrb[100].mxu0 %v6160_v37  ;;  %3493 = vmatmul.mubr.bf16.gmra.mrb[100].mxu1 %v6162_v38 }
 0x280   : > { %3403 = vmatprep.mubr.bf16.mxu0 %v6185_v9  ;;  %3500 = vmatprep.mubr.bf16.mxu1 %v6187_v10 }
 0x287   : > { %3404 = vmatmul.mubr.bf16.gmra.mrb[104].mxu0 %v6181_v3  ;;  %3501 = vmatmul.mubr.bf16.gmra.mrb[104].mxu1 %v6183_v8 }
 0x288   : > { %3411 = vmatprep.mubr.bf16.mxu0 %v6206_v46  ;;  %3508 = vmatprep.mubr.bf16.mxu1 %v6208_v47 }
 0x28f   : > { %3412 = vmatmul.mubr.bf16.gmra.mrb[108].mxu0 %v6202_v44  ;;  %3509 = vmatmul.mubr.bf16.gmra.mrb[108].mxu1 %v6204_v45 }
 0x290   : > { %3419 = vmatprep.mubr.bf16.mxu0 %v6225_v19  ;;  %3516 = vmatprep.mubr.bf16.mxu1 %v6227_v20 }
 0x297   : > { %3420 = vmatmul.mubr.bf16.gmra.mrb[112].mxu0 %v6221_v17  ;;  %3517 = vmatmul.mubr.bf16.gmra.mrb[112].mxu1 %v6223_v18 }
 0x298   : > { %3427 = vmatprep.mubr.bf16.mxu0 %v6241_v58  ;;  %3524 = vmatprep.mubr.bf16.mxu1 %v6243_v59 }
 0x29f   : > { %3428 = vmatmul.mubr.bf16.gmra.mrb[116].mxu0 %v6237_v56  ;;  %3525 = vmatmul.mubr.bf16.gmra.mrb[116].mxu1 %v6239_v57 }
 0x2a0   : > { %3435 = vmatprep.mubr.bf16.mxu0 %v6257_v43  ;;  %3532 = vmatprep.mubr.bf16.mxu1 %v6259_v48 }
 0x2a7   : > { %3436 = vmatmul.mubr.bf16.gmra.mrb[120].mxu0 %v6253_v41  ;;  %3533 = vmatmul.mubr.bf16.gmra.mrb[120].mxu1 %v6255_v42 }
 0x2a8   : > { %3443 = vmatprep.mubr.bf16.mxu0 %v6273_v27  ;;  %3540 = vmatprep.mubr.bf16.mxu1 %v6275_v28 }
 0x2af   : > { %3444 = vmatmul.mubr.bf16.gmra.mrb[124].mxu0 %v6269_v25  ;;  %3541 = vmatmul.mubr.bf16.gmra.mrb[124].mxu1 %v6271_v26 }
 0x30a   : > { %v4622_v34 = vpop.f32.mrb[64].mxu0  ;;  %v4686_v35 = vpop.f32.mrb[64].mxu1 }
 0x30b   : > { %v4623_v4 = vpop.f32.mrb[65].mxu0  ;;  %v4687_v5 = vpop.f32.mrb[65].mxu1 }
 0x30c   : > { %v4624_v6 = vadd.f32 %v4623_v4, %v4622_v34  ;;  %v4688_v7 = vadd.f32 %v4687_v5, %v4686_v35  ;;  %v4625_v37 = vpop.f32.mrb[66].mxu0  ;;  %v4689_v38 = vpop.f32.mrb[66].mxu1 }
 0x30d   : > { %v4626_v39 = vpop.f32.mrb[67].mxu0  ;;  %v4690_v40 = vpop.f32.mrb[67].mxu1 }
 0x30e   : > { %v6481_v3 = vadd.f32 %v4688_v7, %v4624_v6  ;;  %v4627_v8 = vadd.f32 %v4626_v39, %v4625_v37  ;;  %v4691_v9 = vadd.f32 %v4690_v40, %v4689_v38 }
 0x310   : > { %v6483_v10 = vadd.f32 %v4691_v9, %v4627_v8 }
 0x312   : > { %v4628_v44 = vpop.f32.mrb[68].mxu0  ;;  %v4692_v45 = vpop.f32.mrb[68].mxu1 }
 0x313   : > { %v4629_v46 = vpop.f32.mrb[69].mxu0  ;;  %v4693_v47 = vpop.f32.mrb[69].mxu1 }
 0x314   : > { %v4630_v17 = vadd.f32 %v4629_v46, %v4628_v44  ;;  %v4694_v18 = vadd.f32 %v4693_v47, %v4692_v45  ;;  %v4631_v19 = vpop.f32.mrb[70].mxu0  ;;  %v4695_v20 = vpop.f32.mrb[70].mxu1 }
 0x315   : > { %v4632_v56 = vpop.f32.mrb[71].mxu0  ;;  %v4696_v57 = vpop.f32.mrb[71].mxu1 }
 0x316   : > { %v6485_v58 = vadd.f32 %v4694_v18, %v4630_v17  ;;  %v4633_v59 = vadd.f32 %v4632_v56, %v4631_v19  ;;  %v4697_v41 = vadd.f32 %v4696_v57, %v4695_v20 }
 0x318   : > { %v6487_v42 = vadd.f32 %v4697_v41, %v4633_v59 }
 0x31a   : > { %v4634_v43 = vpop.f32.mrb[72].mxu0  ;;  %v4698_v48 = vpop.f32.mrb[72].mxu1 }
 0x31b   : > { %v4635_v25 = vpop.f32.mrb[73].mxu0  ;;  %v4699_v26 = vpop.f32.mrb[73].mxu1 }
 0x31c   : > { %v4636_v27 = vadd.f32 %v4635_v25, %v4634_v43  ;;  %v4700_v28 = vadd.f32 %v4699_v26, %v4698_v48  ;;  %v4637_v11 = vpop.f32.mrb[74].mxu0  ;;  %v4701_v12 = vpop.f32.mrb[74].mxu1 }
 0x31d   : > { %v4638_v60 = vpop.f32.mrb[75].mxu0  ;;  %v4702_v61 = vpop.f32.mrb[75].mxu1 }
 0x31e   : > { %v6489_v55 = vadd.f32 %v4700_v28, %v4636_v27  ;;  %v4639_v53 = vadd.f32 %v4638_v60, %v4637_v11  ;;  %v4703_v54 = vadd.f32 %v4702_v61, %v4701_v12 }
 0x320   : > { %v6491_v2 = vadd.f32 %v4703_v54, %v4639_v53 }
 0x322   : > { %v4640_v49 = vpop.f32.mrb[76].mxu0  ;;  %v4704_v50 = vpop.f32.mrb[76].mxu1 }
 0x323   : > { %v4641_v0 = vpop.f32.mrb[77].mxu0  ;;  %v4705_v31 = vpop.f32.mrb[77].mxu1 }
 0x324   : > { %v4642_v63 = vadd.f32 %v4641_v0, %v4640_v49  ;;  %v4706_v1 = vadd.f32 %v4705_v31, %v4704_v50  ;;  %v4643_v13 = vpop.f32.mrb[78].mxu0  ;;  %v4707_v14 = vpop.f32.mrb[78].mxu1 }
 0x325   : > { %v4644_v23 = vpop.f32.mrb[79].mxu0  ;;  %v4708_v24 = vpop.f32.mrb[79].mxu1 }
 0x326   : > { %v6493_v15 = vadd.f32 %v4706_v1, %v4642_v63  ;;  %v4645_v16 = vadd.f32 %v4644_v23, %v4643_v13  ;;  %v4709_v21 = vadd.f32 %v4708_v24, %v4707_v14 }
 0x328   : > { %v6495_v22 = vadd.f32 %v4709_v21, %v4645_v16 }
 0x32a   : > { %v4646_v29 = vpop.f32.mrb[80].mxu0  ;;  %v4710_v30 = vpop.f32.mrb[80].mxu1 }
 0x32b   : > { %v4647_v51 = vpop.f32.mrb[81].mxu0  ;;  %v4711_v52 = vpop.f32.mrb[81].mxu1 }
 0x32c   : > { %v4648_v36 = vadd.f32 %v4647_v51, %v4646_v29  ;;  %v4712_v32 = vadd.f32 %v4711_v52, %v4710_v30  ;;  %v4649_v62 = vpop.f32.mrb[82].mxu0  ;;  %v4713_v33 = vpop.f32.mrb[82].mxu1 }
 0x32d   : > { %v4650_v34 = vpop.f32.mrb[83].mxu0  ;;  %v4714_v35 = vpop.f32.mrb[83].mxu1 }
 0x32e   : > { %v6497_v4 = vadd.f32 %v4712_v32, %v4648_v36  ;;  %v4651_v5 = vadd.f32 %v4650_v34, %v4649_v62  ;;  %v4715_v6 = vadd.f32 %v4714_v35, %v4713_v33 }
 0x330   : > { %v6499_v7 = vadd.f32 %v4715_v6, %v4651_v5 }
 0x332   : > { %v4652_v37 = vpop.f32.mrb[84].mxu0  ;;  %v4716_v38 = vpop.f32.mrb[84].mxu1 }
 0x333   : > { %v4653_v39 = vpop.f32.mrb[85].mxu0  ;;  %v4717_v40 = vpop.f32.mrb[85].mxu1 }
 0x334   : > { %v4654_v8 = vadd.f32 %v4653_v39, %v4652_v37  ;;  %v4718_v9 = vadd.f32 %v4717_v40, %v4716_v38  ;;  %v4655_v44 = vpop.f32.mrb[86].mxu0  ;;  %v4719_v45 = vpop.f32.mrb[86].mxu1  ;;  %v6519_v38 = vld [vmem:[%s7028_s4] ss:$0 sm:$0xff] }
 0x335   : > { %v4656_v46 = vpop.f32.mrb[87].mxu0  ;;  %v4720_v47 = vpop.f32.mrb[87].mxu1 }
 0x336   : > { %v6501_v17 = vadd.f32 %v4718_v9, %v4654_v8  ;;  %v4657_v18 = vadd.f32 %v4656_v46, %v4655_v44  ;;  %v4721_v19 = vadd.f32 %v4720_v47, %v4719_v45 }
 0x338   : > { %v6503_v20 = vadd.f32 %v4721_v19, %v4657_v18 }
 0x33a   : > { %v4658_v56 = vpop.f32.mrb[88].mxu0  ;;  %v4722_v57 = vpop.f32.mrb[88].mxu1 }
 0x33b   : > { %v4659_v59 = vpop.f32.mrb[89].mxu0  ;;  %v4723_v41 = vpop.f32.mrb[89].mxu1 }
 0x33c   : > { %v4660_v43 = vadd.f32 %v4659_v59, %v4658_v56  ;;  %v4724_v48 = vadd.f32 %v4723_v41, %v4722_v57  ;;  %v4661_v25 = vpop.f32.mrb[90].mxu0  ;;  %v4725_v26 = vpop.f32.mrb[90].mxu1 }
 0x33d   : > { %v4662_v27 = vpop.f32.mrb[91].mxu0  ;;  %v4726_v28 = vpop.f32.mrb[91].mxu1 }
 0x33e   : > { %v6505_v11 = vadd.f32 %v4724_v48, %v4660_v43  ;;  %v4663_v12 = vadd.f32 %v4662_v27, %v4661_v25  ;;  %v4727_v60 = vadd.f32 %v4726_v28, %v4725_v26 }
 0x340   : > { %v6507_v61 = vadd.f32 %v4727_v60, %v4663_v12 }
 0x342   : > { %v4664_v53 = vpop.f32.mrb[92].mxu0  ;;  %v4728_v54 = vpop.f32.mrb[92].mxu1 }
 0x343   : > { %v4665_v49 = vpop.f32.mrb[93].mxu0  ;;  %v4729_v50 = vpop.f32.mrb[93].mxu1 }
 0x344   : > { %v4666_v0 = vadd.f32 %v4665_v49, %v4664_v53  ;;  %v4730_v31 = vadd.f32 %v4729_v50, %v4728_v54  ;;  %v4667_v63 = vpop.f32.mrb[94].mxu0  ;;  %v4731_v1 = vpop.f32.mrb[94].mxu1 }
 0x345   : > { %v4668_v13 = vpop.f32.mrb[95].mxu0  ;;  %v4732_v14 = vpop.f32.mrb[95].mxu1 }
 0x346   : > { %v6510_v23 = vadd.f32 %v4730_v31, %v4666_v0  ;;  %v4669_v24 = vadd.f32 %v4668_v13, %v4667_v63  ;;  %v4733_v16 = vadd.f32 %v4732_v14, %v4731_v1 }
 0x348   : > { %v6512_v21 = vadd.f32 %v4733_v16, %v4669_v24 }
 0x34a   : > { %v4750_v29 = vpop.f32.mrb[96].mxu0  ;;  %v4814_v30 = vpop.f32.mrb[96].mxu1 }
 0x34b   : > { %v4751_v51 = vpop.f32.mrb[97].mxu0  ;;  %v4815_v52 = vpop.f32.mrb[97].mxu1 }
 0x34c   : > { %v4752_v36 = vadd.f32 %v4751_v51, %v4750_v29  ;;  %v4816_v32 = vadd.f32 %v4815_v52, %v4814_v30  ;;  %v4753_v62 = vpop.f32.mrb[98].mxu0  ;;  %v4817_v33 = vpop.f32.mrb[98].mxu1 }
 0x34d   : > { %v4754_v34 = vpop.f32.mrb[99].mxu0  ;;  %v4818_v35 = vpop.f32.mrb[99].mxu1 }
 0x34e   : > { %v3390_v5 = vadd.f32 %v4752_v36, %v6481_v3  ;;  %v4755_v6 = vadd.f32 %v4754_v34, %v4753_v62  ;;  %v4819_v37 = vadd.f32 %v4818_v35, %v4817_v33 }
 0x350   : > { %v3487_v39 = vadd.f32 %v4816_v32, %v3390_v5  ;;  %v3393_v40 = vadd.f32 %v4755_v6, %v6483_v10 }
 0x352   : > { %v6528_v3 = vadd.f32 %v6519_v38, %v3487_v39  ;;  %v3490_v8 = vadd.f32 %v4819_v37, %v3393_v40  ;;  %v4756_v9 = vpop.f32.mrb[100].mxu0  ;;  %v4820_v44 = vpop.f32.mrb[100].mxu1 }
 0x353   : > { %v4757_v45 = vpop.f32.mrb[101].mxu0  ;;  %v4821_v46 = vpop.f32.mrb[101].mxu1 }
 0x354   : > { %v6531_v47 = vadd.f32 %v6519_v38, %v3490_v8  ;;  %v4758_v10 = vadd.f32 %v4757_v45, %v4756_v9  ;;  %v4822_v18 = vadd.f32 %v4821_v46, %v4820_v44  ;;  %v4759_v19 = vpop.f32.mrb[102].mxu0  ;;  %v4823_v56 = vpop.f32.mrb[102].mxu1  ;;  %3588 = vrot.lane.b32.xlu0 %v6528_v3, %s5453_s6  ;;  %3909 = vst.msk [vmem:[%s6525_s30] sm:$0xff] %vm3908_vm1, %v6528_v3 }
 0x355   : > { %v4760_v57 = vpop.f32.mrb[103].mxu0  ;;  %v4824_v59 = vpop.f32.mrb[103].mxu1 }
 0x356   : > { %v3398_v41 = vadd.f32 %v4758_v10, %v6485_v58  ;;  %v4761_v43 = vadd.f32 %v4760_v57, %v4759_v19  ;;  %v4825_v48 = vadd.f32 %v4824_v59, %v4823_v56  ;;  %3910 = vst.msk [vmem:[%s6525_s30 + $0x8] sm:$0xff] %vm3908_vm1, %v6531_v47 }
 0x358   : > { %v3495_v25 = vadd.f32 %v4822_v18, %v3398_v41  ;;  %v3401_v26 = vadd.f32 %v4761_v43, %v6487_v42  ;;  %3590 = vrot.lane.b32.xlu0 %v6531_v47, %s5453_s6 }
 0x35a   : > { %v6546_v27 = vadd.f32 %v6519_v38, %v3495_v25  ;;  %v3498_v28 = vadd.f32 %v4825_v48, %v3401_v26  ;;  %v4762_v12 = vpop.f32.mrb[104].mxu0  ;;  %v4826_v60 = vpop.f32.mrb[104].mxu1 }
 0x35b   : > { %v4763_v58 = vpop.f32.mrb[105].mxu0  ;;  %v4827_v53 = vpop.f32.mrb[105].mxu1 }
 0x35c   : > { %v6549_v54 = vadd.f32 %v6519_v38, %v3498_v28  ;;  %v4764_v49 = vadd.f32 %v4763_v58, %v4762_v12  ;;  %v4828_v50 = vadd.f32 %v4827_v53, %v4826_v60  ;;  %v4765_v0 = vpop.f32.mrb[106].mxu0  ;;  %v4829_v31 = vpop.f32.mrb[106].mxu1  ;;  %3592 = vrot.lane.b32.xlu1 %v6546_v27, %s5453_s6  ;;  %3911 = vst.msk [vmem:[%s6525_s30 + $0x10] sm:$0xff] %vm3908_vm1, %v6546_v27 }
 0x35d   : > { %v4766_v42 = vpop.f32.mrb[107].mxu0  ;;  %v4830_v63 = vpop.f32.mrb[107].mxu1 }
 0x35e   : > { %v3406_v1 = vadd.f32 %v4764_v49, %v6489_v55  ;;  %v4767_v13 = vadd.f32 %v4766_v42, %v4765_v0  ;;  %v4831_v14 = vadd.f32 %v4830_v63, %v4829_v31  ;;  %3912 = vst.msk [vmem:[%s6525_s30 + $0x18] sm:$0xff] %vm3908_vm1, %v6549_v54 }
 0x360   : > { %v3503_v24 = vadd.f32 %v4828_v50, %v3406_v1  ;;  %v3409_v16 = vadd.f32 %v4767_v13, %v6491_v2  ;;  %3594 = vrot.lane.b32.xlu1 %v6549_v54, %s5453_s6 }
 0x362   : > { %v6564_v29 = vadd.f32 %v6519_v38, %v3503_v24  ;;  %v3506_v30 = vadd.f32 %v4831_v14, %v3409_v16  ;;  %v4768_v51 = vpop.f32.mrb[108].mxu0  ;;  %v4832_v52 = vpop.f32.mrb[108].mxu1 }
 0x363   : > { %v4769_v55 = vpop.f32.mrb[109].mxu0  ;;  %v4833_v36 = vpop.f32.mrb[109].mxu1 }
 0x364   : > { %v6567_v32 = vadd.f32 %v6519_v38, %v3506_v30  ;;  %v4770_v62 = vadd.f32 %v4769_v55, %v4768_v51  ;;  %v4834_v33 = vadd.f32 %v4833_v36, %v4832_v52  ;;  %v4771_v34 = vpop.f32.mrb[110].mxu0  ;;  %v4835_v35 = vpop.f32.mrb[110].mxu1  ;;  %3596 = vrot.lane.b32.xlu0 %v6564_v29, %s5453_s6  ;;  %3913 = vst.msk [vmem:[%s6525_s30 + $0x20] sm:$0xff] %vm3908_vm1, %v6564_v29 }
 0x365   : > { %v4772_v2 = vpop.f32.mrb[111].mxu0  ;;  %v4836_v5 = vpop.f32.mrb[111].mxu1 }
 0x366   : > { %v3414_v6 = vadd.f32 %v4770_v62, %v6493_v15  ;;  %v4773_v37 = vadd.f32 %v4772_v2, %v4771_v34  ;;  %v4837_v39 = vadd.f32 %v4836_v5, %v4835_v35  ;;  %3598 = vrot.lane.b32.xlu1 %v6567_v32, %s5453_s6  ;;  %3914 = vst.msk [vmem:[%s6525_s30 + $0x28] sm:$0xff] %vm3908_vm1, %v6567_v32 }
 0x368   : > { %v3511_v40 = vadd.f32 %v4834_v33, %v3414_v6  ;;  %v3417_v8 = vadd.f32 %v4773_v37, %v6495_v22 }
 0x36a   : > { %v6582_v9 = vadd.f32 %v6519_v38, %v3511_v40  ;;  %v3514_v44 = vadd.f32 %v4837_v39, %v3417_v8  ;;  %v4774_v45 = vpop.f32.mrb[112].mxu0  ;;  %v4838_v46 = vpop.f32.mrb[112].mxu1 }
 0x36b   : > { %v4775_v15 = vpop.f32.mrb[113].mxu0  ;;  %v4839_v10 = vpop.f32.mrb[113].mxu1 }
 0x36c   : > { %v6585_v18 = vadd.f32 %v6519_v38, %v3514_v44  ;;  %v4776_v19 = vadd.f32 %v4775_v15, %v4774_v45  ;;  %v4840_v56 = vadd.f32 %v4839_v10, %v4838_v46  ;;  %v4777_v57 = vpop.f32.mrb[114].mxu0  ;;  %v4841_v59 = vpop.f32.mrb[114].mxu1  ;;  %3600 = vrot.lane.b32.xlu0 %v6582_v9, %s5453_s6  ;;  %3915 = vst.msk [vmem:[%s6525_s30 + $0x30] sm:$0xff] %vm3908_vm1, %v6582_v9 }
 0x36d   : > { %v4778_v22 = vpop.f32.mrb[115].mxu0  ;;  %v4842_v41 = vpop.f32.mrb[115].mxu1 }
 0x36e   : > { %v3422_v43 = vadd.f32 %v4776_v19, %v6497_v4  ;;  %v4779_v48 = vadd.f32 %v4778_v22, %v4777_v57  ;;  %v4843_v25 = vadd.f32 %v4842_v41, %v4841_v59  ;;  %3602 = vrot.lane.b32.xlu1 %v6585_v18, %s5453_s6  ;;  %3916 = vst.msk [vmem:[%s6525_s30 + $0x38] sm:$0xff] %vm3908_vm1, %v6585_v18 }
 0x370   : > { %v3519_v26 = vadd.f32 %v4840_v56, %v3422_v43  ;;  %v3425_v28 = vadd.f32 %v4779_v48, %v6499_v7 }
 0x372   : > { %v6600_v12 = vadd.f32 %v6519_v38, %v3519_v26  ;;  %v3522_v60 = vadd.f32 %v4843_v25, %v3425_v28  ;;  %v4780_v58 = vpop.f32.mrb[116].mxu0  ;;  %v4844_v53 = vpop.f32.mrb[116].mxu1 }
 0x373   : > { %v4781_v4 = vpop.f32.mrb[117].mxu0  ;;  %v4845_v49 = vpop.f32.mrb[117].mxu1 }
 0x374   : > { %v6603_v50 = vadd.f32 %v6519_v38, %v3522_v60  ;;  %v4782_v0 = vadd.f32 %v4781_v4, %v4780_v58  ;;  %v4846_v31 = vadd.f32 %v4845_v49, %v4844_v53  ;;  %v4783_v42 = vpop.f32.mrb[118].mxu0  ;;  %v4847_v63 = vpop.f32.mrb[118].mxu1  ;;  %3604 = vrot.lane.b32.xlu0 %v6600_v12, %s5453_s6  ;;  %3917 = vst.msk [vmem:[%s6525_s30 + $0x40] sm:$0xff] %vm3908_vm1, %v6600_v12 }
 0x375   : > { %v4784_v7 = vpop.f32.mrb[119].mxu0  ;;  %v4848_v1 = vpop.f32.mrb[119].mxu1 }
 0x376   : > { %v3430_v13 = vadd.f32 %v4782_v0, %v6501_v17  ;;  %v4785_v14 = vadd.f32 %v4784_v7, %v4783_v42  ;;  %v4849_v24 = vadd.f32 %v4848_v1, %v4847_v63  ;;  %3606 = vrot.lane.b32.xlu1 %v6603_v50, %s5453_s6  ;;  %3918 = vst.msk [vmem:[%s6525_s30 + $0x48] sm:$0xff] %vm3908_vm1, %v6603_v50 }
 0x378   : > { %v3527_v16 = vadd.f32 %v4846_v31, %v3430_v13  ;;  %v3433_v30 = vadd.f32 %v4785_v14, %v6503_v20 }
 0x37a   : > { %v6618_v51 = vadd.f32 %v6519_v38, %v3527_v16  ;;  %v3530_v52 = vadd.f32 %v4849_v24, %v3433_v30  ;;  %v4786_v55 = vpop.f32.mrb[120].mxu0  ;;  %v4850_v36 = vpop.f32.mrb[120].mxu1 }
 0x37b   : > { %v4787_v17 = vpop.f32.mrb[121].mxu0  ;;  %v4851_v62 = vpop.f32.mrb[121].mxu1 }
 0x37c   : > { %v6621_v33 = vadd.f32 %v6519_v38, %v3530_v52  ;;  %v4788_v34 = vadd.f32 %v4787_v17, %v4786_v55  ;;  %v4852_v35 = vadd.f32 %v4851_v62, %v4850_v36  ;;  %v4789_v2 = vpop.f32.mrb[122].mxu0  ;;  %v4853_v5 = vpop.f32.mrb[122].mxu1  ;;  %3608 = vrot.lane.b32.xlu0 %v6618_v51, %s5453_s6  ;;  %3919 = vst.msk [vmem:[%s6525_s30 + $0x50] sm:$0xff] %vm3908_vm1, %v6618_v51 }
 0x37d   : > { %v4790_v20 = vpop.f32.mrb[123].mxu0  ;;  %v4854_v6 = vpop.f32.mrb[123].mxu1 }
 0x37e   : > { %v3438_v37 = vadd.f32 %v4788_v34, %v6505_v11  ;;  %v4791_v39 = vadd.f32 %v4790_v20, %v4789_v2  ;;  %v4855_v40 = vadd.f32 %v4854_v6, %v4853_v5  ;;  %3610 = vrot.lane.b32.xlu1 %v6621_v33, %s5453_s6  ;;  %3920 = vst.msk [vmem:[%s6525_s30 + $0x58] sm:$0xff] %vm3908_vm1, %v6621_v33 }
 0x380   : > { %v3535_v8 = vadd.f32 %v4852_v35, %v3438_v37  ;;  %v3441_v44 = vadd.f32 %v4791_v39, %v6507_v61 }
 0x382   : > { %v6636_v45 = vadd.f32 %v6519_v38, %v3535_v8  ;;  %v3538_v46 = vadd.f32 %v4855_v40, %v3441_v44  ;;  %v4792_v15 = vpop.f32.mrb[124].mxu0  ;;  %v4856_v10 = vpop.f32.mrb[124].mxu1 }
 0x383   : > { %v4793_v11 = vpop.f32.mrb[125].mxu0  ;;  %v4857_v19 = vpop.f32.mrb[125].mxu1 }
 0x384   : > { %v6639_v56 = vadd.f32 %v6519_v38, %v3538_v46  ;;  %v4794_v57 = vadd.f32 %v4793_v11, %v4792_v15  ;;  %v4858_v59 = vadd.f32 %v4857_v19, %v4856_v10  ;;  %v4859_v22 = vpop.f32.mrb[126].mxu1  ;;  %3612 = vrot.lane.b32.xlu0 %v6636_v45, %s5453_s6  ;;  %v4795_v61 = vpop.f32.mrb[126].mxu0  ;;  %3921 = vst.msk [vmem:[%s6525_s30 + $0x60] sm:$0xff] %vm3908_vm1, %v6636_v45 }
 0x385   : > { %v4796_v41 = vpop.f32.mrb[127].mxu0  ;;  %v4860_v43 = vpop.f32.mrb[127].mxu1 }
 0x386   : > { %v3446_v48 = vadd.f32 %v4794_v57, %v6510_v23  ;;  %v4797_v25 = vadd.f32 %v4796_v41, %v4795_v61  ;;  %v4861_v26 = vadd.f32 %v4860_v43, %v4859_v22  ;;  %3614 = vrot.lane.b32.xlu1 %v6639_v56, %s5453_s6  ;;  %3922 = vst.msk [vmem:[%s6525_s30 + $0x68] sm:$0xff] %vm3908_vm1, %v6639_v56 }
 0x388   : > { %v3543_v28 = vadd.f32 %v4858_v59, %v3446_v48  ;;  %v3449_v60 = vadd.f32 %v4797_v25, %v6512_v21 }
 0x38a   : > { %v6654_v58 = vadd.f32 %v6519_v38, %v3543_v28  ;;  %v3546_v53 = vadd.f32 %v4861_v26, %v3449_v60 }
 0x38c   : > { %v6657_v4 = vadd.f32 %v6519_v38, %v3546_v53  ;;  %3616 = vrot.lane.b32.xlu0 %v6654_v58, %s5453_s6  ;;  %3923 = vst.msk [vmem:[%s6525_s30 + $0x70] sm:$0xff] %vm3908_vm1, %v6654_v58 }
 0x38e   : > { %3618 = vrot.lane.b32.xlu1 %v6657_v4, %s5453_s6  ;;  %3924 = vst.msk [vmem:[%s6525_s30 + $0x78] sm:$0xff] %vm3908_vm1, %v6657_v4 }
 0x3c6   : > { %v3589_v23 = vpop.permute.xlu0 %3588 }
 0x3c7   : > { %v6670_v21 = vmax.f32 %v6528_v3, %v3589_v23 }
 0x3c9   : > { %3716 = vrot.lane.b32.xlu0 %v6670_v21, %s5454_s7 }
 0x3ca   : > { %v3591_v38 = vpop.permute.xlu0 %3590 }
 0x3cb   : > { %v6675_v49 = vmax.f32 %v6531_v47, %v3591_v38 }
 0x3cd   : > { %3718 = vrot.lane.b32.xlu1 %v6675_v49, %s5454_s7 }
 0x3ce   : > { %v3593_v0 = vpop.permute.xlu1 %3592 }
 0x3cf   : > { %v6680_v31 = vmax.f32 %v6546_v27, %v3593_v0 }
 0x3d1   : > { %3720 = vrot.lane.b32.xlu0 %v6680_v31, %s5454_s7 }
 0x3d2   : > { %v3595_v42 = vpop.permute.xlu1 %3594 }
 0x3d3   : > { %v6685_v63 = vmax.f32 %v6549_v54, %v3595_v42 }
 0x3d5   : > { %3722 = vrot.lane.b32.xlu1 %v6685_v63, %s5454_s7 }
 0x3d6   : > { %v3597_v7 = vpop.permute.xlu0 %3596 }
 0x3d7   : > { %v6690_v1 = vmax.f32 %v6564_v29, %v3597_v7 }
 0x3d8   : > { %v3599_v13 = vpop.permute.xlu1 %3598 }
 0x3d9   : > { %v6693_v14 = vmax.f32 %v6567_v32, %v3599_v13  ;;  %3724 = vrot.lane.b32.xlu0 %v6690_v1, %s5454_s7 }
 0x3db   : > { %3726 = vrot.lane.b32.xlu1 %v6693_v14, %s5454_s7 }
 0x3de   : > { %v3601_v24 = vpop.permute.xlu0 %3600 }
 0x3df   : > { %v6700_v16 = vmax.f32 %v6582_v9, %v3601_v24 }
 0x3e0   : > { %v3603_v30 = vpop.permute.xlu1 %3602 }
 0x3e1   : > { %v6703_v52 = vmax.f32 %v6585_v18, %v3603_v30  ;;  %3728 = vrot.lane.b32.xlu0 %v6700_v16, %s5454_s7 }
 0x3e3   : > { %3730 = vrot.lane.b32.xlu1 %v6703_v52, %s5454_s7 }
 0x3e6   : > { %v3605_v55 = vpop.permute.xlu0 %3604 }
 0x3e7   : > { %v6710_v36 = vmax.f32 %v6600_v12, %v3605_v55 }
 0x3e8   : > { %v3607_v17 = vpop.permute.xlu1 %3606 }
 0x3e9   : > { %v6713_v62 = vmax.f32 %v6603_v50, %v3607_v17  ;;  %3732 = vrot.lane.b32.xlu0 %v6710_v36, %s5454_s7 }
 0x3eb   : > { %3734 = vrot.lane.b32.xlu1 %v6713_v62, %s5454_s7 }
 0x3ee   : > { %v3609_v34 = vpop.permute.xlu0 %3608 }
 0x3ef   : > { %v6720_v35 = vmax.f32 %v6618_v51, %v3609_v34 }
 0x3f0   : > { %v3611_v2 = vpop.permute.xlu1 %3610 }
 0x3f1   : > { %v6723_v5 = vmax.f32 %v6621_v33, %v3611_v2  ;;  %3736 = vrot.lane.b32.xlu0 %v6720_v35, %s5454_s7 }
 0x3f3   : > { %3738 = vrot.lane.b32.xlu1 %v6723_v5, %s5454_s7 }
 0x3f6   : > { %v3613_v20 = vpop.permute.xlu0 %3612 }
 0x3f7   : > { %v6730_v6 = vmax.f32 %v6636_v45, %v3613_v20 }
 0x3f8   : > { %v3615_v37 = vpop.permute.xlu1 %3614 }
 0x3f9   : > { %v6733_v39 = vmax.f32 %v6639_v56, %v3615_v37  ;;  %3740 = vrot.lane.b32.xlu0 %v6730_v6, %s5454_s7 }
 0x3fb   : > { %3742 = vrot.lane.b32.xlu1 %v6733_v39, %s5454_s7 }
 0x3fe   : > { %v3617_v40 = vpop.permute.xlu0 %3616 }
 0x3ff   : > { %v6740_v8 = vmax.f32 %v6654_v58, %v3617_v40 }
 0x400   : > { %v3619_v44 = vpop.permute.xlu1 %3618 }
 0x401   : > { %v6743_v46 = vmax.f32 %v6657_v4, %v3619_v44  ;;  %3744 = vrot.lane.b32.xlu0 %v6740_v8, %s5454_s7 }
 0x403   : > { %3746 = vrot.lane.b32.xlu1 %v6743_v46, %s5454_s7 }
 0x43b   : > { %v3717_v15 = vpop.permute.xlu0 %3716 }
 0x43c   : > { %v3764_v10 = vsub.f32 %v6528_v3, %v3717_v15 }
 0x43e   : > { %v3780_v11 = vmul.f32 1.442695, %v3764_v10 }
 0x43f   : > { %v3719_v19 = vpop.permute.xlu1 %3718 }
 0x440   : > { %5316 = vpow2.f32 %v3780_v11  ;;  %v3765_v57 = vsub.f32 %v6531_v47, %v3719_v19 }
 0x442   : > { %v3782_v59 = vmul.f32 1.442695, %v3765_v57 }
 0x443   : > { %v3721_v22 = vpop.permute.xlu0 %3720 }
 0x444   : > { %5318 = vpow2.f32 %v3782_v59  ;;  %v3766_v61 = vsub.f32 %v6546_v27, %v3721_v22 }
 0x446   : > { %v3784_v41 = vmul.f32 1.442695, %v3766_v61 }
 0x447   : > { %v3723_v43 = vpop.permute.xlu1 %3722 }
 0x448   : > { %5320 = vpow2.f32 %v3784_v41  ;;  %v3767_v48 = vsub.f32 %v6549_v54, %v3723_v43 }
 0x44a   : > { %v6753_v25 = vpop.eup %5316  ;;  %v3786_v26 = vmul.f32 1.442695, %v3767_v48 }
 0x44b   : > { %3828 = vrot.lane.b32.xlu0 %v6753_v25, %s5453_s6  ;;  %v3725_v28 = vpop.permute.xlu0 %3724 }
 0x44c   : > { %5322 = vpow2.f32 %v3786_v26  ;;  %v3768_v60 = vsub.f32 %v6564_v29, %v3725_v28 }
 0x44d   : > { %v3727_v53 = vpop.permute.xlu1 %3726 }
 0x44e   : > { %v6758_v23 = vpop.eup %5318  ;;  %v3788_v38 = vmul.f32 1.442695, %v3768_v60  ;;  %v3769_v0 = vsub.f32 %v6567_v32, %v3727_v53 }
 0x44f   : > { %3830 = vrot.lane.b32.xlu1 %v6758_v23, %s5453_s6 }
 0x450   : > { %5324 = vpow2.f32 %v3788_v38  ;;  %v3790_v42 = vmul.f32 1.442695, %v3769_v0 }
 0x452   : > { %v6763_v7 = vpop.eup %5320  ;;  %5326 = vpow2.f32 %v3790_v42 }
 0x453   : > { %3832 = vrot.lane.b32.xlu0 %v6763_v7, %s5453_s6  ;;  %v3729_v13 = vpop.permute.xlu0 %3728 }
 0x454   : > { %v3770_v24 = vsub.f32 %v6582_v9, %v3729_v13 }
 0x455   : > { %v3731_v30 = vpop.permute.xlu1 %3730 }
 0x456   : > { %v6768_v55 = vpop.eup %5322  ;;  %v3792_v17 = vmul.f32 1.442695, %v3770_v24  ;;  %v3771_v34 = vsub.f32 %v6585_v18, %v3731_v30 }
 0x457   : > { %3834 = vrot.lane.b32.xlu1 %v6768_v55, %s5453_s6 }
 0x458   : > { %5328 = vpow2.f32 %v3792_v17  ;;  %v3794_v2 = vmul.f32 1.442695, %v3771_v34 }
 0x45a   : > { %v6773_v20 = vpop.eup %5324  ;;  %5330 = vpow2.f32 %v3794_v2 }
 0x45b   : > { %3836 = vrot.lane.b32.xlu0 %v6773_v20, %s5453_s6  ;;  %v3733_v37 = vpop.permute.xlu0 %3732 }
 0x45c   : > { %v6777_v40 = vpop.eup %5326  ;;  %v3772_v44 = vsub.f32 %v6600_v12, %v3733_v37 }
 0x45d   : > { %3838 = vrot.lane.b32.xlu1 %v6777_v40, %s5453_s6  ;;  %v3735_v15 = vpop.permute.xlu1 %3734 }
 0x45e   : > { %v3796_v10 = vmul.f32 1.442695, %v3772_v44  ;;  %v3773_v11 = vsub.f32 %v6603_v50, %v3735_v15 }
 0x460   : > { %5332 = vpow2.f32 %v3796_v10  ;;  %v3798_v19 = vmul.f32 1.442695, %v3773_v11 }
 0x462   : > { %v6783_v57 = vpop.eup %5328  ;;  %5334 = vpow2.f32 %v3798_v19 }
 0x463   : > { %3840 = vrot.lane.b32.xlu0 %v6783_v57, %s5453_s6  ;;  %v3737_v59 = vpop.permute.xlu0 %3736 }
 0x464   : > { %v6787_v22 = vpop.eup %5330  ;;  %v3774_v61 = vsub.f32 %v6618_v51, %v3737_v59 }
 0x465   : > { %3842 = vrot.lane.b32.xlu1 %v6787_v22, %s5453_s6  ;;  %v3739_v41 = vpop.permute.xlu1 %3738 }
 0x466   : > { %v3800_v43 = vmul.f32 1.442695, %v3774_v61  ;;  %v3775_v48 = vsub.f32 %v6621_v33, %v3739_v41  ;;  %v3652_v41 = vsub.f32 %v6528_v3, %v6670_v21  ;;  %v3657_v21 = vsub.f32 %v6567_v32, %v6693_v14 }
 0x468   : > { %5336 = vpow2.f32 %v3800_v43  ;;  %v3802_v26 = vmul.f32 1.442695, %v3775_v48  ;;  %v3668_v43 = vmul.f32 1.442695, %v3652_v41  ;;  %v3653_v48 = vsub.f32 %v6531_v47, %v6675_v49 }
 0x46a   : > { %v6793_v28 = vpop.eup %5332  ;;  %5338 = vpow2.f32 %v3802_v26  ;;  %v3670_v26 = vmul.f32 1.442695, %v3653_v48 }
 0x46b   : > { %3844 = vrot.lane.b32.xlu0 %v6793_v28, %s5453_s6  ;;  %v3741_v60 = vpop.permute.xlu0 %3740 }
 0x46c   : > { %v6797_v53 = vpop.eup %5334  ;;  %v3776_v38 = vsub.f32 %v6636_v45, %v3741_v60  ;;  %v3654_v60 = vsub.f32 %v6546_v27, %v6680_v31  ;;  %v3678_v31 = vmul.f32 1.442695, %v3657_v21  ;;  %v3663_v21 = vsub.f32 %v6621_v33, %v6723_v5 }
 0x46d   : > { %3846 = vrot.lane.b32.xlu1 %v6797_v53, %s5453_s6  ;;  %v3743_v0 = vpop.permute.xlu1 %3742 }
 0x46e   : > { %v3804_v42 = vmul.f32 1.442695, %v3776_v38  ;;  %v3777_v13 = vsub.f32 %v6639_v56, %v3743_v0  ;;  %v3672_v38 = vmul.f32 1.442695, %v3654_v60  ;;  %v3655_v0 = vsub.f32 %v6549_v54, %v6685_v63 }
 0x46f   : > { %v3658_v54 = vsub.f32 %v6582_v9, %v6700_v16 }
 0x470   : > { %5340 = vpow2.f32 %v3804_v42  ;;  %v3806_v24 = vmul.f32 1.442695, %v3777_v13  ;;  %v3674_v42 = vmul.f32 1.442695, %v3655_v0  ;;  %v3656_v13 = vsub.f32 %v6564_v29, %v6690_v1 }
 0x471   : > { %v3659_v29 = vsub.f32 %v6585_v18, %v6703_v52  ;;  %v3680_v14 = vmul.f32 1.442695, %v3658_v54  ;;  %v3661_v18 = vsub.f32 %v6603_v50, %v6713_v62  ;;  %v3662_v50 = vsub.f32 %v6618_v51, %v6720_v35 }
 0x472   : > { %v6803_v30 = vpop.eup %5336  ;;  %5342 = vpow2.f32 %v3806_v24  ;;  %v3676_v24 = vmul.f32 1.442695, %v3656_v13 }
 0x473   : > { %3848 = vrot.lane.b32.xlu0 %v6803_v30, %s5453_s6  ;;  %v3745_v17 = vpop.permute.xlu0 %3744 }
 0x474   : > { %v6807_v34 = vpop.eup %5338  ;;  %v3778_v2 = vsub.f32 %v6654_v58, %v3745_v17 }
 0x475   : > { %3850 = vrot.lane.b32.xlu1 %v6807_v34, %s5453_s6  ;;  %v3747_v37 = vpop.permute.xlu1 %3746 }
 0x476   : > { %v3808_v44 = vmul.f32 1.442695, %v3778_v2  ;;  %v3779_v15 = vsub.f32 %v6657_v4, %v3747_v37 }
 0x478   : > { %5344 = vpow2.f32 %v3808_v44  ;;  %v3810_v10 = vmul.f32 1.442695, %v3779_v15  ;;  %v3682_v44 = vmul.f32 1.442695, %v3659_v29 }
 0x47a   : > { %v6813_v11 = vpop.eup %5340  ;;  %5346 = vpow2.f32 %v3810_v10 }
 0x47b   : > { %3852 = vrot.lane.b32.xlu0 %v6813_v11, %s5453_s6  ;;  %5348 = vpow2.f32 %v3668_v43  ;;  %v3660_v43 = vsub.f32 %v6600_v12, %v6710_v36  ;;  %v3686_v36 = vmul.f32 1.442695, %v3661_v18  ;;  %v3667_v18 = vsub.f32 %v6657_v4, %v6743_v46 }
 0x47c   : > { %v6817_v19 = vpop.eup %5342  ;;  %5350 = vpow2.f32 %v3670_v26 }
 0x47d   : > { %3854 = vrot.lane.b32.xlu1 %v6817_v19, %s5453_s6  ;;  %5352 = vpow2.f32 %v3672_v38  ;;  %v3684_v38 = vmul.f32 1.442695, %v3660_v43 }
 0x47e   : > { %5354 = vpow2.f32 %v3674_v42 }
 0x482   : > { %v6821_v59 = vpop.eup %5344 }
 0x483   : > { %3856 = vrot.lane.b32.xlu0 %v6821_v59, %s5453_s6 }
 0x484   : > { %v6825_v61 = vpop.eup %5346 }
 0x485   : > { %3858 = vrot.lane.b32.xlu1 %v6825_v61, %s5453_s6  ;;  %v5349_v3 = vpop.eup %5348 }
 0x486   : > { %v5351_v27 = vpop.eup %5350 }
 0x487   : > { %v5353_v63 = vpop.eup %5352 }
 0x488   : > { %v5355_v37 = vpop.eup %5354 }
 0x4bd   : > { %v3829_v47 = vpop.permute.xlu0 %3828 }
 0x4be   : > { %v3876_v49 = vadd.f32 %v5349_v3, %v3829_v47 }
 0x4c0   : > { %5356 = vrcp.f32 %v3876_v49 }
 0x4c1   : > { %v3831_v17 = vpop.permute.xlu1 %3830  ;;  %5358 = vpow2.f32 %v3676_v24 }
 0x4c2   : > { %v3877_v2 = vadd.f32 %v5351_v27, %v3831_v17 }
 0x4c4   : > { %5360 = vrcp.f32 %v3877_v2  ;;  %v3690_v2 = vmul.f32 1.442695, %v3663_v21 }
 0x4c5   : > { %5362 = vpow2.f32 %v3678_v31  ;;  %v3833_v32 = vpop.permute.xlu0 %3832  ;;  %v3688_v31 = vmul.f32 1.442695, %v3662_v50 }
 0x4c6   : > { %v3878_v1 = vadd.f32 %v5353_v63, %v3833_v32  ;;  %v3665_v32 = vsub.f32 %v6639_v56, %v6733_v39  ;;  %v3666_v56 = vsub.f32 %v6654_v58, %v6740_v8  ;;  %v3698_v58 = vmul.f32 1.442695, %v3667_v18 }
 0x4c8   : > { %5364 = vrcp.f32 %v3878_v1 }
 0x4c9   : > { %v3835_v15 = vpop.permute.xlu1 %3834  ;;  %5366 = vpow2.f32 %v3680_v14 }
 0x4ca   : > { %v5357_v10 = vpop.eup %5356  ;;  %v3879_v41 = vadd.f32 %v5355_v37, %v3835_v15 }
 0x4cb   : > { %4038 = vrot.lane.b32.xlu0 %v5357_v10, %s5454_s7  ;;  %v5359_v9 = vpop.eup %5358  ;;  %v3925_v52 = vmul.f32 %v5357_v10, %v5349_v3  ;;  %v3694_v10 = vmul.f32 1.442695, %v3665_v32 }
 0x4cc   : > { %5368 = vrcp.f32 %v3879_v41 }
 0x4cd   : > { %5370 = vpow2.f32 %v3682_v44  ;;  %v3837_v16 = vpop.permute.xlu0 %3836 }
 0x4ce   : > { %v5361_v48 = vpop.eup %5360  ;;  %v3880_v26 = vadd.f32 %v5359_v9, %v3837_v16 }
 0x4cf   : > { %v5363_v60 = vpop.eup %5362  ;;  %4040 = vrot.lane.b32.xlu1 %v5361_v48, %s5454_s7  ;;  %v3839_v0 = vpop.permute.xlu1 %3838  ;;  %3957 = vrot.lane.b32.xlu0 %v3925_v52, %s5455_s8  ;;  %v3926_v42 = vmul.f32 %v5361_v48, %v5351_v27 }
 0x4d0   : > { %5372 = vrcp.f32 %v3880_v26  ;;  %v3881_v12 = vadd.f32 %v5363_v60, %v3839_v0 }
 0x4d2   : > { %v5365_v13 = vpop.eup %5364  ;;  %5374 = vrcp.f32 %v3881_v12 }
 0x4d3   : > { %5376 = vpow2.f32 %v3684_v38  ;;  %3959 = vrot.lane.b32.xlu1 %v3926_v42, %s5455_s8  ;;  %4042 = vrot.lane.b32.xlu0 %v5365_v13, %s5454_s7  ;;  %v6856_v62 = vmul.f32 %v5365_v13, %v5353_v63  ;;  %v5367_v3 = vpop.eup %5366  ;;  %v3664_v63 = vsub.f32 %v6636_v45, %v6730_v6 }
 0x4d4   : > { %5378 = vpow2.f32 %v3686_v36 }
 0x4d5   : > { %v3841_v47 = vpop.permute.xlu0 %3840  ;;  %v3692_v45 = vmul.f32 1.442695, %v3664_v63 }
 0x4d6   : > { %v5369_v49 = vpop.eup %5368  ;;  %v3882_v24 = vadd.f32 %v5367_v3, %v3841_v47 }
 0x4d7   : > { %v5371_v27 = vpop.eup %5370  ;;  %4044 = vrot.lane.b32.xlu1 %v5369_v49, %s5454_s7  ;;  %v3843_v17 = vpop.permute.xlu1 %3842  ;;  %v6861_v51 = vmul.f32 %v5369_v49, %v5355_v37 }
 0x4d8   : > { %5380 = vrcp.f32 %v3882_v24  ;;  %v3883_v35 = vadd.f32 %v5371_v27, %v3843_v17 }
 0x4da   : > { %v5373_v54 = vpop.eup %5372  ;;  %5382 = vrcp.f32 %v3883_v35 }
 0x4db   : > { %5384 = vpow2.f32 %v3688_v31  ;;  %4046 = vrot.lane.b32.xlu0 %v5373_v54, %s5454_s7  ;;  %v6866_v33 = vmul.f32 %v5373_v54, %v5359_v9 }
 0x4dc   : > { %v5375_v5 = vpop.eup %5374  ;;  %5386 = vpow2.f32 %v3690_v2 }
 0x4dd   : > { %v6868_v29 = vpop.eup %5376  ;;  %4048 = vrot.lane.b32.xlu1 %v5375_v5, %s5454_s7  ;;  %v3845_v1 = vpop.permute.xlu0 %3844  ;;  %v6873_v14 = vmul.f32 %v5375_v5, %v5363_v60  ;;  %v3696_v60 = vmul.f32 1.442695, %v3666_v56 }
 0x4de   : > { %v3884_v37 = vadd.f32 %v6868_v29, %v3845_v1  ;;  %v6876_v44 = vpop.eup %5378 }
 0x4df   : > { %v3847_v6 = vpop.permute.xlu1 %3846 }
 0x4e0   : > { %5388 = vrcp.f32 %v3884_v37  ;;  %v3885_v15 = vadd.f32 %v6876_v44, %v3847_v6 }
 0x4e2   : > { %v5381_v41 = vpop.eup %5380  ;;  %5390 = vrcp.f32 %v3885_v15 }
 0x4e3   : > { %5392 = vpow2.f32 %v3692_v45  ;;  %4050 = vrot.lane.b32.xlu0 %v5381_v41, %s5454_s7  ;;  %v3931_v39 = vmul.f32 %v5381_v41, %v5367_v3 }
 0x4e4   : > { %v5383_v43 = vpop.eup %5382  ;;  %5394 = vpow2.f32 %v3694_v10 }
 0x4e5   : > { %v5385_v9 = vpop.eup %5384  ;;  %4052 = vrot.lane.b32.xlu1 %v5383_v43, %s5454_s7  ;;  %v3849_v16 = vpop.permute.xlu0 %3848  ;;  %v3932_v52 = vmul.f32 %v5383_v43, %v5371_v27 }
 0x4e6   : > { %v3886_v48 = vadd.f32 %v5385_v9, %v3849_v16  ;;  %v5387_v26 = vpop.eup %5386 }
 0x4e7   : > { %v3851_v38 = vpop.permute.xlu1 %3850 }
 0x4e8   : > { %5396 = vrcp.f32 %v3886_v48  ;;  %v3887_v0 = vadd.f32 %v5387_v26, %v3851_v38 }
 0x4ea   : > { %v5389_v8 = vpop.eup %5388  ;;  %5398 = vrcp.f32 %v3887_v0 }
 0x4eb   : > { %5400 = vpow2.f32 %v3696_v60  ;;  %4054 = vrot.lane.b32.xlu0 %v5389_v8, %s5454_s7  ;;  %v3933_v5 = vmul.f32 %v5389_v8, %v6868_v29 }
 0x4ec   : > { %v5391_v12 = vpop.eup %5390  ;;  %5402 = vpow2.f32 %v3698_v58 }
 0x4ed   : > { %v5393_v36 = vpop.eup %5392  ;;  %4056 = vrot.lane.b32.xlu1 %v5391_v12, %s5454_s7  ;;  %v3853_v4 = vpop.permute.xlu0 %3852  ;;  %v3934_v32 = vmul.f32 %v5391_v12, %v6876_v44 }
 0x4ee   : > { %v3888_v46 = vadd.f32 %v5393_v36, %v3853_v4  ;;  %v5395_v42 = vpop.eup %5394 }
 0x4ef   : > { %v3855_v13 = vpop.permute.xlu1 %3854 }
 0x4f0   : > { %5404 = vrcp.f32 %v3888_v46  ;;  %v3889_v50 = vadd.f32 %v5395_v42, %v3855_v13 }
 0x4f2   : > { %v5397_v3 = vpop.eup %5396  ;;  %5406 = vrcp.f32 %v3889_v50 }
 0x4f3   : > { %4058 = vrot.lane.b32.xlu0 %v5397_v3, %s5454_s7 }
 0x4f4   : > { %v5399_v21 = vpop.eup %5398 }
 0x4f5   : > { %v5401_v47 = vpop.eup %5400  ;;  %4060 = vrot.lane.b32.xlu1 %v5399_v21, %s5454_s7  ;;  %v3857_v49 = vpop.permute.xlu0 %3856 }
 0x4f6   : > { %v3890_v24 = vadd.f32 %v5401_v47, %v3857_v49  ;;  %v5403_v27 = vpop.eup %5402 }
 0x4f7   : > { %v3859_v31 = vpop.permute.xlu1 %3858 }
 0x4f8   : > { %5408 = vrcp.f32 %v3890_v24  ;;  %v3891_v17 = vadd.f32 %v5403_v27, %v3859_v31 }
 0x4fa   : > { %v5405_v35 = vpop.eup %5404  ;;  %5410 = vrcp.f32 %v3891_v17 }
 0x4fb   : > { %4062 = vrot.lane.b32.xlu0 %v5405_v35, %s5454_s7 }
 0x4fc   : > { %v5407_v2 = vpop.eup %5406 }
 0x4fd   : > { %4064 = vrot.lane.b32.xlu1 %v5407_v2, %s5454_s7  ;;  %v3938_v1 = vmul.f32 %v5407_v2, %v5395_v42 }
 0x502   : > { %v5409_v54 = vpop.eup %5408 }
 0x503   : > { %4066 = vrot.lane.b32.xlu0 %v5409_v54, %s5454_s7  ;;  %v3939_v29 = vmul.f32 %v5409_v54, %v5401_v47 }
 0x504   : > { %v5411_v63 = vpop.eup %5410 }
 0x505   : > { %4068 = vrot.lane.b32.xlu1 %v5411_v63, %s5454_s7 }
 0x507   : > { %3961 = vrot.lane.b32.xlu0 %v6856_v62, %s5455_s8  ;;  %v3935_v62 = vmul.f32 %v5397_v3, %v5385_v9 }
 0x509   : > { %3963 = vrot.lane.b32.xlu1 %v6861_v51, %s5455_s8  ;;  %v3936_v51 = vmul.f32 %v5399_v21, %v5387_v26 }
 0x50b   : > { %3965 = vrot.lane.b32.xlu0 %v6866_v33, %s5455_s8  ;;  %v3937_v33 = vmul.f32 %v5405_v35, %v5393_v36 }
 0x50d   : > { %3967 = vrot.lane.b32.xlu1 %v6873_v14, %s5455_s8  ;;  %v3940_v14 = vmul.f32 %v5411_v63, %v5403_v27 }
 0x50f   : > { %3969 = vrot.lane.b32.xlu0 %v3931_v39, %s5455_s8 }
 0x511   : > { %3971 = vrot.lane.b32.xlu1 %v3932_v52, %s5455_s8 }
 0x513   : > { %3973 = vrot.lane.b32.xlu0 %v3933_v5, %s5455_s8 }
 0x515   : > { %3975 = vrot.lane.b32.xlu1 %v3934_v32, %s5455_s8 }
 0x517   : > { %3977 = vrot.lane.b32.xlu0 %v3935_v62, %s5455_s8 }
 0x519   : > { %3979 = vrot.lane.b32.xlu1 %v3936_v51, %s5455_s8 }
 0x51b   : > { %3981 = vrot.lane.b32.xlu0 %v3937_v33, %s5455_s8 }
 0x51d   : > { %3983 = vrot.lane.b32.xlu1 %v3938_v1, %s5455_s8 }
 0x51f   : > { %3985 = vrot.lane.b32.xlu0 %v3939_v29, %s5455_s8 }
 0x521   : > { %3987 = vrot.lane.b32.xlu1 %v3940_v14, %s5455_s8 }
 0x53d   : > { %v4039_v37 = vpop.permute.xlu0 %4038 }
 0x53e   : > { %v4086_v44 = vmul.f32 %v6753_v25, %v4039_v37 }
 0x540   : > { %4118 = vrot.lane.b32.xlu0 %v4086_v44, %s5455_s8 }
 0x541   : > { %v4041_v45 = vpop.permute.xlu1 %4040  ;;  %v3958_v6 = vpop.permute.xlu0 %3957 }
 0x542   : > { %v4087_v15 = vmul.f32 %v6758_v23, %v4041_v45  ;;  %4006 = vst.msk [vmem:[%s6525_s30] sm:$0xff] %vm4005_vm2, %v3958_v6 }
 0x544   : > { %4120 = vrot.lane.b32.xlu1 %v4087_v15, %s5455_s8 }
 0x545   : > { %v3960_v10 = vpop.permute.xlu1 %3959  ;;  %v4043_v41 = vpop.permute.xlu0 %4042 }
 0x546   : > { %4007 = vst.msk [vmem:[%s6525_s30 + $0x8] sm:$0xff] %vm4005_vm2, %v3960_v10  ;;  %v4088_v56 = vmul.f32 %v6763_v7, %v4043_v41 }
 0x548   : > { %4122 = vrot.lane.b32.xlu0 %v4088_v56, %s5455_s8 }
 0x549   : > { %v4045_v25 = vpop.permute.xlu1 %4044 }
 0x54a   : > { %v4089_v39 = vmul.f32 %v6768_v55, %v4045_v25 }
 0x54c   : > { %4124 = vrot.lane.b32.xlu1 %v4089_v39, %s5455_s8 }
 0x54d   : > { %v4047_v43 = vpop.permute.xlu0 %4046 }
 0x54e   : > { %v4090_v23 = vmul.f32 %v6773_v20, %v4047_v43 }
 0x54f   : > { %v4049_v9 = vpop.permute.xlu1 %4048 }
 0x550   : > { %v4091_v18 = vmul.f32 %v6777_v40, %v4049_v9  ;;  %4126 = vrot.lane.b32.xlu0 %v4090_v23, %s5455_s8 }
 0x552   : > { %4128 = vrot.lane.b32.xlu1 %v4091_v18, %s5455_s8 }
 0x555   : > { %v4051_v16 = vpop.permute.xlu0 %4050 }
 0x556   : > { %v4092_v7 = vmul.f32 %v6783_v57, %v4051_v16 }
 0x557   : > { %v4053_v52 = vpop.permute.xlu1 %4052 }
 0x558   : > { %v4093_v48 = vmul.f32 %v6787_v22, %v4053_v52  ;;  %4130 = vrot.lane.b32.xlu0 %v4092_v7, %s5455_s8 }
 0x55a   : > { %4132 = vrot.lane.b32.xlu1 %v4093_v48, %s5455_s8 }
 0x55d   : > { %v4055_v55 = vpop.permute.xlu0 %4054 }
 0x55e   : > { %v4094_v20 = vmul.f32 %v6793_v28, %v4055_v55 }
 0x55f   : > { %v4057_v26 = vpop.permute.xlu1 %4056 }
 0x560   : > { %v4095_v40 = vmul.f32 %v6797_v53, %v4057_v26  ;;  %4134 = vrot.lane.b32.xlu0 %v4094_v20, %s5455_s8 }
 0x562   : > { %4136 = vrot.lane.b32.xlu1 %v4095_v40, %s5455_s8 }
 0x565   : > { %v4059_v60 = vpop.permute.xlu0 %4058 }
 0x566   : > { %v4096_v57 = vmul.f32 %v6803_v30, %v4059_v60 }
 0x567   : > { %v4061_v38 = vpop.permute.xlu1 %4060 }
 0x568   : > { %v4097_v22 = vmul.f32 %v6807_v34, %v4061_v38  ;;  %4138 = vrot.lane.b32.xlu0 %v4096_v57, %s5455_s8 }
 0x56a   : > { %4140 = vrot.lane.b32.xlu1 %v4097_v22, %s5455_s8 }
 0x56d   : > { %v4063_v28 = vpop.permute.xlu0 %4062 }
 0x56e   : > { %v4098_v0 = vmul.f32 %v6813_v11, %v4063_v28 }
 0x56f   : > { %v4065_v53 = vpop.permute.xlu1 %4064 }
 0x570   : > { %v4099_v58 = vmul.f32 %v6817_v19, %v4065_v53  ;;  %4142 = vrot.lane.b32.xlu0 %v4098_v0, %s5455_s8 }
 0x572   : > { %4144 = vrot.lane.b32.xlu1 %v4099_v58, %s5455_s8 }
 0x575   : > { %v4067_v30 = vpop.permute.xlu0 %4066 }
 0x576   : > { %v4100_v34 = vmul.f32 %v6821_v59, %v4067_v30 }
 0x577   : > { %v4069_v8 = vpop.permute.xlu1 %4068 }
 0x578   : > { %v4101_v12 = vmul.f32 %v6825_v61, %v4069_v8  ;;  %4146 = vrot.lane.b32.xlu0 %v4100_v34, %s5455_s8 }
 0x579   : > { %v3962_v11 = vpop.permute.xlu0 %3961 }
 0x57a   : > { %4008 = vst.msk [vmem:[%s6525_s30 + $0x10] sm:$0xff] %vm4005_vm2, %v3962_v11  ;;  %4148 = vrot.lane.b32.xlu1 %v4101_v12, %s5455_s8 }
 0x57b   : > { %v3964_v19 = vpop.permute.xlu1 %3963 }
 0x57c   : > { %4009 = vst.msk [vmem:[%s6525_s30 + $0x18] sm:$0xff] %vm4005_vm2, %v3964_v19 }
 0x57d   : > { %v3966_v36 = vpop.permute.xlu0 %3965 }
 0x57e   : > { %4010 = vst.msk [vmem:[%s6525_s30 + $0x20] sm:$0xff] %vm4005_vm2, %v3966_v36 }
 0x57f   : > { %v3968_v59 = vpop.permute.xlu1 %3967 }
 0x580   : > { %4011 = vst.msk [vmem:[%s6525_s30 + $0x28] sm:$0xff] %vm4005_vm2, %v3968_v59 }
 0x581   : > { %v3970_v61 = vpop.permute.xlu0 %3969 }
 0x582   : > { %4012 = vst.msk [vmem:[%s6525_s30 + $0x30] sm:$0xff] %vm4005_vm2, %v3970_v61 }
 0x583   : > { %v3972_v4 = vpop.permute.xlu1 %3971 }
 0x584   : > { %4013 = vst.msk [vmem:[%s6525_s30 + $0x38] sm:$0xff] %vm4005_vm2, %v3972_v4 }
 0x585   : > { %v3974_v46 = vpop.permute.xlu0 %3973 }
 0x586   : > { %4014 = vst.msk [vmem:[%s6525_s30 + $0x40] sm:$0xff] %vm4005_vm2, %v3974_v46 }
 0x587   : > { %v3976_v42 = vpop.permute.xlu1 %3975 }
 0x588   : > { %4015 = vst.msk [vmem:[%s6525_s30 + $0x48] sm:$0xff] %vm4005_vm2, %v3976_v42 }
 0x589   : > { %v3978_v13 = vpop.permute.xlu0 %3977 }
 0x58a   : > { %4016 = vst.msk [vmem:[%s6525_s30 + $0x50] sm:$0xff] %vm4005_vm2, %v3978_v13 }
 0x58b   : > { %v3980_v50 = vpop.permute.xlu1 %3979 }
 0x58c   : > { %4017 = vst.msk [vmem:[%s6525_s30 + $0x58] sm:$0xff] %vm4005_vm2, %v3980_v50 }
 0x58d   : > { %v3982_v3 = vpop.permute.xlu0 %3981 }
 0x58e   : > { %4018 = vst.msk [vmem:[%s6525_s30 + $0x60] sm:$0xff] %vm4005_vm2, %v3982_v3 }
 0x58f   : > { %v3984_v21 = vpop.permute.xlu1 %3983 }
 0x590   : > { %4019 = vst.msk [vmem:[%s6525_s30 + $0x68] sm:$0xff] %vm4005_vm2, %v3984_v21 }
 0x591   : > { %v3986_v47 = vpop.permute.xlu0 %3985 }
 0x592   : > { %4020 = vst.msk [vmem:[%s6525_s30 + $0x70] sm:$0xff] %vm4005_vm2, %v3986_v47 }
 0x593   : > { %v3988_v49 = vpop.permute.xlu1 %3987 }
 0x594   : > { %4021 = vst.msk [vmem:[%s6525_s30 + $0x78] sm:$0xff] %vm4005_vm2, %v3988_v49 }
 0x5b2   : > { %v4119_v24 = vpop.permute.xlu0 %4118 }
 0x5b3   : > { %4167 = vst.msk [vmem:[%s6525_s30] sm:$0xff] %vm4166_vm3, %v4119_v24 }
 0x5b6   : > { %v4121_v27 = vpop.permute.xlu1 %4120 }
 0x5b7   : > { %4168 = vst.msk [vmem:[%s6525_s30 + $0x8] sm:$0xff] %vm4166_vm3, %v4121_v27 }
 0x5ba   : > { %v4123_v31 = vpop.permute.xlu0 %4122 }
 0x5bb   : > { %4169 = vst.msk [vmem:[%s6525_s30 + $0x10] sm:$0xff] %vm4166_vm3, %v4123_v31 }
 0x5be   : > { %v4125_v17 = vpop.permute.xlu1 %4124 }
 0x5bf   : > { %4170 = vst.msk [vmem:[%s6525_s30 + $0x18] sm:$0xff] %vm4166_vm3, %v4125_v17 }
 0x5c2   : > { %v4127_v35 = vpop.permute.xlu0 %4126 }
 0x5c3   : > { %4171 = vst.msk [vmem:[%s6525_s30 + $0x20] sm:$0xff] %vm4166_vm3, %v4127_v35 }
 0x5c4   : > { %v4129_v2 = vpop.permute.xlu1 %4128 }
 0x5c5   : > { %4172 = vst.msk [vmem:[%s6525_s30 + $0x28] sm:$0xff] %vm4166_vm3, %v4129_v2 }
 0x5ca   : > { %v4131_v54 = vpop.permute.xlu0 %4130 }
 0x5cb   : > { %4173 = vst.msk [vmem:[%s6525_s30 + $0x30] sm:$0xff] %vm4166_vm3, %v4131_v54 }
 0x5cc   : > { %v4133_v63 = vpop.permute.xlu1 %4132 }
 0x5cd   : > { %4174 = vst.msk [vmem:[%s6525_s30 + $0x38] sm:$0xff] %vm4166_vm3, %v4133_v63 }
 0x5d2   : > { %v4135_v5 = vpop.permute.xlu0 %4134 }
 0x5d3   : > { %4175 = vst.msk [vmem:[%s6525_s30 + $0x40] sm:$0xff] %vm4166_vm3, %v4135_v5 }
 0x5d4   : > { %v4137_v32 = vpop.permute.xlu1 %4136 }
 0x5d5   : > { %4176 = vst.msk [vmem:[%s6525_s30 + $0x48] sm:$0xff] %vm4166_vm3, %v4137_v32 }
 0x5da   : > { %v4139_v62 = vpop.permute.xlu0 %4138 }
 0x5db   : > { %4177 = vst.msk [vmem:[%s6525_s30 + $0x50] sm:$0xff] %vm4166_vm3, %v4139_v62 }
 0x5dc   : > { %v4141_v51 = vpop.permute.xlu1 %4140 }
 0x5dd   : > { %4178 = vst.msk [vmem:[%s6525_s30 + $0x58] sm:$0xff] %vm4166_vm3, %v4141_v51 }
 0x5e2   : > { %v4143_v33 = vpop.permute.xlu0 %4142 }
 0x5e3   : > { %4179 = vst.msk [vmem:[%s6525_s30 + $0x60] sm:$0xff] %vm4166_vm3, %v4143_v33 }
 0x5e4   : > { %v4145_v1 = vpop.permute.xlu1 %4144 }
 0x5e5   : > { %4180 = vst.msk [vmem:[%s6525_s30 + $0x68] sm:$0xff] %vm4166_vm3, %v4145_v1 }
 0x5ea   : > { %v4147_v29 = vpop.permute.xlu0 %4146 }
 0x5eb   : > { %4181 = vst.msk [vmem:[%s6525_s30 + $0x70] sm:$0xff] %vm4166_vm3, %v4147_v29 }
 0x5ec   : > { %v4149_v14 = vpop.permute.xlu1 %4148 }
 0x5ed   : > { %4182 = vst.msk [vmem:[%s6525_s30 + $0x78] sm:$0xff] %vm4166_vm3, %v4149_v14 }
 0x5ee PF: > { %s15_s22 = sadd.s32 1, %s5450_s22   ;;  %s7030_s18 = smov %s5442_s20 }
 0x5ef   : > { %p12_p8 = scmp.ge.s32.totalorder %s15_s22, 6   ;;  %s7031_s19 = smov %s5446_s21 }
 0x5f0   : > { %s7032_s20 = smov %s7035_s23  ;;  %s7033_s21 = smov %s7039_s24 }
 0x5f1   :  { %14 = sbr.rel (!%p12_p8) target bundleno = 3 (0x3), region = 73 }

</bundles_post_ra>
